<compile_context>
chip_gen: v7x
topology: tpu7x:2x2x1
jax: 0.10.0
libtpu: 0.0.40
codegen_flags: <defaults>
</compile_context>

<pallas_src>
import functools

import jax
import jax.numpy as jnp
from jax.experimental import pallas as pl
from jax.experimental.pallas import tpu as pltpu


def _vmem_limit_bytes():
    """Scoped-VMEM budget per generation (v7x: 64 MiB physical, v5e/v6e: 128)."""
    try:
        cap = pltpu.get_tpu_info().vmem_capacity_bytes
    except Exception:
        cap = 128 * 1024 * 1024
    return int(min(cap * 3 // 4, 100 * 1024 * 1024))


def _pick_spatial_tile(S, max_rows=4096):
    if S <= max_rows:
        return S
    for rows in range(max_rows - max_rows % 8, 0, -8):
        if S % rows == 0:
            return rows
    return S


def _pick_depth_tile(D, HW, max_rows=4096):
    for d in range(D, 0, -1):
        if D % d == 0 and d * HW <= max_rows:
            return d
    return 1


# ---------------------------------------------------------------------------
# Kernel A: fused (x + [t|v] @ Wtv + bias) -> tiled two-pass GroupNorm(8)
#           -> affine -> SiLU.   Grid (N, pass, tile).
# ---------------------------------------------------------------------------
def _proj_gn_silu_kernel(x_ref, tv_ref, w_ref, b_ref, g_ref, be_ref, gavg_ref,
                         o_ref, sum_ref, sq_ref, mean_ref, rstd_ref, *, eps):
    p = pl.program_id(1)        # 0: stats pass, 1: normalize pass
    ti = pl.program_id(2)

    # Single K=(Ct+Cv) projection matmul + residual + combined bias (f32 acc).
    h = (x_ref[0]
         + jnp.dot(tv_ref[0], w_ref[...], preferred_element_type=jnp.float32)
         + b_ref[...])                                           # (St, C) f32

    @pl.when(p == 0)
    def _():
        @pl.when(ti == 0)
        def _():
            sum_ref[...] = jnp.zeros_like(sum_ref)
            sq_ref[...] = jnp.zeros_like(sq_ref)
        sum_ref[...] += jnp.sum(h, axis=0, keepdims=True)
        sq_ref[...] += jnp.sum(h * h, axis=0, keepdims=True)

    @pl.when((p == 1) & (ti == 0))
    def _():
        # gavg (C, C) averages per-channel partials within each group and
        # folds the 1/(S * C_per_group) factor.
        mean_c = jnp.dot(sum_ref[...], gavg_ref[...],
                         preferred_element_type=jnp.float32)
        ex2_c = jnp.dot(sq_ref[...], gavg_ref[...],
                        preferred_element_type=jnp.float32)
        var_c = jnp.maximum(ex2_c - mean_c * mean_c, 0.0)
        mean_ref[...] = mean_c
        rstd_ref[...] = jax.lax.rsqrt(var_c + eps)

    @pl.when(p == 1)
    def _():
        y = (h - mean_ref[...]) * rstd_ref[...] * g_ref[...] + be_ref[...]
        o_ref[0] = (y * jax.nn.sigmoid(y)).astype(o_ref.dtype)   # SiLU, bf16


def fused_proj_gn_silu(x2, tv2, wtv, bias, gamma, beta, gavg, *, eps, st):
    """x2: (N,S,C) f32; tv2: (N,S,Ct+Cv) bf16; returns (N,S,C) bf16."""
    N, S, C = x2.shape
    Ctv = tv2.shape[-1]
    T = S // st
    kernel = functools.partial(_proj_gn_silu_kernel, eps=eps)
    return pl.pallas_call(
        kernel,
        out_shape=jax.ShapeDtypeStruct((N, S, C), jnp.bfloat16),
        grid=(N, 2, T),
        in_specs=[
            pl.BlockSpec((1, st, C), lambda n, p, ti: (n, ti, 0)),
            pl.BlockSpec((1, st, Ctv), lambda n, p, ti: (n, ti, 0)),
            pl.BlockSpec((Ctv, C), lambda n, p, ti: (0, 0)),
            pl.BlockSpec((1, C), lambda n, p, ti: (0, 0)),
            pl.BlockSpec((1, C), lambda n, p, ti: (0, 0)),
            pl.BlockSpec((1, C), lambda n, p, ti: (0, 0)),
            pl.BlockSpec((C, C), lambda n, p, ti: (0, 0)),
        ],
        # Pass 0 never writes the output; parking its (unwritten) block at
        # tile 0 keeps the block index constant, so no garbage writebacks.
        out_specs=pl.BlockSpec((1, st, C), lambda n, p, ti: (n, ti * p, 0)),
        scratch_shapes=[pltpu.VMEM((1, C), jnp.float32)] * 4,
        compiler_params=pltpu.CompilerParams(
            dimension_semantics=("parallel", "arbitrary", "arbitrary"),
            vmem_limit_bytes=_vmem_limit_bytes()),
    )(x2, tv2, wtv, bias, gamma, beta, gavg)


# ---------------------------------------------------------------------------
# Kernel B: sub-pixel ConvTranspose3d (k=3, s=2, p=1, op=1) as a 2x2x2
# stride-1 conv over the UNPADDED activation; boundary taps masked in-kernel,
# all 8 output parities packed into the lane dim, bf16 output, depth-tiled.
# ---------------------------------------------------------------------------
def _deconv_subpix_kernel(h_ref, hn_ref, m_ref, w_ref, b_ref, o_ref, *, W, HW):
    rows = h_ref.shape[1]
    C = h_ref.shape[-1]
    ncol = b_ref.shape[-1]
    # Extended operand: this depth tile, the next low-res depth slab (halo),
    # and a small zero tail so every shifted window slice stays in bounds
    # (tail / halo-garbage rows are always masked out).
    ext = jnp.concatenate(
        [h_ref[0], hn_ref[0], jnp.zeros((W + 8, C), h_ref.dtype)], axis=0)
    m_d = m_ref[0]            # (rows, 1): 1.0 where d + 1 < D
    m_h = m_ref[1]            # (rows, 1): 1.0 where h + 1 < H
    m_w = m_ref[2]            # (rows, 1): 1.0 where w + 1 < W
    acc = jnp.zeros((rows, ncol), jnp.float32)
    for dd in range(2):
        for dh in range(2):
            for dw in range(2):
                tap = dd * 4 + dh * 2 + dw
                s = dd * HW + dh * W + dw
                a = ext[s:s + rows, :]
                mask = None
                for use, m in ((dd, m_d), (dh, m_h), (dw, m_w)):
                    if use:
                        mask = m if mask is None else mask * m
                if mask is not None:
                    a = a * mask
                # TODO(synk): if MXU-bound (v6e), lane-concat the 8 windows
                # and run one K=8*C matmul instead of 8 K=C matmuls.
                acc = acc + jnp.dot(a, w_ref[tap],
                                    preferred_element_type=jnp.float32)
    o_ref[0] = (acc + b_ref[...]).astype(o_ref.dtype)            # bf16 packed


def deconv_subpixel(h, masks, wpk, bpk, *, D, H, W, dtile):
    """h: (N,S,C) bf16; returns packed (N, S, 8*Cout) bf16."""
    N, S, C = h.shape
    HW = H * W
    ncol = bpk.shape[-1]
    DT = D // dtile
    rows = dtile * HW
    kernel = functools.partial(_deconv_subpix_kernel, W=W, HW=HW)
    nxt = lambda n, dt: (n, jnp.minimum((dt + 1) * dtile, D - 1), 0)
    return pl.pallas_call(
        kernel,
        out_shape=jax.ShapeDtypeStruct((N, S, ncol), jnp.bfloat16),
        grid=(N, DT),
        in_specs=[
            pl.BlockSpec((1, rows, C), lambda n, dt: (n, dt, 0)),
            pl.BlockSpec((1, HW, C), nxt),            # next-depth-slab halo
            pl.BlockSpec((3, rows, 1), lambda n, dt: (0, dt, 0)),
            pl.BlockSpec((8, C, ncol), lambda n, dt: (0, 0, 0)),
            pl.BlockSpec((1, ncol), lambda n, dt: (0, 0)),
        ],
        out_specs=pl.BlockSpec((1, rows, ncol), lambda n, dt: (n, dt, 0)),
        compiler_params=pltpu.CompilerParams(
            dimension_semantics=("parallel", "parallel"),
            vmem_limit_bytes=_vmem_limit_bytes()),
    )(h, h, masks, wpk, bpk)


# ---------------------------------------------------------------------------
# Weight packing for the sub-pixel decomposition.
#   output(2q+p) gets: offset 0 with k=1 (p=0); offset 0 with k=2 and
#   offset 1 with k=0 (p=1).  Missing (parity, offset) pairs are zero.
# ---------------------------------------------------------------------------
_KMAP = {(0, 0): 1, (1, 0): 2, (1, 1): 0}


def pack_deconv_weights(w, b):
    """w: PyTorch ConvTranspose3d weight (Cin, Cout, 3, 3, 3); b: (Cout,)."""
    cin, cout = w.shape[0], w.shape[1]
    wpk = jnp.zeros((2, 2, 2, cin, 2, 2, 2, cout), jnp.float32)
    for dd in (0, 1):
        for dh in (0, 1):
            for dw in (0, 1):
                for pd in (0, 1):
                    for ph in (0, 1):
                        for pw in (0, 1):
                            if ((pd, dd) in _KMAP and (ph, dh) in _KMAP
                                    and (pw, dw) in _KMAP):
                                wpk = wpk.at[dd, dh, dw, :, pd, ph, pw, :].set(
                                    w[:, :, _KMAP[(pd, dd)], _KMAP[(ph, dh)],
                                      _KMAP[(pw, dw)]])
    # NOTE: 27/64 (tap, parity) blocks are structurally zero (redundant MXU
    # FLOPs only, not a correctness issue); split by parity group on v5e if
    # the MXU ever saturates.
    wpk = wpk.reshape(8, cin, 8 * cout).astype(jnp.bfloat16)
    bpk = jnp.tile(b.reshape(1, cout), (1, 8)).astype(jnp.float32)
    return wpk, bpk


def build_boundary_masks(D, H, W):
    """(3, D*H*W, 1) bf16 masks: [d+1<D, h+1<H, w+1<W] per flat voxel."""
    md = (jnp.arange(D) < D - 1).astype(jnp.bfloat16)[:, None, None]
    mh = (jnp.arange(H) < H - 1).astype(jnp.bfloat16)[None, :, None]
    mw = (jnp.arange(W) < W - 1).astype(jnp.bfloat16)[None, None, :]
    full = lambda m: jnp.broadcast_to(m, (D, H, W)).reshape(D * H * W, 1)
    return jnp.stack([full(md), full(mh), full(mw)], axis=0)


# ---------------------------------------------------------------------------
# Full block (external API mirrors PyTorch NCDHW)
# ---------------------------------------------------------------------------
def frustum_tv_up_block(params, x, t, v, groups=8, eps=1e-5,
                        spatial_tile=None, depth_tile=None):
    N, C, D, H, W = x.shape
    Ct, Cv = t.shape[1], v.shape[1]
    cout = params["conv"]["b"].shape[0]
    S = D * H * W
    HW = H * W
    assert C % groups == 0 and HW % 8 == 0

    st = spatial_tile or _pick_spatial_tile(S)
    dtile = depth_tile or _pick_depth_tile(D, HW)
    assert S % st == 0 and (st % 8 == 0 or st == S)
    assert D % dtile == 0

    # --- layout glue: channels-last + bf16 matmul operands ------------------
    # TODO(synk): accept NDHWC activations at the block boundary so these
    # relayout passes (pure HBM plumbing) disappear.
    x2 = jnp.transpose(x, (0, 2, 3, 4, 1)).reshape(N, S, C)
    tv2 = jnp.transpose(jnp.concatenate([t, v], axis=1),
                        (0, 2, 3, 4, 1)).reshape(N, S, Ct + Cv)
    tv2 = tv2.astype(jnp.bfloat16)
    wt = params["t_conv"]["w"].reshape(C, Ct).T
    wv = params["v_conv"]["w"].reshape(C, Cv).T
    wtv = jnp.concatenate([wt, wv], axis=0).astype(jnp.bfloat16)   # (Ct+Cv, C)
    bias = (params["t_conv"]["b"] + params["v_conv"]["b"]).reshape(1, C)
    gamma = params["norm"]["gamma"].reshape(1, C)
    beta = params["norm"]["beta"].reshape(1, C)
    cg = C // groups
    grp = jnp.arange(C) // cg
    gavg = ((grp[:, None] == grp[None, :]).astype(jnp.float32)
            / float(S * cg))                                       # (C, C)

    # --- Kernel A: projection + tiled two-pass GroupNorm + SiLU ------------
    h = fused_proj_gn_silu(x2, tv2, wtv, bias, gamma, beta, gavg,
                           eps=eps, st=st)                     # (N, S, C) bf16

    # --- Kernel B: sub-pixel ConvTranspose3d, boundary taps masked ----------
    wpk, bpk = pack_deconv_weights(params["conv"]["w"], params["conv"]["b"])
    masks = build_boundary_masks(D, H, W)
    outp = deconv_subpixel(h, masks, wpk, bpk, D=D, H=H, W=W,
                           dtile=dtile)                  # (N, S, 8*cout) bf16

    # --- parity unshuffle (depth-to-space, bf16) + NCDHW --------------------
    # TODO(synk): fuse this unshuffle into kernel B's store to save one pass.
    o = outp.reshape(N, D, H, W, 2, 2, 2, cout)
    o = jnp.transpose(o, (0, 1, 4, 2, 5, 3, 6, 7)).reshape(
        N, 2 * D, 2 * H, 2 * W, cout)
    return jnp.transpose(o, (0, 4, 1, 2, 3)).astype(jnp.float32)   # NCDHW f32


# ---------------------------------------------------------------------------
# Pure-JAX reference (same bf16 rounding points) for a numerical self-check.
# ---------------------------------------------------------------------------
def reference_forward(params, x, t, v, groups=8, eps=1e-5):
    bf = lambda a: a.astype(jnp.bfloat16).astype(jnp.float32)
    N, C, D, H, W = x.shape
    Ct, Cv = t.shape[1], v.shape[1]
    xc = jnp.transpose(x, (0, 2, 3, 4, 1))
    tc = bf(jnp.transpose(t, (0, 2, 3, 4, 1)))
    vc = bf(jnp.transpose(v, (0, 2, 3, 4, 1)))
    wtm = bf(params["t_conv"]["w"].reshape(C, Ct).T)
    wvm = bf(params["v_conv"]["w"].reshape(C, Cv).T)
    h = (xc + jnp.einsum("ndhwc,ck->ndhwk", tc, wtm) + params["t_conv"]["b"]
         + jnp.einsum("ndhwc,ck->ndhwk", vc, wvm) + params["v_conv"]["b"])
    hg = h.reshape(N, D * H * W, groups, C // groups)
    mean = hg.mean(axis=(1, 3), keepdims=True)
    var = ((hg - mean) ** 2).mean(axis=(1, 3), keepdims=True)
    hn = ((hg - mean) / jnp.sqrt(var + eps)).reshape(N, D, H, W, C)
    y = hn * params["norm"]["gamma"] + params["norm"]["beta"]
    y = bf(y * jax.nn.sigmoid(y))
    wr = bf(jnp.transpose(jnp.flip(params["conv"]["w"], (2, 3, 4)),
                          (2, 3, 4, 0, 1)))                        # DHWIO
    o = jax.lax.conv_general_dilated(
        y, wr, window_strides=(1, 1, 1), padding=((1, 2), (1, 2), (1, 2)),
        lhs_dilation=(2, 2, 2),
        dimension_numbers=("NDHWC", "DHWIO", "NDHWC"))
    o = o + params["conv"]["b"]
    return jnp.transpose(o, (0, 4, 1, 2, 3))


# ---------------------------------------------------------------------------
# Deterministic synthetic parameters (PyTorch layouts)
# ---------------------------------------------------------------------------
def init_params(key, x_dim, t_dim, v_dim, out_dim):
    ks = jax.random.split(key, 8)

    def w(k, shape, s=0.05):
        return s * jax.random.normal(k, shape, jnp.float32)

    return {
        "t_conv": {"w": w(ks[0], (x_dim, t_dim, 1, 1, 1)),
                   "b": w(ks[1], (x_dim,), 0.01)},
        "v_conv": {"w": w(ks[2], (x_dim, v_dim, 1, 1, 1)),
                   "b": w(ks[3], (x_dim,), 0.01)},
        "norm": {"gamma": 1.0 + w(ks[4], (x_dim,)),
                 "beta": w(ks[5], (x_dim,), 0.01)},
        "conv": {"w": w(ks[6], (x_dim, out_dim, 3, 3, 3)),
                 "b": w(ks[7], (out_dim,), 0.01)},
    }


if __name__ == "__main__":
    # x_dim % 8 == 0 for GroupNorm(8, .); 8*out_dim = 128 -> lane-dense output.
    X_DIM, T_DIM, V_DIM, OUT_DIM = 32, 16, 16, 16
    B, D, H, W = 2, 8, 8, 8

    key = jax.random.PRNGKey(0)
    kp, kx, kt, kv = jax.random.split(key, 4)
    params = init_params(kp, X_DIM, T_DIM, V_DIM, OUT_DIM)
    x = jax.random.normal(kx, (B, X_DIM, D, H, W), jnp.float32)
    t = jax.random.normal(kt, (B, T_DIM, D, H, W), jnp.float32)
    v = jax.random.normal(kv, (B, V_DIM, D, H, W), jnp.float32)

    # Explicit small tiles so the tiled two-pass GroupNorm (4 spatial tiles)
    # and the depth-tiled deconv (2 depth tiles) paths are exercised.
    fwd = jax.jit(functools.partial(frustum_tv_up_block,
                                    spatial_tile=128, depth_tile=4))
    out = jax.block_until_ready(fwd(params, x, t, v))
    assert out.shape == (B, OUT_DIM, 2 * D, 2 * H, 2 * W), out.shape
    assert bool(jnp.all(jnp.isfinite(out)))

    ref = jax.block_until_ready(jax.jit(reference_forward)(params, x, t, v))
    err = float(jnp.max(jnp.abs(out - ref)))
    scale = float(jnp.max(jnp.abs(ref))) + 1.0
    assert err <= 2e-2 * scale, (err, scale)

    print("KERNEL_OK")
</pallas_src>

<mosaic_0001>
module attributes {stable_mosaic.version = 11 : i64} {
  func.func @_deconv_subpix_kernel(%arg0: i32, %arg1: i32, %arg2: memref<1x256x32xbf16, #tpu.memory_space<vmem>>, %arg3: memref<1x64x32xbf16, #tpu.memory_space<vmem>>, %arg4: memref<3x256x1xbf16, #tpu.memory_space<vmem>>, %arg5: memref<8x32x128xbf16, #tpu.memory_space<vmem>>, %arg6: memref<1x128xf32, #tpu.memory_space<vmem>>, %arg7: memref<1x256x128xbf16, #tpu.memory_space<vmem>>) attributes {dimension_semantics = [#tpu.dimension_semantics<parallel>, #tpu.dimension_semantics<parallel>], iteration_bounds = array<i64: 2, 2>, scalar_prefetch = 0 : i64, scratch_operands = 0 : i64, tpu.core_type = #tpu.core_type<tc>, window_params = [{transform_indices = @transform_0, window_bounds = array<i64: 1, 256, 32>}, {transform_indices = @transform_1, window_bounds = array<i64: 1, 64, 32>}, {transform_indices = @transform_2, window_bounds = array<i64: 3, 256, 1>}, {pipeline_mode = #tpu.pipeline_mode<synchronous>, transform_indices = @transform_3, window_bounds = array<i64: 8, 32, 128>}, {pipeline_mode = #tpu.pipeline_mode<synchronous>, transform_indices = @transform_4, window_bounds = array<i64: 1, 128>}, {transform_indices = @transform_5, window_bounds = array<i64: 1, 256, 128>}]} {
    %c0 = arith.constant 0 : index
    %c0_0 = arith.constant 0 : index
    %c0_1 = arith.constant 0 : index
    %0 = vector.load %arg2[%c0, %c0_0, %c0_1] : memref<1x256x32xbf16, #tpu.memory_space<vmem>>, vector<1x256x32xbf16>
    %1 = vector.shape_cast %0 : vector<1x256x32xbf16> to vector<256x32xbf16>
    %c0_2 = arith.constant 0 : index
    %c0_3 = arith.constant 0 : index
    %c0_4 = arith.constant 0 : index
    %2 = vector.load %arg3[%c0_2, %c0_3, %c0_4] : memref<1x64x32xbf16, #tpu.memory_space<vmem>>, vector<1x64x32xbf16>
    %3 = vector.shape_cast %2 : vector<1x64x32xbf16> to vector<64x32xbf16>
    %cst = arith.constant 0.000000e+00 : bf16
    %4 = vector.broadcast %cst : bf16 to vector<16x32xbf16>
    %5 = tpu.concatenate %1, %3, %4 in 0 : vector<256x32xbf16>, vector<64x32xbf16>, vector<16x32xbf16> -> vector<336x32xbf16>
    %c0_5 = arith.constant 0 : index
    %c0_6 = arith.constant 0 : index
    %c0_7 = arith.constant 0 : index
    %6 = vector.load %arg4[%c0_5, %c0_6, %c0_7] : memref<3x256x1xbf16, #tpu.memory_space<vmem>>, vector<1x256x1xbf16>
    %7 = vector.shape_cast %6 : vector<1x256x1xbf16> to vector<256x1xbf16>
    %c1 = arith.constant 1 : index
    %c0_8 = arith.constant 0 : index
    %c0_9 = arith.constant 0 : index
    %8 = vector.load %arg4[%c1, %c0_8, %c0_9] : memref<3x256x1xbf16, #tpu.memory_space<vmem>>, vector<1x256x1xbf16>
    %9 = vector.shape_cast %8 : vector<1x256x1xbf16> to vector<256x1xbf16>
    %c2 = arith.constant 2 : index
    %c0_10 = arith.constant 0 : index
    %c0_11 = arith.constant 0 : index
    %10 = vector.load %arg4[%c2, %c0_10, %c0_11] : memref<3x256x1xbf16, #tpu.memory_space<vmem>>, vector<1x256x1xbf16>
    %11 = vector.shape_cast %10 : vector<1x256x1xbf16> to vector<256x1xbf16>
    %cst_12 = arith.constant 0.000000e+00 : f32
    %12 = vector.broadcast %cst_12 : f32 to vector<256x128xf32>
    %13 = vector.extract_strided_slice %5 {offsets = [0, 0], sizes = [256, 32], strides = [1, 1]} : vector<336x32xbf16> to vector<256x32xbf16>
    %c0_13 = arith.constant 0 : index
    %c0_14 = arith.constant 0 : index
    %c0_15 = arith.constant 0 : index
    %14 = vector.load %arg5[%c0_13, %c0_14, %c0_15] : memref<8x32x128xbf16, #tpu.memory_space<vmem>>, vector<1x32x128xbf16>
    %15 = vector.shape_cast %14 : vector<1x32x128xbf16> to vector<32x128xbf16>
    %cst_16 = arith.constant dense<0.000000e+00> : vector<256x128xf32>
    %16 = tpu.matmul %13, %15, %cst_16 {dimension_numbers = #tpu.dot_dimension_numbers<[1], [0], [0], [1], [0, 0, 1, 1], [], []>} : vector<256x32xbf16>, vector<32x128xbf16>, vector<256x128xf32> -> vector<256x128xf32>
    %17 = arith.addf %12, %16 : vector<256x128xf32>
    %18 = vector.extract_strided_slice %5 {offsets = [1, 0], sizes = [256, 32], strides = [1, 1]} : vector<336x32xbf16> to vector<256x32xbf16>
    %19 = vector.broadcast %11 : vector<256x1xbf16> to vector<256x32xbf16>
    %20 = arith.mulf %18, %19 : vector<256x32xbf16>
    %c1_17 = arith.constant 1 : index
    %c0_18 = arith.constant 0 : index
    %c0_19 = arith.constant 0 : index
    %21 = vector.load %arg5[%c1_17, %c0_18, %c0_19] : memref<8x32x128xbf16, #tpu.memory_space<vmem>>, vector<1x32x128xbf16>
    %22 = vector.shape_cast %21 : vector<1x32x128xbf16> to vector<32x128xbf16>
    %cst_20 = arith.constant dense<0.000000e+00> : vector<256x128xf32>
    %23 = tpu.matmul %20, %22, %cst_20 {dimension_numbers = #tpu.dot_dimension_numbers<[1], [0], [0], [1], [0, 0, 1, 1], [], []>} : vector<256x32xbf16>, vector<32x128xbf16>, vector<256x128xf32> -> vector<256x128xf32>
    %24 = arith.addf %17, %23 : vector<256x128xf32>
    %25 = vector.extract_strided_slice %5 {offsets = [8, 0], sizes = [256, 32], strides = [1, 1]} : vector<336x32xbf16> to vector<256x32xbf16>
    %26 = vector.broadcast %9 : vector<256x1xbf16> to vector<256x32xbf16>
    %27 = arith.mulf %25, %26 : vector<256x32xbf16>
    %c2_21 = arith.constant 2 : index
    %c0_22 = arith.constant 0 : index
    %c0_23 = arith.constant 0 : index
    %28 = vector.load %arg5[%c2_21, %c0_22, %c0_23] : memref<8x32x128xbf16, #tpu.memory_space<vmem>>, vector<1x32x128xbf16>
    %29 = vector.shape_cast %28 : vector<1x32x128xbf16> to vector<32x128xbf16>
    %cst_24 = arith.constant dense<0.000000e+00> : vector<256x128xf32>
    %30 = tpu.matmul %27, %29, %cst_24 {dimension_numbers = #tpu.dot_dimension_numbers<[1], [0], [0], [1], [0, 0, 1, 1], [], []>} : vector<256x32xbf16>, vector<32x128xbf16>, vector<256x128xf32> -> vector<256x128xf32>
    %31 = arith.addf %24, %30 : vector<256x128xf32>
    %32 = vector.extract_strided_slice %5 {offsets = [9, 0], sizes = [256, 32], strides = [1, 1]} : vector<336x32xbf16> to vector<256x32xbf16>
    %33 = arith.mulf %9, %11 : vector<256x1xbf16>
    %34 = vector.broadcast %33 : vector<256x1xbf16> to vector<256x32xbf16>
    %35 = arith.mulf %32, %34 : vector<256x32xbf16>
    %c3 = arith.constant 3 : index
    %c0_25 = arith.constant 0 : index
    %c0_26 = arith.constant 0 : index
    %36 = vector.load %arg5[%c3, %c0_25, %c0_26] : memref<8x32x128xbf16, #tpu.memory_space<vmem>>, vector<1x32x128xbf16>
    %37 = vector.shape_cast %36 : vector<1x32x128xbf16> to vector<32x128xbf16>
    %cst_27 = arith.constant dense<0.000000e+00> : vector<256x128xf32>
    %38 = tpu.matmul %35, %37, %cst_27 {dimension_numbers = #tpu.dot_dimension_numbers<[1], [0], [0], [1], [0, 0, 1, 1], [], []>} : vector<256x32xbf16>, vector<32x128xbf16>, vector<256x128xf32> -> vector<256x128xf32>
    %39 = arith.addf %31, %38 : vector<256x128xf32>
    %40 = vector.extract_strided_slice %5 {offsets = [64, 0], sizes = [256, 32], strides = [1, 1]} : vector<336x32xbf16> to vector<256x32xbf16>
    %41 = vector.broadcast %7 : vector<256x1xbf16> to vector<256x32xbf16>
    %42 = arith.mulf %40, %41 : vector<256x32xbf16>
    %c4 = arith.constant 4 : index
    %c0_28 = arith.constant 0 : index
    %c0_29 = arith.constant 0 : index
    %43 = vector.load %arg5[%c4, %c0_28, %c0_29] : memref<8x32x128xbf16, #tpu.memory_space<vmem>>, vector<1x32x128xbf16>
    %44 = vector.shape_cast %43 : vector<1x32x128xbf16> to vector<32x128xbf16>
    %cst_30 = arith.constant dense<0.000000e+00> : vector<256x128xf32>
    %45 = tpu.matmul %42, %44, %cst_30 {dimension_numbers = #tpu.dot_dimension_numbers<[1], [0], [0], [1], [0, 0, 1, 1], [], []>} : vector<256x32xbf16>, vector<32x128xbf16>, vector<256x128xf32> -> vector<256x128xf32>
    %46 = arith.addf %39, %45 : vector<256x128xf32>
    %47 = vector.extract_strided_slice %5 {offsets = [65, 0], sizes = [256, 32], strides = [1, 1]} : vector<336x32xbf16> to vector<256x32xbf16>
    %48 = arith.mulf %7, %11 : vector<256x1xbf16>
    %49 = vector.broadcast %48 : vector<256x1xbf16> to vector<256x32xbf16>
    %50 = arith.mulf %47, %49 : vector<256x32xbf16>
    %c5 = arith.constant 5 : index
    %c0_31 = arith.constant 0 : index
    %c0_32 = arith.constant 0 : index
    %51 = vector.load %arg5[%c5, %c0_31, %c0_32] : memref<8x32x128xbf16, #tpu.memory_space<vmem>>, vector<1x32x128xbf16>
    %52 = vector.shape_cast %51 : vector<1x32x128xbf16> to vector<32x128xbf16>
    %cst_33 = arith.constant dense<0.000000e+00> : vector<256x128xf32>
    %53 = tpu.matmul %50, %52, %cst_33 {dimension_numbers = #tpu.dot_dimension_numbers<[1], [0], [0], [1], [0, 0, 1, 1], [], []>} : vector<256x32xbf16>, vector<32x128xbf16>, vector<256x128xf32> -> vector<256x128xf32>
    %54 = arith.addf %46, %53 : vector<256x128xf32>
    %55 = vector.extract_strided_slice %5 {offsets = [72, 0], sizes = [256, 32], strides = [1, 1]} : vector<336x32xbf16> to vector<256x32xbf16>
    %56 = arith.mulf %7, %9 : vector<256x1xbf16>
    %57 = vector.broadcast %56 : vector<256x1xbf16> to vector<256x32xbf16>
    %58 = arith.mulf %55, %57 : vector<256x32xbf16>
    %c6 = arith.constant 6 : index
    %c0_34 = arith.constant 0 : index
    %c0_35 = arith.constant 0 : index
    %59 = vector.load %arg5[%c6, %c0_34, %c0_35] : memref<8x32x128xbf16, #tpu.memory_space<vmem>>, vector<1x32x128xbf16>
    %60 = vector.shape_cast %59 : vector<1x32x128xbf16> to vector<32x128xbf16>
    %cst_36 = arith.constant dense<0.000000e+00> : vector<256x128xf32>
    %61 = tpu.matmul %58, %60, %cst_36 {dimension_numbers = #tpu.dot_dimension_numbers<[1], [0], [0], [1], [0, 0, 1, 1], [], []>} : vector<256x32xbf16>, vector<32x128xbf16>, vector<256x128xf32> -> vector<256x128xf32>
    %62 = arith.addf %54, %61 : vector<256x128xf32>
    %63 = vector.extract_strided_slice %5 {offsets = [73, 0], sizes = [256, 32], strides = [1, 1]} : vector<336x32xbf16> to vector<256x32xbf16>
    %64 = arith.mulf %7, %9 : vector<256x1xbf16>
    %65 = arith.mulf %64, %11 : vector<256x1xbf16>
    %66 = vector.broadcast %65 : vector<256x1xbf16> to vector<256x32xbf16>
    %67 = arith.mulf %63, %66 : vector<256x32xbf16>
    %c7 = arith.constant 7 : index
    %c0_37 = arith.constant 0 : index
    %c0_38 = arith.constant 0 : index
    %68 = vector.load %arg5[%c7, %c0_37, %c0_38] : memref<8x32x128xbf16, #tpu.memory_space<vmem>>, vector<1x32x128xbf16>
    %69 = vector.shape_cast %68 : vector<1x32x128xbf16> to vector<32x128xbf16>
    %cst_39 = arith.constant dense<0.000000e+00> : vector<256x128xf32>
    %70 = tpu.matmul %67, %69, %cst_39 {dimension_numbers = #tpu.dot_dimension_numbers<[1], [0], [0], [1], [0, 0, 1, 1], [], []>} : vector<256x32xbf16>, vector<32x128xbf16>, vector<256x128xf32> -> vector<256x128xf32>
    %71 = arith.addf %62, %70 : vector<256x128xf32>
    %c0_40 = arith.constant 0 : index
    %c0_41 = arith.constant 0 : index
    %72 = vector.load %arg6[%c0_40, %c0_41] : memref<1x128xf32, #tpu.memory_space<vmem>>, vector<1x128xf32>
    %73 = vector.broadcast %72 : vector<1x128xf32> to vector<256x128xf32>
    %74 = arith.addf %71, %73 : vector<256x128xf32>
    %75 = arith.truncf %74 : vector<256x128xf32> to vector<256x128xbf16>
    %c0_42 = arith.constant 0 : index
    %c0_43 = arith.constant 0 : index
    %c0_44 = arith.constant 0 : index
    %76 = vector.load %arg7[%c0_42, %c0_43, %c0_44] : memref<1x256x128xbf16, #tpu.memory_space<vmem>>, vector<1x256x128xbf16>
    %77 = vector.shape_cast %76 : vector<1x256x128xbf16> to vector<256x128xbf16>
    %78 = vector.shape_cast %75 : vector<256x128xbf16> to vector<1x256x128xbf16>
    tpu.vector_store %arg7[%c0_42, %c0_43, %c0_44], %78 {strides = array<i32>} : memref<1x256x128xbf16, #tpu.memory_space<vmem>>, vector<1x256x128xbf16>,
    return
  }
  func.func @transform_0(%arg0: i32, %arg1: i32) -> (i32, i32, i32) {
    %c0_i32 = arith.constant 0 : i32
    %c0_i32_0 = arith.constant 0 : i32
    return %arg0, %arg1, %c0_i32 : i32, i32, i32
  }
  func.func @transform_1(%arg0: i32, %arg1: i32) -> (i32, i32, i32) {
    %c1_i32 = arith.constant 1 : i32
    %0 = arith.addi %arg1, %c1_i32 : i32
    %c4_i32 = arith.constant 4 : i32
    %1 = arith.muli %0, %c4_i32 : i32
    %c7_i32 = arith.constant 7 : i32
    %2 = arith.minsi %1, %c7_i32 : i32
    %c0_i32 = arith.constant 0 : i32
    %c0_i32_0 = arith.constant 0 : i32
    return %arg0, %2, %c0_i32 : i32, i32, i32
  }
  func.func @transform_2(%arg0: i32, %arg1: i32) -> (i32, i32, i32) {
    %c0_i32 = arith.constant 0 : i32
    %c0_i32_0 = arith.constant 0 : i32
    %c0_i32_1 = arith.constant 0 : i32
    return %c0_i32, %arg1, %c0_i32_0 : i32, i32, i32
  }
  func.func @transform_3(%arg0: i32, %arg1: i32) -> (i32, i32, i32) {
    %c0_i32 = arith.constant 0 : i32
    %c0_i32_0 = arith.constant 0 : i32
    %c0_i32_1 = arith.constant 0 : i32
    %c0_i32_2 = arith.constant 0 : i32
    return %c0_i32, %c0_i32_0, %c0_i32_1 : i32, i32, i32
  }
  func.func @transform_4(%arg0: i32, %arg1: i32) -> (i32, i32) {
    %c0_i32 = arith.constant 0 : i32
    %c0_i32_0 = arith.constant 0 : i32
    %c0_i32_1 = arith.constant 0 : i32
    return %c0_i32, %c0_i32_0 : i32, i32
  }
  func.func @transform_5(%arg0: i32, %arg1: i32) -> (i32, i32, i32) {
    %c0_i32 = arith.constant 0 : i32
    %c0_i32_0 = arith.constant 0 : i32
    return %arg0, %arg1, %c0_i32 : i32, i32, i32
  }
}

module attributes {stable_mosaic.version = 11 : i64} {
  func.func @_proj_gn_silu_kernel(%arg0: i32, %arg1: i32, %arg2: i32, %arg3: memref<1x128x32xf32, #tpu.memory_space<vmem>>, %arg4: memref<1x128x32xbf16, #tpu.memory_space<vmem>>, %arg5: memref<32x32xbf16, #tpu.memory_space<vmem>>, %arg6: memref<1x32xf32, #tpu.memory_space<vmem>>, %arg7: memref<1x32xf32, #tpu.memory_space<vmem>>, %arg8: memref<1x32xf32, #tpu.memory_space<vmem>>, %arg9: memref<32x32xf32, #tpu.memory_space<vmem>>, %arg10: memref<1x128x32xbf16, #tpu.memory_space<vmem>>, %arg11: memref<1x32xf32, #tpu.memory_space<vmem>>, %arg12: memref<1x32xf32, #tpu.memory_space<vmem>>, %arg13: memref<1x32xf32, #tpu.memory_space<vmem>>, %arg14: memref<1x32xf32, #tpu.memory_space<vmem>>) attributes {dimension_semantics = [#tpu.dimension_semantics<parallel>, #tpu.dimension_semantics<arbitrary>, #tpu.dimension_semantics<arbitrary>], iteration_bounds = array<i64: 2, 2, 4>, scalar_prefetch = 0 : i64, scratch_operands = 4 : i64, tpu.core_type = #tpu.core_type<tc>, window_params = [{transform_indices = @transform_0, window_bounds = array<i64: 1, 128, 32>}, {transform_indices = @transform_1, window_bounds = array<i64: 1, 128, 32>}, {pipeline_mode = #tpu.pipeline_mode<synchronous>, transform_indices = @transform_2, window_bounds = array<i64: 32, 32>}, {pipeline_mode = #tpu.pipeline_mode<synchronous>, transform_indices = @transform_3, window_bounds = array<i64: 1, 32>}, {pipeline_mode = #tpu.pipeline_mode<synchronous>, transform_indices = @transform_4, window_bounds = array<i64: 1, 32>}, {pipeline_mode = #tpu.pipeline_mode<synchronous>, transform_indices = @transform_5, window_bounds = array<i64: 1, 32>}, {pipeline_mode = #tpu.pipeline_mode<synchronous>, transform_indices = @transform_6, window_bounds = array<i64: 32, 32>}, {transform_indices = @transform_7, window_bounds = array<i64: 1, 128, 32>}]} {
    %c0 = arith.constant 0 : index
    %c0_0 = arith.constant 0 : index
    %c0_1 = arith.constant 0 : index
    %0 = vector.load %arg3[%c0, %c0_0, %c0_1] : memref<1x128x32xf32, #tpu.memory_space<vmem>>, vector<1x128x32xf32>
    %1 = vector.shape_cast %0 : vector<1x128x32xf32> to vector<128x32xf32>
    %c0_2 = arith.constant 0 : index
    %c0_3 = arith.constant 0 : index
    %c0_4 = arith.constant 0 : index
    %2 = vector.load %arg4[%c0_2, %c0_3, %c0_4] : memref<1x128x32xbf16, #tpu.memory_space<vmem>>, vector<1x128x32xbf16>
    %3 = vector.shape_cast %2 : vector<1x128x32xbf16> to vector<128x32xbf16>
    %c0_5 = arith.constant 0 : index
    %c0_6 = arith.constant 0 : index
    %4 = vector.load %arg5[%c0_5, %c0_6] : memref<32x32xbf16, #tpu.memory_space<vmem>>, vector<32x32xbf16>
    %cst = arith.constant dense<0.000000e+00> : vector<128x32xf32>
    %5 = tpu.matmul %3, %4, %cst {dimension_numbers = #tpu.dot_dimension_numbers<[1], [0], [0], [1], [0, 0, 1, 1], [], []>} : vector<128x32xbf16>, vector<32x32xbf16>, vector<128x32xf32> -> vector<128x32xf32>
    %6 = arith.addf %1, %5 : vector<128x32xf32>
    %c0_7 = arith.constant 0 : index
    %c0_8 = arith.constant 0 : index
    %7 = vector.load %arg6[%c0_7, %c0_8] : memref<1x32xf32, #tpu.memory_space<vmem>>, vector<1x32xf32>
    %8 = vector.broadcast %7 : vector<1x32xf32> to vector<128x32xf32>
    %9 = arith.addf %6, %8 : vector<128x32xf32>
    %c0_i32 = arith.constant 0 : i32
    %10 = arith.cmpi eq, %arg1, %c0_i32 : i32
    %11 = arith.extui %10 : i1 to i32
    %c0_i32_9 = arith.constant 0 : i32
    %12 = arith.cmpi ne, %11, %c0_i32_9 : i32
    scf.if %12 {
      %c0_i32_14 = arith.constant 0 : i32
      %21 = arith.cmpi eq, %arg2, %c0_i32_14 : i32
      %22 = arith.extui %21 : i1 to i32
      %c0_i32_15 = arith.constant 0 : i32
      %23 = arith.cmpi ne, %22, %c0_i32_15 : i32
      scf.if %23 {
        %cst_26 = arith.constant 0.000000e+00 : f32
        %35 = vector.broadcast %cst_26 : f32 to vector<1x32xf32>
        %c0_27 = arith.constant 0 : index
        %c0_28 = arith.constant 0 : index
        %36 = vector.load %arg11[%c0_27, %c0_28] : memref<1x32xf32, #tpu.memory_space<vmem>>, vector<1x32xf32>
        tpu.vector_store %arg11[%c0_27, %c0_28], %35 {strides = array<i32>} : memref<1x32xf32, #tpu.memory_space<vmem>>, vector<1x32xf32>,
        %cst_29 = arith.constant 0.000000e+00 : f32
        %37 = vector.broadcast %cst_29 : f32 to vector<1x32xf32>
        %c0_30 = arith.constant 0 : index
        %c0_31 = arith.constant 0 : index
        %38 = vector.load %arg12[%c0_30, %c0_31] : memref<1x32xf32, #tpu.memory_space<vmem>>, vector<1x32xf32>
        tpu.vector_store %arg12[%c0_30, %c0_31], %37 {strides = array<i32>} : memref<1x32xf32, #tpu.memory_space<vmem>>, vector<1x32xf32>,
      } else {
      }
      %c0_16 = arith.constant 0 : index
      %c0_17 = arith.constant 0 : index
      %24 = vector.load %arg11[%c0_16, %c0_17] : memref<1x32xf32, #tpu.memory_space<vmem>>, vector<1x32xf32>
      %cst_18 = arith.constant dense<0.000000e+00> : vector<32xf32>
      %25 = vector.multi_reduction <add>, %9, %cst_18 [0] : vector<128x32xf32> to vector<32xf32>
      %26 = vector.shape_cast %25 : vector<32xf32> to vector<1x32xf32>
      %27 = arith.addf %24, %26 : vector<1x32xf32>
      %c0_19 = arith.constant 0 : index
      %c0_20 = arith.constant 0 : index
      %28 = vector.load %arg11[%c0_19, %c0_20] : memref<1x32xf32, #tpu.memory_space<vmem>>, vector<1x32xf32>
      tpu.vector_store %arg11[%c0_19, %c0_20], %27 {strides = array<i32>} : memref<1x32xf32, #tpu.memory_space<vmem>>, vector<1x32xf32>,
      %c0_21 = arith.constant 0 : index
      %c0_22 = arith.constant 0 : index
      %29 = vector.load %arg12[%c0_21, %c0_22] : memref<1x32xf32, #tpu.memory_space<vmem>>, vector<1x32xf32>
      %30 = arith.mulf %9, %9 : vector<128x32xf32>
      %cst_23 = arith.constant dense<0.000000e+00> : vector<32xf32>
      %31 = vector.multi_reduction <add>, %30, %cst_23 [0] : vector<128x32xf32> to vector<32xf32>
      %32 = vector.shape_cast %31 : vector<32xf32> to vector<1x32xf32>
      %33 = arith.addf %29, %32 : vector<1x32xf32>
      %c0_24 = arith.constant 0 : index
      %c0_25 = arith.constant 0 : index
      %34 = vector.load %arg12[%c0_24, %c0_25] : memref<1x32xf32, #tpu.memory_space<vmem>>, vector<1x32xf32>
      tpu.vector_store %arg12[%c0_24, %c0_25], %33 {strides = array<i32>} : memref<1x32xf32, #tpu.memory_space<vmem>>, vector<1x32xf32>,
    } else {
    }
    %c1_i32 = arith.constant 1 : i32
    %13 = arith.cmpi eq, %arg1, %c1_i32 : i32
    %c0_i32_10 = arith.constant 0 : i32
    %14 = arith.cmpi eq, %arg2, %c0_i32_10 : i32
    %15 = arith.andi %13, %14 : i1
    %16 = arith.extui %15 : i1 to i32
    %c0_i32_11 = arith.constant 0 : i32
    %17 = arith.cmpi ne, %16, %c0_i32_11 : i32
    scf.if %17 {
      %c0_14 = arith.constant 0 : index
      %c0_15 = arith.constant 0 : index
      %21 = vector.load %arg11[%c0_14, %c0_15] : memref<1x32xf32, #tpu.memory_space<vmem>>, vector<1x32xf32>
      %c0_16 = arith.constant 0 : index
      %c0_17 = arith.constant 0 : index
      %22 = vector.load %arg9[%c0_16, %c0_17] : memref<32x32xf32, #tpu.memory_space<vmem>>, vector<32x32xf32>
      %cst_18 = arith.constant dense<0.000000e+00> : vector<1x32xf32>
      %23 = tpu.matmul %21, %22, %cst_18 {dimension_numbers = #tpu.dot_dimension_numbers<[1], [0], [0], [1], [0, 0, 1, 1], [], []>} : vector<1x32xf32>, vector<32x32xf32>, vector<1x32xf32> -> vector<1x32xf32>
      %c0_19 = arith.constant 0 : index
      %c0_20 = arith.constant 0 : index
      %24 = vector.load %arg12[%c0_19, %c0_20] : memref<1x32xf32, #tpu.memory_space<vmem>>, vector<1x32xf32>
      %c0_21 = arith.constant 0 : index
      %c0_22 = arith.constant 0 : index
      %25 = vector.load %arg9[%c0_21, %c0_22] : memref<32x32xf32, #tpu.memory_space<vmem>>, vector<32x32xf32>
      %cst_23 = arith.constant dense<0.000000e+00> : vector<1x32xf32>
      %26 = tpu.matmul %24, %25, %cst_23 {dimension_numbers = #tpu.dot_dimension_numbers<[1], [0], [0], [1], [0, 0, 1, 1], [], []>} : vector<1x32xf32>, vector<32x32xf32>, vector<1x32xf32> -> vector<1x32xf32>
      %27 = arith.mulf %23, %23 : vector<1x32xf32>
      %28 = arith.subf %26, %27 : vector<1x32xf32>
      %cst_24 = arith.constant 0.000000e+00 : f32
      %29 = vector.broadcast %cst_24 : f32 to vector<1x32xf32>
      %30 = arith.maximumf %28, %29 : vector<1x32xf32>
      %c0_25 = arith.constant 0 : index
      %c0_26 = arith.constant 0 : index
      %31 = vector.load %arg13[%c0_25, %c0_26] : memref<1x32xf32, #tpu.memory_space<vmem>>, vector<1x32xf32>
      tpu.vector_store %arg13[%c0_25, %c0_26], %23 {strides = array<i32>} : memref<1x32xf32, #tpu.memory_space<vmem>>, vector<1x32xf32>,
      %cst_27 = arith.constant 9.99999974E-6 : f32
      %32 = vector.broadcast %cst_27 : f32 to vector<1x32xf32>
      %33 = arith.addf %30, %32 : vector<1x32xf32>
      %34 = math.rsqrt %33 : vector<1x32xf32>
      %c0_28 = arith.constant 0 : index
      %c0_29 = arith.constant 0 : index
      %35 = vector.load %arg14[%c0_28, %c0_29] : memref<1x32xf32, #tpu.memory_space<vmem>>, vector<1x32xf32>
      tpu.vector_store %arg14[%c0_28, %c0_29], %34 {strides = array<i32>} : memref<1x32xf32, #tpu.memory_space<vmem>>, vector<1x32xf32>,
    } else {
    }
    %c1_i32_12 = arith.constant 1 : i32
    %18 = arith.cmpi eq, %arg1, %c1_i32_12 : i32
    %19 = arith.extui %18 : i1 to i32
    %c0_i32_13 = arith.constant 0 : i32
    %20 = arith.cmpi ne, %19, %c0_i32_13 : i32
    scf.if %20 {
      %c0_14 = arith.constant 0 : index
      %c0_15 = arith.constant 0 : index
      %21 = vector.load %arg13[%c0_14, %c0_15] : memref<1x32xf32, #tpu.memory_space<vmem>>, vector<1x32xf32>
      %22 = vector.broadcast %21 : vector<1x32xf32> to vector<128x32xf32>
      %23 = arith.subf %9, %22 : vector<128x32xf32>
      %c0_16 = arith.constant 0 : index
      %c0_17 = arith.constant 0 : index
      %24 = vector.load %arg14[%c0_16, %c0_17] : memref<1x32xf32, #tpu.memory_space<vmem>>, vector<1x32xf32>
      %25 = vector.broadcast %24 : vector<1x32xf32> to vector<128x32xf32>
      %26 = arith.mulf %23, %25 : vector<128x32xf32>
      %c0_18 = arith.constant 0 : index
      %c0_19 = arith.constant 0 : index
      %27 = vector.load %arg7[%c0_18, %c0_19] : memref<1x32xf32, #tpu.memory_space<vmem>>, vector<1x32xf32>
      %28 = vector.broadcast %27 : vector<1x32xf32> to vector<128x32xf32>
      %29 = arith.mulf %26, %28 : vector<128x32xf32>
      %c0_20 = arith.constant 0 : index
      %c0_21 = arith.constant 0 : index
      %30 = vector.load %arg8[%c0_20, %c0_21] : memref<1x32xf32, #tpu.memory_space<vmem>>, vector<1x32xf32>
      %31 = vector.broadcast %30 : vector<1x32xf32> to vector<128x32xf32>
      %32 = arith.addf %29, %31 : vector<128x32xf32>
      %33 = arith.negf %32 : vector<128x32xf32>
      %34 = math.exp %33 : vector<128x32xf32>
      %cst_22 = arith.constant 1.000000e+00 : f32
      %35 = vector.broadcast %cst_22 : f32 to vector<128x32xf32>
      %36 = arith.addf %35, %34 : vector<128x32xf32>
      %37 = arith.divf %35, %36 : vector<128x32xf32>
      %38 = arith.mulf %32, %37 : vector<128x32xf32>
      %39 = arith.truncf %38 : vector<128x32xf32> to vector<128x32xbf16>
      %c0_23 = arith.constant 0 : index
      %c0_24 = arith.constant 0 : index
      %c0_25 = arith.constant 0 : index
      %40 = vector.load %arg10[%c0_23, %c0_24, %c0_25] : memref<1x128x32xbf16, #tpu.memory_space<vmem>>, vector<1x128x32xbf16>
      %41 = vector.shape_cast %40 : vector<1x128x32xbf16> to vector<128x32xbf16>
      %42 = vector.shape_cast %39 : vector<128x32xbf16> to vector<1x128x32xbf16>
      tpu.vector_store %arg10[%c0_23, %c0_24, %c0_25], %42 {strides = array<i32>} : memref<1x128x32xbf16, #tpu.memory_space<vmem>>, vector<1x128x32xbf16>,
    } else {
    }
    return
  }
  func.func @transform_0(%arg0: i32, %arg1: i32, %arg2: i32) -> (i32, i32, i32) {
    %c0_i32 = arith.constant 0 : i32
    %c0_i32_0 = arith.constant 0 : i32
    return %arg0, %arg2, %c0_i32 : i32, i32, i32
  }
  func.func @transform_1(%arg0: i32, %arg1: i32, %arg2: i32) -> (i32, i32, i32) {
    %c0_i32 = arith.constant 0 : i32
    %c0_i32_0 = arith.constant 0 : i32
    return %arg0, %arg2, %c0_i32 : i32, i32, i32
  }
  func.func @transform_2(%arg0: i32, %arg1: i32, %arg2: i32) -> (i32, i32) {
    %c0_i32 = arith.constant 0 : i32
    %c0_i32_0 = arith.constant 0 : i32
    %c0_i32_1 = arith.constant 0 : i32
    return %c0_i32, %c0_i32_0 : i32, i32
  }
  func.func @transform_3(%arg0: i32, %arg1: i32, %arg2: i32) -> (i32, i32) {
    %c0_i32 = arith.constant 0 : i32
    %c0_i32_0 = arith.constant 0 : i32
    %c0_i32_1 = arith.constant 0 : i32
    return %c0_i32, %c0_i32_0 : i32, i32
  }
  func.func @transform_4(%arg0: i32, %arg1: i32, %arg2: i32) -> (i32, i32) {
    %c0_i32 = arith.constant 0 : i32
    %c0_i32_0 = arith.constant 0 : i32
    %c0_i32_1 = arith.constant 0 : i32
    return %c0_i32, %c0_i32_0 : i32, i32
  }
  func.func @transform_5(%arg0: i32, %arg1: i32, %arg2: i32) -> (i32, i32) {
    %c0_i32 = arith.constant 0 : i32
    %c0_i32_0 = arith.constant 0 : i32
    %c0_i32_1 = arith.constant 0 : i32
    return %c0_i32, %c0_i32_0 : i32, i32
  }
  func.func @transform_6(%arg0: i32, %arg1: i32, %arg2: i32) -> (i32, i32) {
    %c0_i32 = arith.constant 0 : i32
    %c0_i32_0 = arith.constant 0 : i32
    %c0_i32_1 = arith.constant 0 : i32
    return %c0_i32, %c0_i32_0 : i32, i32
  }
  func.func @transform_7(%arg0: i32, %arg1: i32, %arg2: i32) -> (i32, i32, i32) {
    %0 = arith.muli %arg2, %arg1 : i32
    %c0_i32 = arith.constant 0 : i32
    %c0_i32_0 = arith.constant 0 : i32
    return %arg0, %0, %c0_i32 : i32, i32, i32
  }
}

</mosaic_0001>

<bundles_post_ra>
// kernel: frustum_tv_up_block.2
= control target key start
LH: loop header
LB: loop body
LE: loop exit
PB: predicated region body
PF: predicated region fallthrough
CT: control target
= control target key end

     0   :  { %s3101_s0 = inlined_call_operand.hbm [shape: f32[2,512,32], index: 0, kind: input, shape index: {}]   ;;  %s3102_s1 = inlined_call_operand.hbm [shape: bf16[2,512,32], index: 1, kind: input, shape index: {}]   ;;  %s3103_s2 = inlined_call_operand.hbm [shape: bf16[32,32], index: 2, kind: input, shape index: {}]   ;;  %s3104_s3 = inlined_call_operand.hbm [shape: f32[1,32], index: 3, kind: input, shape index: {}]   ;;  %s3105_s4 = inlined_call_operand.hbm [shape: f32[1,32], index: 4, kind: input, shape index: {}]   ;;  %s3106_s5 = inlined_call_operand.hbm [shape: f32[1,32], index: 5, kind: input, shape index: {}]   ;;  %s3107_s6 = inlined_call_operand.hbm [shape: f32[32,32], index: 6, kind: input, shape index: {}]   ;;  %s3108_s7 = inlined_call_operand.hbm [shape: bf16[2,512,32], index: 7, kind: output, shape index: {}]  }
   0x1   :  { %3126 = sst [smem:[#allocation35_spill]] %s3101_s0 }
   0x2   :  { %3127 = sst [smem:[#allocation36_spill]] %s3103_s2 }
   0x3   :  { %3128 = sst [smem:[#allocation37_spill]] %s3104_s3 }
   0x4   :  { %3129 = sst [smem:[#allocation38_spill]] %s3105_s4 }
   0x5   :  { %3130 = sst [smem:[#allocation39_spill]] %s3106_s5 }
   0x6   :  { %3131 = sst [smem:[#allocation40_spill]] %s3107_s6 }
   0x7   :  { %3132 = sst [smem:[#allocation41_spill]] %s3108_s7 }
   0x8   :  { %12 = vsyncpa [#allocation7], 0 }
   0x9   :  { %14 = vsyncpa [#allocation7 + $0x1], 0 }
   0xa   :  { %15 = vsyncpa [#allocation10], 0 }
   0xb   :  { %17 = vsyncpa [#allocation10 + $0x1], 0 }
   0xc   :  { %18 = vsyncpa [#allocation13], 0 }
   0xd   :  { %19 = vsyncpa [#allocation16], 0 }
   0xe   :  { %20 = vsyncpa [#allocation8], 0 }
   0xf   :  { %22 = vsyncpa [#allocation8 + $0x1], 0  ;;  %s2296_s24 = smov 0   ;;  %s2298_s25 = smov 0  }
  0x10   :  { %s2300_s26 = smov 0   ;;  %s2302_s27 = smov 0  }
  0x11   :  { %s2304_s28 = smov 0   ;;  %s2306_s29 = smov 0  }
  0x12   :  { %s2308_s30 = smov 0   ;;  %s2310_s8 = smov 0  }
  0x13   :  { %s2312_s9 = smov 0   ;;  %s2314_s10 = smov 0  }
  0x14   :  { %s2316_s11 = smov 0   ;;  %s2318_s12 = smov 0  }
  0x15   :  { %s2320_s13 = smov 0  }
  0x16 LB: > { %3133 = sst [smem:[#allocation25_spill]] %s2188_s24  ;;  %s2362_s14 = sadd.s32 4294967295, %s2236_s13   ;;  %s2236_s13 = sphi %s2320_s13, %s28_s13   ;;  %s2232_s12 = sphi %s2318_s12, %s3200_s12   ;;  %s2228_s11 = sphi %s2316_s11, %s3199_s11   ;;  %s2224_s10 = sphi %s2314_s10, %s3198_s10   ;;  %s2220_s9 = sphi %s2312_s9, %s3197_s9   ;;  %s2216_s8 = sphi %s2310_s8, %s3196_s8   ;;  %s2212_s30 = sphi %s2308_s30, %s3195_s30   ;;  %s2208_s29 = sphi %s2306_s29, %s3194_s29   ;;  %s2204_s28 = sphi %s2304_s28, %s3193_s28   ;;  %s2200_s27 = sphi %s2302_s27, %s3192_s27   ;;  %s2196_s26 = sphi %s2300_s26, %s3191_s26   ;;  %s2192_s25 = sphi %s2298_s25, %s3190_s25   ;;  %s2188_s24 = sphi %s2296_s24, %s3187_s24  }
  0x17   : > { %3134 = sst [smem:[#allocation26_spill]] %s2192_s25  ;;  %s1437_s15 = sadd.s32 4294967294, %s2236_s13  }
  0x18   : > { %3135 = sst [smem:[#allocation27_spill]] %s2212_s30  ;;  %p3114_p0 = scmp.eq.s32.totalorder %s2362_s14, 0 }
  0x19   : > { %3136 = sst [smem:[#allocation28_spill]] %s2216_s8  ;;  %p229_p1 = scmp.ne.s32.totalorder %s2196_s26, %s2192_s25 }
  0x1a   : > { %3137 = sst [smem:[#allocation29_spill]] %s2220_s9  ;;  %p230_p2 = scmp.eq.s32.totalorder %s2362_s14, 15 }
  0x1b   : > { %p235_p3 = scmp.ne.s32.totalorder %s2192_s25, %s2188_s24  ;;  %p236_p4 = scmp.eq.s32.totalorder %s1437_s15, 15 }
  0x1c   : > { %p1438_p5 = scmp.ge.s32.totalorder %s2236_s13, 1  ;;  %p2372_p6 = por %p230_p2, %p229_p1 }
  0x1d   : > { %p243_p7 = scmp.lt.s32.totalorder %s2236_s13, 17  ;;  %p2377_p8 = por %p236_p4, %p235_p3 }
  0x1e   : > { %s3138_s16 = scalar_select %p2372_p6, 1, 0 }
  0x1f   : > { %s3140_s17 = scalar_select %p2377_p8, 1, 0 }
  0x20   : > { %3139 = sst [smem:[#allocation30_spill]] %s3138_s16  ;;  %p2381_p9 = pnand %p1438_p5, %p243_p7 }
  0x21   : > { %3141 = sst [smem:[#allocation31_spill]] %s3140_s17  ;;  %s2238_s19 = smov [#allocation11]  }
  0x22   : > { %s3142_s18 = scalar_select %p2381_p9, 1, 0 }
  0x23   : > { %s255_s20 = sshll.u32 %s2238_s19, 4  ;;  %p1648_p10 = pneg %p2381_p9  ;;  %s256_s20 = int_to_ptr.vmem [resolvable:$true] %s255_s20 }
  0x24   : > { %3143 = sst [smem:[#allocation32_spill]] %s3142_s18  ;;  %s2239_s22 = smov [#allocation12]  }
  0x25   : > { %p2389_p11 = pnand %p1648_p10, %p3114_p0  ;;  %s269_s23 = sshll.u32 %s2239_s22, 4  ;;  %s2393_s23 = int_to_ptr.vmem [resolvable:$true] %s269_s23 }
  0x26   : > { %s3145_s2 = sld [smem:[#allocation36_spill]] }
  0x27   : > { %p2403_p13 = pneg %p2389_p11 }
  0x2c   : > { %s1882_s24 = scalar_lea.hbm %s3145_s2, 256 }
  0x2d   : > { %p1883_p12 = scmp.ne.s32.totalorder %s3145_s2, %s1882_s24  ;;  %p1889_p3 = scmp.lt.u32.totalorder %s1882_s24, %s3145_s2 }
  0x2f   : > { %p1885_p1 = pnand %p2403_p13, %p1883_p12 }
  0x31   : > { %p1886_p2 = pneg %p1885_p1 }
  0x33   : > { %p1891_p4 = pnand %p1889_p3, %p1886_p2 }
  0x35   : > { %1894 = shalt.err (!%p1891_p4)
}
  0x36   : > { %s1895_s17 = scalar_lea.vmem %s256_s20, 256  ;;  %p1903_p0 = scmp.lt.s32.totalorder %s256_s20, %s256_s20 }
  0x37   : > { %p1896_p5 = scmp.ne.s32.totalorder %s256_s20, %s1895_s17  ;;  %p1904_p8 = scmp.lt.s32.totalorder %s1895_s17, %s1895_s17 }
  0x39   : > { %p1898_p7 = pnand %p1896_p5, %p2403_p13  ;;  %p1905_p6 = por %p1904_p8, %p1903_p0 }
  0x3b   : > { %p1899_p10 = pneg %p1898_p7 }
  0x3d   : > { %p1906_p9 = pnand %p1905_p6, %p1899_p10 }
  0x3f   : > { %1909 = shalt.err (!%p1906_p9)
}
  0x40   : > { %s3120_s7 = smov 64   ;;  %s3121_s16 = smov 4  }
  0x41   : > { %1651 = dma.hbm_to_vmem [thread:$0]  (!%p2389_p11), %s3145_s2, 256, %s256_s20, [#allocation10], %s3120_s7, %s3120_s7, %s3121_s16  }
  0x42   : > { %s3147_s3 = sld [smem:[#allocation37_spill]] }
  0x48   : > { %s1910_s30 = scalar_lea.hbm %s3147_s3, 16 }
  0x49   : > { %p1911_p0 = scmp.ne.s32.totalorder %s3147_s3, %s1910_s30  ;;  %p1917_p9 = scmp.lt.u32.totalorder %s1910_s30, %s3147_s3 }
  0x4b   : > { %p1913_p6 = pnand %p1911_p0, %p2403_p13 }
  0x4d   : > { %p1914_p8 = pneg %p1913_p6 }
  0x4f   : > { %p1919_p12 = pnand %p1917_p9, %p1914_p8 }
  0x51   : > { %1922 = shalt.err (!%p1919_p12)
}
  0x52   : > { %s1923_s20 = scalar_lea.vmem %s2393_s23, 16  ;;  %s1930_s8 = scalar_lea.vmem %s2393_s23, 32 }
  0x53   : > { %p1924_p1 = scmp.ne.s32.totalorder %s2393_s23, %s1923_s20  ;;  %p1931_p4 = scmp.lt.s32.totalorder %s2393_s23, %s2393_s23 }
  0x54   : > { %p1932_p5 = scmp.lt.s32.totalorder %s1930_s8, %s1923_s20 }
  0x55   : > { %p1926_p2 = pnand %p1924_p1, %p2403_p13 }
  0x56   : > { %p1933_p7 = por %p1932_p5, %p1931_p4 }
  0x57   : > { %p1927_p3 = pneg %p1926_p2 }
  0x59   : > { %p1934_p10 = pnand %p1933_p7, %p1927_p3 }
  0x5b   : > { %1937 = shalt.err (!%p1934_p10)
}
  0x5c   : > { %1654 = dma.hbm_to_vmem [thread:$0]  (!%p2389_p11), %s3147_s3, 16, %s2393_s23, [#allocation13]  }
  0x5d   : > { %s2242_s18 = smov [#allocation15]   ;;  %s2243_s9 = smov [#allocation14]  }
  0x5e   : > { %s291_s24 = sshll.u32 %s2242_s18, 4  ;;  %s280_s15 = sshll.u32 %s2243_s9, 4  ;;  %s292_s24 = int_to_ptr.vmem [resolvable:$true] %s291_s24  ;;  %s281_s15 = int_to_ptr.vmem [resolvable:$true] %s280_s15 }
  0x5f   : > { %s3148_s5 = sld [smem:[#allocation39_spill]] }
  0x65   : > { %s1938_s20 = scalar_lea.hbm %s3148_s5, 16 }
  0x66   : > { %p1939_p0 = scmp.ne.s32.totalorder %s3148_s5, %s1938_s20  ;;  %p1945_p9 = scmp.lt.u32.totalorder %s1938_s20, %s3148_s5 }
  0x68   : > { %p1941_p6 = pnand %p1939_p0, %p2403_p13 }
  0x6a   : > { %p1942_p8 = pneg %p1941_p6 }
  0x6c   : > { %p1947_p12 = pnand %p1945_p9, %p1942_p8 }
  0x6e   : > { %1950 = shalt.err (!%p1947_p12)
}
  0x6f   : > { %s1951_s23 = scalar_lea.vmem %s292_s24, 16  ;;  %s1958_s30 = scalar_lea.vmem %s292_s24, 32 }
  0x70   : > { %p1952_p1 = scmp.ne.s32.totalorder %s292_s24, %s1951_s23  ;;  %p1959_p4 = scmp.lt.s32.totalorder %s292_s24, %s292_s24 }
  0x71   : > { %p1960_p5 = scmp.lt.s32.totalorder %s1958_s30, %s1951_s23 }
  0x72   : > { %p1954_p2 = pnand %p1952_p1, %p2403_p13 }
  0x73   : > { %p1961_p7 = por %p1960_p5, %p1959_p4 }
  0x74   : > { %p1955_p3 = pneg %p1954_p2 }
  0x76   : > { %p1962_p10 = pnand %p1961_p7, %p1955_p3 }
  0x78   : > { %1965 = shalt.err (!%p1962_p10)
}
  0x79   : > { %1660 = dma.hbm_to_vmem [thread:$0]  (!%p2389_p11), %s3148_s5, 16, %s292_s24, [#allocation16]  }
  0x7a   : > { %s3149_s4 = sld [smem:[#allocation38_spill]] }
  0x80   : > { %s1966_s22 = scalar_lea.hbm %s3149_s4, 16 }
  0x81   : > { %p1967_p0 = scmp.ne.s32.totalorder %s3149_s4, %s1966_s22  ;;  %p1973_p9 = scmp.lt.u32.totalorder %s1966_s22, %s3149_s4 }
  0x83   : > { %p1969_p6 = pnand %p1967_p0, %p2403_p13 }
  0x85   : > { %p1970_p8 = pneg %p1969_p6 }
  0x87   : > { %p1975_p12 = pnand %p1973_p9, %p1970_p8 }
  0x89   : > { %1978 = shalt.err (!%p1975_p12)
}
  0x8a   : > { %s1979_s23 = scalar_lea.vmem %s281_s15, 16  ;;  %s1986_s24 = scalar_lea.vmem %s281_s15, 32 }
  0x8b   : > { %p1980_p1 = scmp.ne.s32.totalorder %s281_s15, %s1979_s23  ;;  %p1987_p4 = scmp.lt.s32.totalorder %s281_s15, %s281_s15 }
  0x8c   : > { %p1988_p5 = scmp.lt.s32.totalorder %s1986_s24, %s1979_s23 }
  0x8d   : > { %p1982_p2 = pnand %p1980_p1, %p2403_p13 }
  0x8e   : > { %p1989_p7 = por %p1988_p5, %p1987_p4 }
  0x8f   : > { %p1983_p3 = pneg %p1982_p2 }
  0x91   : > { %p1990_p10 = pnand %p1989_p7, %p1983_p3 }
  0x93   : > { %1993 = shalt.err (!%p1990_p10)
}
  0x94   : > { %1657 = dma.hbm_to_vmem [thread:$0]  (!%p2389_p11), %s3149_s4, 16, %s281_s15, [#allocation13]  }
  0x95   : > { %s2244_s18 = smov [#allocation17]   ;;  %s3150_s6 = sld [smem:[#allocation40_spill]] }
  0x96   : > { %s301_s16 = sshll.u32 %s2244_s18, 4  ;;  %s302_s16 = int_to_ptr.vmem [resolvable:$true] %s301_s16 }
  0x9b   : > { %s1994_s17 = scalar_lea.hbm %s3150_s6, 512 }
  0x9c   : > { %p1995_p0 = scmp.ne.s32.totalorder %s3150_s6, %s1994_s17  ;;  %p2001_p9 = scmp.lt.u32.totalorder %s1994_s17, %s3150_s6 }
  0x9e   : > { %p1997_p6 = pnand %p1995_p0, %p2403_p13 }
  0xa0   : > { %p1998_p8 = pneg %p1997_p6 }
  0xa2   : > { %p2003_p12 = pnand %p2001_p9, %p1998_p8 }
  0xa4   : > { %2006 = shalt.err (!%p2003_p12)
}
  0xa5   : > { %s2007_s15 = scalar_lea.vmem %s302_s16, 512  ;;  %p2015_p4 = scmp.lt.s32.totalorder %s302_s16, %s302_s16 }
  0xa6   : > { %p2008_p1 = scmp.ne.s32.totalorder %s302_s16, %s2007_s15  ;;  %p2016_p5 = scmp.lt.s32.totalorder %s2007_s15, %s2007_s15 }
  0xa8   : > { %p2010_p2 = pnand %p2008_p1, %p2403_p13  ;;  %p2017_p7 = por %p2016_p5, %p2015_p4 }
  0xaa   : > { %p2011_p3 = pneg %p2010_p2 }
  0xac   : > { %p2018_p10 = pnand %p2017_p7, %p2011_p3 }
  0xae   : > { %2021 = shalt.err (!%p2018_p10)
}
  0xaf   : > { %s3122_s24 = smov 128   ;;  %s3123_s19 = smov 8  }
  0xb0   : > { %1663 = dma.hbm_to_vmem [thread:$0]  (!%p2389_p11), %s3150_s6, 512, %s302_s16, [#allocation16], %s3122_s24, %s3122_s24, %s3123_s19  }
  0xb1   : > { %s40_s18 = sadd.s32 1, %s2224_s10  ;;  %s43_s9 = sadd.s32 1, %s2228_s11 }
  0xb2   : > { %p41_p13 = scmp.ge.s32.totalorder %s40_s18, 4  ;;  %s47_s22 = sadd.s32 1, %s2232_s12 }
  0xb3   : > { %s56_s17 = sadd.s32 1, %s2208_s29  ;;  %p63_p0 = scmp.ne.s32.totalorder %s2208_s29, %s2204_s28 }
  0xb4   : > { %s3202_s18 = smov (%p41_p13, %s40_s18), 0  ;;  %s3204_s9 = smov (!%p41_p13, %s43_s9), %s2228_s11 }
  0xb5   : > { %s52_s21 = ssub.s32 %s2224_s10, %s3202_s18  ;;  %p45_p6 = scmp.ge.s32.totalorder %s3204_s9, 2 }
  0xb6   : > { %p69_p11 = scmp.ne.s32.totalorder %s2204_s28, %s2200_s27  ;;  %p64_p8 = scmp.eq.s32.totalorder %s2236_s13, 0 }
  0xb7   : > { %s212_s16 = smul.u32 %s2224_s10, %s2228_s11  ;;  %s3206_s9 = smov (%p45_p6, %s3204_s9), 0 }
  0xb8   : > { %3151 = sst [smem:[#allocation33_spill]] %s3206_s9  ;;  %s3208_s22 = smov (!%p45_p6, %s47_s22), %s2232_s12 }
  0xb9   : > { %p3152_p9 = scmp.eq.s32.totalorder %s2362_s14, 0  ;;  %s213_s8 = smul.u32 %s3206_s9, %s3202_s18 }
  0xba   : > { %p49_p1 = scmp.ge.s32.totalorder %s3208_s22, 2  ;;  %p2530_p2 = por %p64_p8, %p63_p0 }
  0xbb   : > { %p2524_p12 = por %p3152_p9, %p69_p11  ;;  %s215_s27 = ssub.s32 %s212_s16, %s213_s8 }
  0xbc   : > { %s219_s23 = sadd.s32 1, %s2196_s26  ;;  %s3210_s22 = smov (%p49_p1, %s3208_s22), 0 }
  0xbd   : > { %3155 = sst [smem:[#allocation34_spill]] %s3210_s22  ;;  %p1680_p3 = scmp.lt.s32.totalorder %s2236_s13, 16 }
  0xbe   : > { %s2539_s15 = sand.u32 1, %s2208_s29   ;;  %s51_s30 = ssub.s32 %s2232_s12, %s3210_s22 }
  0xbf   : > { %s1446_s7 = sshll.u32 %s2224_s10, 4  ;;  %s53_s24 = sor.u32 %s52_s21, %s51_s30 }
  0xc0   : > { %s216_s19 = sor.u32 %s215_s27, %s51_s30  ;;  %p54_p4 = scmp.eq.s32.totalorder %s53_s24, 0 }
  0xc1   : > { %p217_p5 = scmp.eq.s32.totalorder %s216_s19, 0  ;;  %s1445_s2 = sshll.u32 %s2539_s15, 7 }
  0xc2   : > { %s1447_s16 = sshll.u32 %s2232_s12, 6  ;;  %s319_s6 = scalar_lea.vmem [#allocation6], %s1445_s2 }
  0xc3   : > { %s2547_s8 = scalar_select %p54_p4, %s2208_s29, %s56_s17  }
  0xc4   : > { %s2550_s3 = scalar_select %p217_p5, %s2196_s26, %s219_s23  }
  0xc5   : > { %s2552_s4 = sadd.s32 %s1447_s16, %s1446_s7  ;;  %s328_s22 = sshll.u32 %s319_s6, 4  ;;  %s2560_s22 = int_to_ptr.vmem [resolvable:$true] %s328_s22 }
  0xc6   : > { %s1448_s5 = sshll.u32 %s2552_s4, 7  ;;  %s3156_s0 = sld [smem:[#allocation35_spill]] }
  0xc7   : > { %p2566_p7 = pnand %p1680_p3, %p2530_p2  ;;  %s1452_s2 = sshll.u32 %s2552_s4, 6 }
  0xc8   : > { %s338_s6 = sand.u32 1, %s2236_s13   ;;  %s316_s19 = scalar_lea.sflag [#allocation7], %s2539_s15 }
  0xc9   : > { %p2024_p13 = pneg %p2566_p7 }
  0xcc   : > { %s2558_s27 = scalar_lea.hbm %s3156_s0, %s1448_s5  ;;  %s2027_s25 = scalar_lea.hbm %s3156_s0, 16384 }
  0xcd   : > { %s2022_s9 = scalar_lea.hbm %s2558_s27, 2048  ;;  %p2028_p11 = scmp.lt.u32.totalorder %s2558_s27, %s3156_s0 }
  0xce   : > { %p2023_p10 = scmp.ne.s32.totalorder %s2558_s27, %s2022_s9  ;;  %p2029_p8 = scmp.lt.u32.totalorder %s2027_s25, %s2022_s9 }
  0xcf   : > { %p2031_p1 = scmp.lt.u32.totalorder %s2022_s9, %s2558_s27 }
  0xd0   : > { %p2025_p0 = pnand %p2024_p13, %p2023_p10  ;;  %p2030_p9 = por %p2029_p8, %p2028_p11 }
  0xd2   : > { %p2026_p6 = pneg %p2025_p0  ;;  %p2032_p2 = por %p2031_p1, %p2030_p9 }
  0xd4   : > { %p2033_p3 = pnand %p2032_p2, %p2026_p6 }
  0xd6   : > { %2036 = shalt.err (!%p2033_p3)
}
  0xd7   : > { %s2037_s7 = scalar_lea.vmem %s2560_s22, 2048  ;;  %s2247_s16 = smov [#allocation6]  }
  0xd8   : > { %p2038_p4 = scmp.ne.s32.totalorder %s2560_s22, %s2037_s7  ;;  %s2042_s21 = sshll.u32 %s2247_s16, 4  ;;  %s2043_s21 = int_to_ptr.vmem [resolvable:$false] %s2042_s21 }
  0xd9   : > { %s2044_s5 = scalar_lea.vmem %s2043_s21, 4096  ;;  %p2045_p0 = scmp.lt.s32.totalorder %s2560_s22, %s2043_s21 }
  0xda   : > { %p2040_p5 = pnand %p2038_p4, %p2024_p13  ;;  %p2046_p11 = scmp.lt.s32.totalorder %s2044_s5, %s2037_s7 }
  0xdc   : > { %p2041_p10 = pneg %p2040_p5  ;;  %p2047_p8 = por %p2046_p11, %p2045_p0 }
  0xde   : > { %p2048_p9 = pnand %p2047_p8, %p2041_p10 }
  0xe0   : > { %2051 = shalt.err (!%p2048_p9)
}
  0xe1   : > { %s3158_s9 = smov 8   ;;  %s3159_s17 = smov 128  }
  0xe2   : > { %1667 = dma.hbm_to_vmem [thread:$0]  (!%p2566_p7), %s2558_s27, 2048, %s2560_s22, %s316_s19, %s3159_s17, %s3159_s17, %s3158_s9  }
  0xe3   : > { %s2608_s30 = scalar_lea.hbm %s3102_s1, %s1452_s2  ;;  %s1449_s7 = sshll.u32 %s2539_s15, 6 }
  0xe4   : > { %s342_s16 = scalar_lea.vmem [#allocation9], %s1449_s7  ;;  %s2615_s5 = scalar_lea.sflag [#allocation10], %s338_s6 }
  0xe5   : > { %s351_s21 = sshll.u32 %s342_s16, 4  ;;  %s2052_s0 = scalar_lea.hbm %s2608_s30, 1024  ;;  %s2611_s21 = int_to_ptr.vmem [resolvable:$true] %s351_s21 }
  0xe6   : > { %p2053_p6 = scmp.ne.s32.totalorder %s2608_s30, %s2052_s0  ;;  %s2057_s27 = scalar_lea.hbm %s3102_s1, 8192 }
  0xe7   : > { %p2058_p3 = scmp.lt.u32.totalorder %s2608_s30, %s3102_s1  ;;  %p2059_p4 = scmp.lt.u32.totalorder %s2057_s27, %s2052_s0 }
  0xe8   : > { %p2055_p1 = pnand %p2053_p6, %p2024_p13  ;;  %p2061_p10 = scmp.lt.u32.totalorder %s2052_s0, %s2608_s30 }
  0xe9   : > { %p2060_p5 = por %p2059_p4, %p2058_p3 }
  0xea   : > { %p2056_p2 = pneg %p2055_p1 }
  0xeb   : > { %p2062_p0 = por %p2061_p10, %p2060_p5 }
  0xed   : > { %p2063_p11 = pnand %p2062_p0, %p2056_p2 }
  0xef   : > { %2066 = shalt.err (!%p2063_p11)
}
  0xf0   : > { %s2067_s15 = scalar_lea.vmem %s2611_s21, 1024  ;;  %s2248_s6 = smov [#allocation9]  }
  0xf1   : > { %p2068_p8 = scmp.ne.s32.totalorder %s2611_s21, %s2067_s15  ;;  %s2072_s9 = sshll.u32 %s2248_s6, 4  ;;  %s2073_s9 = int_to_ptr.vmem [resolvable:$false] %s2072_s9 }
  0xf2   : > { %s2074_s17 = scalar_lea.vmem %s2073_s9, 2048  ;;  %p2075_p1 = scmp.lt.s32.totalorder %s2611_s21, %s2073_s9 }
  0xf3   : > { %p2070_p9 = pnand %p2068_p8, %p2024_p13  ;;  %p2076_p3 = scmp.lt.s32.totalorder %s2074_s17, %s2067_s15 }
  0xf5   : > { %p2071_p6 = pneg %p2070_p9  ;;  %p2077_p4 = por %p2076_p3, %p2075_p1 }
  0xf7   : > { %p2078_p5 = pnand %p2077_p4, %p2071_p6 }
  0xf9   : > { %2081 = shalt.err (!%p2078_p5)
}
  0xfa   : > { %s3160_s0 = smov 4   ;;  %s3161_s25 = smov 64  }
  0xfb   : > { %1670 = dma.hbm_to_vmem [thread:$0]  (!%p2566_p7), %s2608_s30, 1024, %s2611_s21, %s2615_s5, %s3161_s25, %s3161_s25, %s3160_s0  }
  0xfc   : > { %s3162_s23 = sld [smem:[#allocation32_spill]] }
 0x102   : > { %p3163_p13 = scmp.ne.s32.totalorder %s3162_s23, 0 }
 0x103   : > { %s365_s7 = sand.u32 (!%p3163_p13), 1, %s2204_s28  }
 0x104   : > { %363 = sbr.rel (%p3163_p13) target bundleno = 928 (0x3a0), region = 48  ;;  %s1454_s16 = sshll.u32 (!%p3163_p13), %s365_s7, 7 }
 0x105   : > { %s366_s4 = scalar_lea.sflag (!%p3163_p13), [#allocation7], %s365_s7  ;;  %s2647_s22 = scalar_lea.vmem (!%p3163_p13), [#allocation6], %s1454_s16 }
 0x10b   : > { %2163 = dma.done.wait (%p2524_p12), %s366_s4, 2048  }
 0x10c   : > { %2165 = vsyncadd (%p2524_p12), %s366_s4, 4294965248  ;;  %s374_s24 = sand.u32 1, %s2362_s14   ;;  %s1455_s27 = sshll.u32 %s365_s7, 6 }
 0x10d   : > { %s375_s30 = scalar_lea.sflag [#allocation10], %s374_s24  ;;  %s2654_s21 = scalar_lea.vmem [#allocation9], %s1455_s27 }
 0x10e   : > { %2167 = dma.done.wait (%p2524_p12), %s375_s30, 1024  }
 0x10f   : > { %2169 = vsyncadd (%p2524_p12), %s375_s30, 4294966272  ;;  %p3164_p7 = scmp.eq.s32.totalorder %s2362_s14, 0 }
 0x111   : > { %2171 = dma.done.wait (%p3164_p7), [#allocation10], 256   ;;  %p3165_p2 = pmov %p3164_p7 }
 0x113   : > { %2173 = vsyncadd (%p3165_p2), [#allocation10], 4294967040  ;;  %p3166_p10 = pmov %p3165_p2 }
 0x114   : > { %p3167_p0 = pmov %p3165_p2 }
 0x115   : > { %2175 = dma.done.wait (%p3166_p10), [#allocation13], 32  }
 0x116   : > { %2177 = vsyncadd (%p3167_p0), [#allocation13], 4294967264  ;;  %p3168_p11 = pmov %p3167_p0 }
 0x117   : > { %p3169_p8 = pmov %p3167_p0 }
 0x118   : > { %2179 = dma.done.wait (%p3168_p11), [#allocation16], 528  }
 0x119   : > { %2181 = vsyncadd (%p3169_p8), [#allocation16], 4294966768  ;;  %s3170_s20 = sld [smem:[#allocation26_spill]]  ;;  %v1806_v0 = vld [vmem:[#allocation11] sm:$0xff]   ;;  %v1807_v1 = vld [vmem:[#allocation11 + $0x8] sm:$0xff]   ;;  %vm527_vm0 = vcmask 261120  }
 0x11a   : > { %1564 = vmatprep.subr.bf16.mxu0 %v1806_v0  ;;  %1618 = vmatprep.subr.bf16.mxu1 %v1806_v0  ;;  %v1808_v2 = vld [vmem:[%s2654_s21] sm:$0xff]   ;;  %v1810_v4 = vld [vmem:[%s2654_s21 + $0x8] sm:$0xff]   ;;  %v1812_v6 = vld [vmem:[%s2654_s21 + $0x10] sm:$0xff]   ;;  %s3171_s19 = sld [smem:[#allocation28_spill]] }
 0x11b   : > { %1565 = vmatpush3.bf16.msra.mxu0 %v1806_v0  ;;  %1620 = vmatpush3.bf16.msra.mxu1 %v1806_v0  ;;  %v1809_v3 = vld [vmem:[%s2654_s21 + $0x20] sm:$0xff]   ;;  %v1811_v5 = vld [vmem:[%s2654_s21 + $0x28] sm:$0xff]   ;;  %v1813_v7 = vld [vmem:[%s2654_s21 + $0x30] sm:$0xff]  }
 0x11c   : > { %1566 = vmatprep.subr.bf16.mxu0 %v1807_v1  ;;  %1619 = vmatprep.subr.bf16.mxu1 %v1807_v1  ;;  %v1814_v8 = vld [vmem:[%s2654_s21 + $0x18] sm:$0xff]   ;;  %v441_v10 = vld [vmem:[%s2647_s22 + $0x10] sm:$0xff]  ;;  %v439_v12 = vld [vmem:[%s2647_s22] sm:$0xff] }
 0x11d   : > { %1568 = vmatprep.mubr.msk.bf16.mxu0 %vm527_vm0, %v1808_v2  ;;  %1576 = vmatprep.mubr.msk.bf16.mxu1 %vm527_vm0, %v1809_v3  ;;  %v1815_v9 = vld [vmem:[%s2654_s21 + $0x38] sm:$0xff]   ;;  %v449_v11 = vld [vmem:[%s2647_s22 + $0x50] sm:$0xff]  ;;  %v447_v13 = vld [vmem:[%s2647_s22 + $0x40] sm:$0xff] }
 0x11e   : > { %v1480_v15 = vld [vmem:[#allocation12] ss:$0 sm:$0xff]  ;;  %v442_v17 = vld [vmem:[%s2647_s22 + $0x18] sm:$0xff]  ;;  %v440_v23 = vld [vmem:[%s2647_s22 + $0x8] sm:$0xff] }
 0x11f   : > { %s431_s5 = sand.u32 1, %s3170_s20   ;;  %1567 = vmatpush3.bf16.msra.mxu0 %v1807_v1  ;;  %1621 = vmatpush3.bf16.msra.mxu1 %v1807_v1  ;;  %v450_v18 = vld [vmem:[%s2647_s22 + $0x58] sm:$0xff]  ;;  %v448_v24 = vld [vmem:[%s2647_s22 + $0x48] sm:$0xff]  ;;  %v445_v43 = vld [vmem:[%s2647_s22 + $0x30] sm:$0xff] }
 0x120   : > { %s2675_s2 = sshll.u32 %s431_s5, 6  ;;  %v453_v44 = vld [vmem:[%s2647_s22 + $0x70] sm:$0xff]  ;;  %v443_v45 = vld [vmem:[%s2647_s22 + $0x20] sm:$0xff]  ;;  %v446_v49 = vld [vmem:[%s2647_s22 + $0x38] sm:$0xff]  ;;  %p1481_p12 = scmp.ne.s32.totalorder %s3171_s19, 0 }
 0x121   : > { %v451_v46 = vld [vmem:[%s2647_s22 + $0x60] sm:$0xff]  ;;  %v454_v50 = vld [vmem:[%s2647_s22 + $0x78] sm:$0xff]  ;;  %v444_v55 = vld [vmem:[%s2647_s22 + $0x28] sm:$0xff]  ;;  %s2742_s14 = scalar_lea.vmem [#allocation18], %s2675_s2  ;;  %s3172_s15 = sld [smem:[#allocation27_spill]] (!%p1481_p12) }
 0x122   : > { %1569 = vmatmul.mubr.msk.bf16.vlgmr.msra.gmra.mrb[0].mxu0 %vm527_vm0, %v1810_v4  ;;  %1577 = vmatmul.mubr.msk.bf16.vlgmr.msra.gmra.mrb[0].mxu1 %vm527_vm0, %v1811_v5  ;;  %v452_v56 = vld [vmem:[%s2647_s22 + $0x68] sm:$0xff] }
 0x123   : > { %1572 = vmatprep.mubr.msk.bf16.mxu0 %vm527_vm0, %v1812_v6  ;;  %1580 = vmatprep.mubr.msk.bf16.mxu1 %vm527_vm0, %v1813_v7 }
 0x127   : > { %p1482_p9 = scmp.ne.s32.totalorder (!%p1481_p12), %s3172_s15, 0 }
 0x12a   : > { %1573 = vmatmul.mubr.msk.bf16.gmra.mrb[4].mxu0 %vm527_vm0, %v1814_v8  ;;  %1581 = vmatmul.mubr.msk.bf16.gmra.mrb[4].mxu1 %vm527_vm0, %v1815_v9 }
 0x1f5   : > { %v1570_v14 = vpop.f32.mrb[0].mxu0  ;;  %v1578_v16 = vpop.f32.mrb[0].mxu1 }
 0x1f6   : > { %v651_v19 = vadd.f32 %v1570_v14, %v441_v10  ;;  %v659_v20 = vadd.f32 %v1578_v16, %v449_v11  ;;  %v586_v21 = vpop.f32.mrb[1].mxu0  ;;  %v618_v22 = vpop.f32.mrb[1].mxu1 }
 0x1f7   : > { %v649_v25 = vadd.f32 %v586_v21, %v439_v12  ;;  %v657_v26 = vadd.f32 %v618_v22, %v447_v13  ;;  %v1571_v27 = vpop.f32.mrb[2].mxu0  ;;  %v1579_v28 = vpop.f32.mrb[2].mxu1 }
 0x1f8   : > { %v2701_v29 = vadd.f32 %v1480_v15, %v651_v19  ;;  %v2703_v30 = vadd.f32 %v1480_v15, %v659_v20  ;;  %v652_v31 = vadd.f32 %v1571_v27, %v442_v17  ;;  %v660_v32 = vadd.f32 %v1579_v28, %v450_v18  ;;  %v589_v33 = vpop.f32.mrb[3].mxu0  ;;  %v621_v34 = vpop.f32.mrb[3].mxu1 }
 0x1f9   : > { %v2705_v35 = vadd.f32 %v1480_v15, %v649_v25  ;;  %v2707_v36 = vadd.f32 %v1480_v15, %v657_v26  ;;  %v650_v37 = vadd.f32 %v589_v33, %v440_v23  ;;  %v658_v38 = vadd.f32 %v621_v34, %v448_v24 }
 0x1fa   : > { %v2709_v39 = vadd.f32 %v1480_v15, %v652_v31  ;;  %v2711_v40 = vadd.f32 %v1480_v15, %v660_v32 }
 0x1fb   : > { %v2713_v41 = vadd.f32 %v1480_v15, %v650_v37  ;;  %v2715_v42 = vadd.f32 %v1480_v15, %v658_v38 }
 0x1fd   : > { %v1574_v47 = vpop.f32.mrb[4].mxu0  ;;  %v1582_v48 = vpop.f32.mrb[4].mxu1  ;;  %691 = sbr.rel (%p1481_p12) target bundleno = 572 (0x23c), region = 80 }
 0x1fe   : > { %v655_v51 = vadd.f32 %v1574_v47, %v445_v43  ;;  %v663_v52 = vadd.f32 %v1582_v48, %v453_v44  ;;  %v602_v53 = vpop.f32.mrb[5].mxu0  ;;  %v634_v54 = vpop.f32.mrb[5].mxu1 }
 0x1ff   : > { %v653_v57 = vadd.f32 %v602_v53, %v443_v45  ;;  %v661_v58 = vadd.f32 %v634_v54, %v451_v46  ;;  %v1575_v59 = vpop.f32.mrb[6].mxu0  ;;  %v1583_v60 = vpop.f32.mrb[6].mxu1 }
 0x200   : > { %v2725_v61 = vadd.f32 %v1480_v15, %v655_v51  ;;  %v2727_v62 = vadd.f32 %v1480_v15, %v663_v52  ;;  %v656_v63 = vadd.f32 %v1575_v59, %v446_v49  ;;  %v664_v0 = vadd.f32 %v1583_v60, %v454_v50  ;;  %v605_v1 = vpop.f32.mrb[7].mxu0  ;;  %v637_v2 = vpop.f32.mrb[7].mxu1 }
 0x201   : > { %v2729_v3 = vadd.f32 %v1480_v15, %v653_v57  ;;  %v2731_v4 = vadd.f32 %v1480_v15, %v661_v58  ;;  %v654_v5 = vadd.f32 %v605_v1, %v444_v55  ;;  %v662_v6 = vadd.f32 %v637_v2, %v452_v56 }
 0x202   : > { %v2733_v7 = vadd.f32 %v1480_v15, %v656_v63  ;;  %v2735_v8 = vadd.f32 %v1480_v15, %v664_v0 }
 0x203   : > { %v2737_v9 = vadd.f32 %v1480_v15, %v654_v5  ;;  %v2739_v10 = vadd.f32 %v1480_v15, %v662_v6 }
 0x204   : > { %695 = sbr.rel (%p1482_p9) target bundleno = 523 (0x20b), region = 84  ;;  %vm696_vm1 = vcmask (!%p1482_p9), 253952   ;;  %v2249_v11 = vmov (!%p1482_p9), 0.0  }
 0x205   : > { %697 = vst.msk [vmem:[#allocation2] sm:$0x1] (!%p1482_p9), %vm696_vm1, %v2249_v11  ;;  %698 = vst.msk [vmem:[#allocation3] sm:$0x1] (!%p1482_p9), %vm696_vm1, %v2249_v11 }
 0x20b PF: > { %v700_v12 = vsel %vm527_vm0, %v2705_v35, 0.0  ;;  %v701_v13 = vsel %vm527_vm0, %v2713_v41, 0.0  ;;  %v703_v14 = vsel %vm527_vm0, %v2701_v29, 0.0  ;;  %v705_v16 = vsel %vm527_vm0, %v2709_v39, 0.0 }
 0x20c   : > { %v702_v15 = vadd.f32 %v701_v13, %v700_v12  ;;  %v707_v18 = vsel %vm527_vm0, %v2729_v3, 0.0  ;;  %v741_v20 = vmul.f32 %v2705_v35, %v2705_v35  ;;  %v742_v21 = vmul.f32 %v2713_v41, %v2713_v41 }
 0x20d   : > { %v709_v22 = vsel %vm527_vm0, %v2737_v9, 0.0  ;;  %v743_v23 = vmul.f32 %v2701_v29, %v2701_v29  ;;  %v744_v25 = vmul.f32 %v2709_v39, %v2709_v39  ;;  %v711_v26 = vsel %vm527_vm0, %v2725_v61, 0.0 }
 0x20e   : > { %v704_v17 = vadd.f32 %v703_v14, %v702_v15  ;;  %v745_v28 = vmul.f32 %v2729_v3, %v2729_v3  ;;  %v757_v31 = vsel %vm527_vm0, %v741_v20, 0.0  ;;  %v758_v32 = vsel %vm527_vm0, %v742_v21, 0.0 }
 0x20f   : > { %v713_v33 = vsel %vm527_vm0, %v2733_v7, 0.0  ;;  %v759_v34 = vadd.f32 %v758_v32, %v757_v31  ;;  %v760_v37 = vsel %vm527_vm0, %v743_v23, 0.0  ;;  %v746_v43 = vmul.f32 %v2737_v9, %v2737_v9 }
 0x210   : > { %v706_v19 = vadd.f32 %v705_v16, %v704_v17  ;;  %v762_v44 = vsel %vm527_vm0, %v744_v25, 0.0  ;;  %v715_v45 = vsel %vm527_vm0, %v2707_v36, 0.0  ;;  %v747_v48 = vmul.f32 %v2725_v61, %v2725_v61 }
 0x211   : > { %v761_v46 = vadd.f32 %v760_v37, %v759_v34  ;;  %v764_v49 = vsel %vm527_vm0, %v745_v28, 0.0  ;;  %v717_v50 = vsel %vm527_vm0, %v2715_v42, 0.0  ;;  %v748_v53 = vmul.f32 %v2733_v7, %v2733_v7 }
 0x212   : > { %v708_v24 = vadd.f32 %v707_v18, %v706_v19  ;;  %v766_v54 = vsel %vm527_vm0, %v746_v43, 0.0  ;;  %v719_v55 = vsel %vm527_vm0, %v2703_v30, 0.0  ;;  %v749_v58 = vmul.f32 %v2707_v36, %v2707_v36 }
 0x213   : > { %v763_v51 = vadd.f32 %v762_v44, %v761_v46  ;;  %v768_v59 = vsel %vm527_vm0, %v747_v48, 0.0  ;;  %v721_v60 = vsel %vm527_vm0, %v2711_v40, 0.0  ;;  %v750_v1 = vmul.f32 %v2715_v42, %v2715_v42 }
 0x214   : > { %v710_v27 = vadd.f32 %v709_v22, %v708_v24  ;;  %v770_v2 = vsel %vm527_vm0, %v748_v53, 0.0  ;;  %v723_v5 = vsel %vm527_vm0, %v2731_v4, 0.0  ;;  %v751_v12 = vmul.f32 %v2703_v30, %v2703_v30 }
 0x215   : > { %v765_v56 = vadd.f32 %v764_v49, %v763_v51  ;;  %v772_v13 = vsel %vm527_vm0, %v749_v58, 0.0  ;;  %v725_v14 = vsel %vm527_vm0, %v2739_v10, 0.0  ;;  %v752_v17 = vmul.f32 %v2711_v40, %v2711_v40 }
 0x216   : > { %v712_v38 = vadd.f32 %v711_v26, %v710_v27  ;;  %v774_v18 = vsel %vm527_vm0, %v750_v1, 0.0  ;;  %v727_v19 = vsel %vm527_vm0, %v2727_v62, 0.0  ;;  %v753_v22 = vmul.f32 %v2731_v4, %v2731_v4  ;;  %v740_v1 = vld [vmem:[#allocation3] sm:$0x1] }
 0x217   : > { %v767_v63 = vadd.f32 %v766_v54, %v765_v56  ;;  %v776_v23 = vsel %vm527_vm0, %v751_v12, 0.0  ;;  %v729_v24 = vsel %vm527_vm0, %v2735_v8, 0.0  ;;  %v754_v27 = vmul.f32 %v2739_v10, %v2739_v10 }
 0x218   : > { %v714_v47 = vadd.f32 %v713_v33, %v712_v38  ;;  %v778_v28 = vsel %vm527_vm0, %v752_v17, 0.0  ;;  %v755_v33 = vmul.f32 %v2727_v62, %v2727_v62  ;;  %v780_v34 = vsel %vm527_vm0, %v753_v22, 0.0 }
 0x219   : > { %v769_v6 = vadd.f32 %v768_v59, %v767_v63  ;;  %v756_v43 = vmul.f32 %v2735_v8, %v2735_v8  ;;  %v782_v44 = vsel %vm527_vm0, %v754_v27, 0.0  ;;  %vm738_vm2 = vcmask 253952  }
 0x21a   : > { %v716_v52 = vadd.f32 %v715_v45, %v714_v47  ;;  %v784_v47 = vsel %vm527_vm0, %v755_v33, 0.0 }
 0x21b   : > { %v771_v15 = vadd.f32 %v770_v2, %v769_v6 }
 0x21c   : > { %v718_v57 = vadd.f32 %v717_v50, %v716_v52  ;;  %v786_v50 = vsel %vm527_vm0, %v756_v43, 0.0 }
 0x21d   : > { %v773_v20 = vadd.f32 %v772_v13, %v771_v15 }
 0x21e   : > { %v720_v0 = vadd.f32 %v719_v55, %v718_v57  ;;  %v699_v55 = vld [vmem:[#allocation2] sm:$0x1] }
 0x21f   : > { %v775_v25 = vadd.f32 %v774_v18, %v773_v20 }
 0x220   : > { %v722_v11 = vadd.f32 %v721_v60, %v720_v0 }
 0x221   : > { %v777_v31 = vadd.f32 %v776_v23, %v775_v25 }
 0x222   : > { %v724_v16 = vadd.f32 %v723_v5, %v722_v11 }
 0x223   : > { %v779_v37 = vadd.f32 %v778_v28, %v777_v31 }
 0x224   : > { %v726_v21 = vadd.f32 %v725_v14, %v724_v16 }
 0x225   : > { %v781_v45 = vadd.f32 %v780_v34, %v779_v37 }
 0x226   : > { %v728_v26 = vadd.f32 %v727_v19, %v726_v21 }
 0x227   : > { %v783_v48 = vadd.f32 %v782_v44, %v781_v45 }
 0x228   : > { %v730_v32 = vadd.f32 %v729_v24, %v728_v26 }
 0x229   : > { %v785_v51 = vadd.f32 %v784_v47, %v783_v48 }
 0x22a   : > { %v731_v38 = vrot.slane %v730_v32, 4 }
 0x22b   : > { %v787_v53 = vadd.f32 %v786_v50, %v785_v51 }
 0x22c   : > { %v732_v46 = vadd.f32 %v731_v38, %v730_v32 }
 0x22d   : > { %v788_v56 = vrot.slane %v787_v53, 4 }
 0x22e   : > { %v733_v49 = vrot.slane %v732_v46, 2 }
 0x22f   : > { %v789_v58 = vadd.f32 %v788_v56, %v787_v53 }
 0x230   : > { %v734_v52 = vadd.f32 %v733_v49, %v732_v46 }
 0x231   : > { %v790_v60 = vrot.slane %v789_v58, 2 }
 0x232   : > { %v735_v54 = vrot.slane %v734_v52, 1 }
 0x233   : > { %v791_v63 = vadd.f32 %v790_v60, %v789_v58 }
 0x234   : > { %v736_v57 = vadd.f32 %v735_v54, %v734_v52 }
 0x235   : > { %v792_v0 = vrot.slane %v791_v63, 1 }
 0x236   : > { %v737_v59 = vadd.f32 %v736_v57, %v699_v55 }
 0x237   : > { %v793_v2 = vadd.f32 %v792_v0, %v791_v63 }
 0x238   : > { %739 = vst.msk [vmem:[#allocation2] sm:$0x1] %vm738_vm2, %v737_v59 }
 0x239   : > { %v794_v5 = vadd.f32 %v793_v2, %v740_v1 }
 0x23b   : > { %795 = vst.msk [vmem:[#allocation3] sm:$0x1] %vm738_vm2, %v794_v5 }
 0x23c PF: > { %s3173_s6 = sld [smem:[#allocation28_spill]]  ;;  %s3174_s9 = sld [smem:[#allocation27_spill]] }
 0x242   : > { %p796_p6 = scmp.eq.s32.totalorder %s3173_s6, 1  ;;  %p797_p1 = scmp.eq.s32.totalorder %s3174_s9, 0 }
 0x244   : > { %p798_p3 = pnand %p797_p1, %p796_p6 }
 0x245   : > { %v803_v6 = vld [vmem:[#allocation17] sm:$0xff] (!%p798_p3)  ;;  %v804_v11 = vld [vmem:[#allocation17 + $0x8] sm:$0xff] (!%p798_p3)  ;;  %v805_v12 = vld [vmem:[#allocation17 + $0x10] sm:$0xff] (!%p798_p3)  ;;  %v2250_v13 = vmov (!%p798_p3), 0.0|0.0   ;;  %vm2251_vm3 = vmmov (!%p798_p3), 0   ;;  %v2252_v16 = vmov (!%p798_p3), 0.0  }
 0x246   : > { %801 = sbr.rel (%p798_p3) target bundleno = 823 (0x337), region = 88  ;;  %1606 = vmatprep.subr.bf16.mxu0 (!%p798_p3), %v2250_v13  ;;  %v1607_v14 = vpack.c.bf16 (!%p798_p3), %v804_v11, %v803_v6  ;;  %1612 = vmatprep.subr.bf16.mxu1 (!%p798_p3), %v2250_v13  ;;  %v806_v15 = vld [vmem:[#allocation17 + $0x18] sm:$0xff] (!%p798_p3)  ;;  %v802_v18 = vld [vmem:[#allocation2] sm:$0x1] (!%p798_p3)  ;;  %v880_v19 = vld [vmem:[#allocation3] sm:$0x1] (!%p798_p3) }
 0x247   : > { %1592 = vmatprep.mubr.msk.f32.mxu0 (!%p798_p3), %vm2251_vm3, %v2252_v16  ;;  %1603 = vmatprep.mubr.msk.f32.mxu1 (!%p798_p3), %vm2251_vm3, %v2252_v16  ;;  %v1610_v17 = vpack.c.bf16 (!%p798_p3), %v806_v15, %v805_v12  ;;  %vm957_vm4 = vcmask (!%p798_p3), 253952  }
 0x248   : > { %1608 = vmatpush3.bf16.msra.mxu0 (!%p798_p3), %v1607_v14  ;;  %1614 = vmatpush3.bf16.msra.mxu1 (!%p798_p3), %v1607_v14 }
 0x249   : > { %1609 = vmatprep.subr.bf16.mxu0 (!%p798_p3), %v2250_v13  ;;  %1615 = vmatprep.subr.bf16.mxu1 (!%p798_p3), %v2250_v13 }
 0x24c   : > { %1611 = vmatpush3.bf16.msra.mxu0 (!%p798_p3), %v1610_v17  ;;  %1617 = vmatpush3.bf16.msra.mxu1 (!%p798_p3), %v1610_v17 }
 0x24f   : > { %1593 = vmatmul.mubr.msk.f32.vlgmr.msra.gmra.mrb[0].mxu0 %vm527_vm0, %v802_v18  ;;  %1604 = vmatmul.mubr.msk.f32.vlgmr.msra.gmra.mrb[0].mxu1 %vm527_vm0, %v880_v19 }
 0x322   : > { %v876_v20 = vpop.f32.mrb[0].mxu0  ;;  %v950_v21 = vpop.f32.mrb[0].mxu1 }
 0x323   : > { %v954_v22 = vmul.f32 %v876_v20, %v876_v20  ;;  %958 = vst.msk [vmem:[#allocation4] sm:$0x1] %vm957_vm4, %v876_v20  ;;  %v1594_v23 = vpop.f32.mrb[1].mxu0  ;;  %v1605_v24 = vpop.f32.mrb[1].mxu1 }
 0x325   : > { %v955_v25 = vsub.f32 %v950_v21, %v954_v22 }
 0x327   : > { %v956_v26 = vmax.f32 %v955_v25, 0.0 }
 0x329   : > { %v959_v27 = vadd.f32 1e-05, %v956_v26 }
 0x32b   : > { %1816 = vrsqrt.f32 %v959_v27 }
 0x335   : > { %v1817_v28 = vpop.eup %1816 }
 0x336   : > { %961 = vst.msk [vmem:[#allocation5] sm:$0x1] %vm957_vm4, %v1817_v28 }
 0x337 PF: > { %s3175_s17 = sld [smem:[#allocation28_spill]] }
 0x33d   : > { %p1485_p4 = scmp.ne.s32.totalorder %s3175_s17, 1 }
 0x33e   : > { %v2831_v31 = vld [vmem:[#allocation4] ss:$0 sm:$0xff] (!%p1485_p4)  ;;  %v2833_v32 = vld [vmem:[#allocation5] ss:$0 sm:$0xff] (!%p1485_p4)  ;;  %v2841_v38 = vld [vmem:[#allocation14] ss:$0 sm:$0xff] (!%p1485_p4) }
 0x33f   : > { %964 = sbr.rel (%p1485_p4) target bundleno = 898 (0x382), region = 92  ;;  %v972_v33 = vsub.f32 (!%p1485_p4), %v2705_v35, %v2831_v31  ;;  %v973_v34 = vsub.f32 (!%p1485_p4), %v2713_v41, %v2831_v31  ;;  %v974_v37 = vsub.f32 (!%p1485_p4), %v2701_v29, %v2831_v31  ;;  %v975_v43 = vsub.f32 (!%p1485_p4), %v2709_v39, %v2831_v31  ;;  %v2856_v48 = vld [vmem:[#allocation15] ss:$0 sm:$0xff] (!%p1485_p4) }
 0x340   : > { %v976_v44 = vsub.f32 (!%p1485_p4), %v2729_v3, %v2831_v31  ;;  %v977_v45 = vsub.f32 (!%p1485_p4), %v2737_v9, %v2831_v31  ;;  %v978_v35 = vsub.f32 (!%p1485_p4), %v2725_v61, %v2831_v31  ;;  %v979_v47 = vsub.f32 (!%p1485_p4), %v2733_v7, %v2831_v31 }
 0x341   : > { %v995_v46 = vmul.f32 (!%p1485_p4), %v2833_v32, %v972_v33  ;;  %v996_v41 = vmul.f32 (!%p1485_p4), %v2833_v32, %v973_v34  ;;  %v997_v29 = vmul.f32 (!%p1485_p4), %v2833_v32, %v974_v37  ;;  %v998_v39 = vmul.f32 (!%p1485_p4), %v2833_v32, %v975_v43 }
 0x342   : > { %v999_v3 = vmul.f32 (!%p1485_p4), %v2833_v32, %v976_v44  ;;  %v1000_v9 = vmul.f32 (!%p1485_p4), %v2833_v32, %v977_v45  ;;  %v1001_v49 = vmul.f32 (!%p1485_p4), %v2833_v32, %v978_v35  ;;  %v1002_v52 = vmul.f32 (!%p1485_p4), %v2833_v32, %v979_v47 }
 0x343   : > { %v1018_v61 = vmul.f32 (!%p1485_p4), %v2841_v38, %v995_v46  ;;  %v1019_v50 = vmul.f32 (!%p1485_p4), %v2841_v38, %v996_v41  ;;  %v1020_v51 = vmul.f32 (!%p1485_p4), %v2841_v38, %v997_v29  ;;  %v1021_v7 = vmul.f32 (!%p1485_p4), %v2841_v38, %v998_v39 }
 0x344   : > { %v1022_v53 = vmul.f32 (!%p1485_p4), %v2841_v38, %v999_v3  ;;  %v1023_v54 = vmul.f32 (!%p1485_p4), %v2841_v38, %v1000_v9  ;;  %v1024_v55 = vmul.f32 (!%p1485_p4), %v2841_v38, %v1001_v49  ;;  %v1025_v59 = vmul.f32 (!%p1485_p4), %v2841_v38, %v1002_v52 }
 0x345   : > { %v2871_v56 = vadd.f32 (!%p1485_p4), %v2856_v48, %v1018_v61  ;;  %v2874_v57 = vadd.f32 (!%p1485_p4), %v2856_v48, %v1019_v50  ;;  %v2877_v58 = vadd.f32 (!%p1485_p4), %v2856_v48, %v1020_v51  ;;  %v2881_v60 = vadd.f32 (!%p1485_p4), %v2856_v48, %v1021_v7 }
 0x346   : > { %v2884_v63 = vadd.f32 %v2856_v48, %v1022_v53  ;;  %v2887_v0 = vadd.f32 %v2856_v48, %v1023_v54  ;;  %v2890_v1 = vadd.f32 %v2856_v48, %v1024_v55  ;;  %v2896_v11 = vadd.f32 %v2856_v48, %v1025_v59 }
 0x347   : > { %v1490_v2 = vmul.f32 -1.442695, %v2871_v56  ;;  %v1491_v5 = vmul.f32 -1.442695, %v2874_v57  ;;  %v1492_v6 = vmul.f32 -1.442695, %v2877_v58  ;;  %v980_v14 = vsub.f32 %v2707_v36, %v2831_v31 }
 0x348   : > { %v1493_v12 = vmul.f32 -1.442695, %v2881_v60  ;;  %v1494_v13 = vmul.f32 -1.442695, %v2884_v63  ;;  %v1495_v15 = vmul.f32 -1.442695, %v2887_v0  ;;  %v981_v17 = vsub.f32 %v2715_v42, %v2831_v31 }
 0x349   : > { %1818 = vpow2.f32 %v1490_v2  ;;  %v1496_v16 = vmul.f32 -1.442695, %v2890_v1  ;;  %v1003_v18 = vmul.f32 %v2833_v32, %v980_v14  ;;  %v982_v19 = vsub.f32 %v2703_v30, %v2831_v31 }
 0x34a   : > { %1820 = vpow2.f32 %v1491_v5  ;;  %v983_v20 = vsub.f32 %v2711_v40, %v2831_v31  ;;  %v1497_v36 = vmul.f32 -1.442695, %v2896_v11  ;;  %v1004_v21 = vmul.f32 %v2833_v32, %v981_v17 }
 0x34b   : > { %1822 = vpow2.f32 %v1492_v6  ;;  %v984_v22 = vsub.f32 %v2731_v4, %v2831_v31  ;;  %v1026_v42 = vmul.f32 %v2841_v38, %v1003_v18  ;;  %v1005_v23 = vmul.f32 %v2833_v32, %v982_v19 }
 0x34c   : > { %1824 = vpow2.f32 %v1493_v12  ;;  %v1006_v24 = vmul.f32 %v2833_v32, %v983_v20  ;;  %v1027_v30 = vmul.f32 %v2841_v38, %v1004_v21  ;;  %v985_v28 = vsub.f32 %v2739_v10, %v2831_v31 }
 0x34d   : > { %1826 = vpow2.f32 %v1494_v13  ;;  %v1007_v40 = vmul.f32 %v2833_v32, %v984_v22  ;;  %v2921_v25 = vadd.f32 %v2856_v48, %v1026_v42  ;;  %v1028_v26 = vmul.f32 %v2841_v38, %v1005_v23 }
 0x34e   : > { %1828 = vpow2.f32 %v1495_v15  ;;  %v1029_v4 = vmul.f32 %v2841_v38, %v1006_v24  ;;  %v2926_v27 = vadd.f32 %v2856_v48, %v1027_v30  ;;  %v986_v45 = vsub.f32 %v2727_v62, %v2831_v31 }
 0x34f   : > { %1830 = vpow2.f32 %v1496_v16  ;;  %v1498_v33 = vmul.f32 -1.442695, %v2921_v25  ;;  %v2932_v34 = vadd.f32 %v2856_v48, %v1028_v26  ;;  %v1030_v44 = vmul.f32 %v2841_v38, %v1007_v40 }
 0x350   : > { %1832 = vpow2.f32 %v1497_v36  ;;  %v2935_v37 = vadd.f32 %v2856_v48, %v1029_v4  ;;  %v1499_v43 = vmul.f32 -1.442695, %v2926_v27  ;;  %v987_v46 = vsub.f32 %v2735_v8, %v2831_v31 }
 0x351   : > { %1834 = vpow2.f32 %v1498_v33  ;;  %v1500_v35 = vmul.f32 -1.442695, %v2932_v34  ;;  %v1008_v29 = vmul.f32 %v2833_v32, %v985_v28  ;;  %v1009_v3 = vmul.f32 %v2833_v32, %v986_v45 }
 0x352   : > { %v1501_v10 = vmul.f32 -1.442695, %v2935_v37  ;;  %1836 = vpow2.f32 %v1499_v43  ;;  %v1010_v62 = vmul.f32 %v2833_v32, %v987_v46  ;;  %v2949_v51 = vadd.f32 %v2856_v48, %v1030_v44 }
 0x353   : > { %v1819_v41 = vpop.eup %1818  ;;  %1838 = vpow2.f32 %v1500_v35  ;;  %v1031_v52 = vmul.f32 %v2841_v38, %v1008_v29  ;;  %v1032_v54 = vmul.f32 %v2841_v38, %v1009_v3  ;;  %vm1233_vm5 = vcmask 257024  }
 0x354   : > { %v1821_v47 = vpop.eup %1820  ;;  %v1105_v39 = vadd.f32 1.0, %v1819_v41  ;;  %1840 = vpow2.f32 %v1501_v10  ;;  %v1033_v32 = vmul.f32 %v2841_v38, %v1010_v62  ;;  %v1502_v6 = vmul.f32 -1.442695, %v2949_v51 }
 0x355   : > { %v1823_v9 = vpop.eup %1822  ;;  %v1106_v49 = vadd.f32 1.0, %v1821_v47  ;;  %v2956_v13 = vadd.f32 %v2856_v48, %v1031_v52  ;;  %v2959_v15 = vadd.f32 %v2856_v48, %v1032_v54 }
 0x356   : > { %v1825_v61 = vpop.eup %1824  ;;  %1842 = vrcp.f32 %v1105_v39  ;;  %v1107_v50 = vadd.f32 1.0, %v1823_v9  ;;  %v2962_v38 = vadd.f32 %v2856_v48, %v1033_v32 }
 0x357   : > { %v1827_v8 = vpop.eup %1826  ;;  %1844 = vrcp.f32 %v1106_v49  ;;  %v1108_v31 = vadd.f32 1.0, %v1825_v61  ;;  %v1503_v21 = vmul.f32 -1.442695, %v2956_v13  ;;  %v1504_v23 = vmul.f32 -1.442695, %v2959_v15 }
 0x358   : > { %v1829_v7 = vpop.eup %1828  ;;  %1846 = vrcp.f32 %v1107_v50  ;;  %v1109_v53 = vadd.f32 1.0, %v1827_v8  ;;  %v1505_v48 = vmul.f32 -1.442695, %v2962_v38 }
 0x359   : > { %v1831_v55 = vpop.eup %1830  ;;  %1848 = vrcp.f32 %v1108_v31  ;;  %v1110_v59 = vadd.f32 1.0, %v1829_v7 }
 0x35a   : > { %v1833_v2 = vpop.eup %1832  ;;  %1850 = vrcp.f32 %v1109_v53  ;;  %v1111_v5 = vadd.f32 1.0, %v1831_v55 }
 0x35b   : > { %1852 = vrcp.f32 %v1110_v59  ;;  %v1112_v12 = vadd.f32 1.0, %v1833_v2  ;;  %v1835_v14 = vpop.eup %1834 }
 0x35c   : > { %1854 = vrcp.f32 %v1111_v5  ;;  %v1837_v16 = vpop.eup %1836  ;;  %v1113_v17 = vadd.f32 1.0, %v1835_v14 }
 0x35d   : > { %1856 = vrcp.f32 %v1112_v12  ;;  %v1839_v18 = vpop.eup %1838  ;;  %v1114_v19 = vadd.f32 1.0, %v1837_v16 }
 0x35e   : > { %1858 = vpow2.f32 %v1502_v6  ;;  %v1841_v20 = vpop.eup %1840  ;;  %v1115_v36 = vadd.f32 1.0, %v1839_v18 }
 0x35f   : > { %1860 = vrcp.f32 %v1113_v17  ;;  %v1116_v42 = vadd.f32 1.0, %v1841_v20 }
 0x360   : > { %v1843_v22 = vpop.eup %1842  ;;  %1862 = vrcp.f32 %v1114_v19 }
 0x361   : > { %v1845_v24 = vpop.eup %1844  ;;  %v1153_v30 = vmul.f32 %v1843_v22, %v2871_v56  ;;  %1864 = vrcp.f32 %v1115_v36 }
 0x362   : > { %v1847_v40 = vpop.eup %1846  ;;  %v1154_v26 = vmul.f32 %v1845_v24, %v2874_v57  ;;  %1866 = vrcp.f32 %v1116_v42 }
 0x363   : > { %v1849_v4 = vpop.eup %1848  ;;  %v1528_v28 = vpack.c.bf16 %v1153_v30, %v1153_v30  ;;  %v1155_v33 = vmul.f32 %v1847_v40, %v2877_v58  ;;  %1868 = vpow2.f32 %v1503_v21 }
 0x364   : > { %v1851_v43 = vpop.eup %1850  ;;  %v1529_v44 = vpack.c.bf16 %v1154_v26, %v1154_v26  ;;  %v1156_v56 = vmul.f32 %v1849_v4, %v2881_v60  ;;  %1870 = vpow2.f32 %v1504_v23 }
 0x365   : > { %v1853_v45 = vpop.eup %1852  ;;  %1234 = vst.msk [vmem:[%s2742_s14] sm:$0xf] %vm1233_vm5, %v1528_v28  ;;  %v1530_v35 = vpack.c.bf16 %v1155_v33, %v1155_v33  ;;  %v1157_v57 = vmul.f32 %v1851_v43, %v2884_v63  ;;  %1872 = vpow2.f32 %v1505_v48 }
 0x366   : > { %v1855_v10 = vpop.eup %1854  ;;  %1235 = vst.msk [vmem:[%s2742_s14 + $0x4] sm:$0xf] %vm1233_vm5, %v1529_v44  ;;  %v1531_v58 = vpack.c.bf16 %v1156_v56, %v1156_v56  ;;  %v1158_v46 = vmul.f32 %v1853_v45, %v2887_v0 }
 0x367   : > { %v1857_v41 = vpop.eup %1856  ;;  %1236 = vst.msk [vmem:[%s2742_s14 + $0x8] sm:$0xf] %vm1233_vm5, %v1530_v35  ;;  %v1532_v60 = vpack.c.bf16 %v1157_v57, %v1157_v57  ;;  %v1159_v29 = vmul.f32 %v1855_v10, %v2890_v1 }
 0x368   : > { %v1859_v47 = vpop.eup %1858  ;;  %1237 = vst.msk [vmem:[%s2742_s14 + $0xc] sm:$0xf] %vm1233_vm5, %v1531_v58  ;;  %v1533_v63 = vpack.c.bf16 %v1158_v46, %v1158_v46  ;;  %v1160_v39 = vmul.f32 %v1857_v41, %v2896_v11 }
 0x369   : > { %v1861_v3 = vpop.eup %1860  ;;  %1238 = vst.msk [vmem:[%s2742_s14 + $0x10] sm:$0xf] %vm1233_vm5, %v1532_v60  ;;  %v1534_v9 = vpack.c.bf16 %v1159_v29, %v1159_v29  ;;  %v1117_v49 = vadd.f32 1.0, %v1859_v47 }
 0x36a   : > { %v1863_v0 = vpop.eup %1862  ;;  %1239 = vst.msk [vmem:[%s2742_s14 + $0x14] sm:$0xf] %vm1233_vm5, %v1533_v63  ;;  %v1535_v62 = vpack.c.bf16 %v1160_v39, %v1160_v39  ;;  %v1161_v61 = vmul.f32 %v1861_v3, %v2921_v25 }
 0x36b   : > { %v1865_v1 = vpop.eup %1864  ;;  %1240 = vst.msk [vmem:[%s2742_s14 + $0x18] sm:$0xf] %vm1233_vm5, %v1534_v9  ;;  %v1162_v50 = vmul.f32 %v1863_v0, %v2926_v27  ;;  %1874 = vrcp.f32 %v1117_v49 }
 0x36c   : > { %v1867_v11 = vpop.eup %1866  ;;  %1241 = vst.msk [vmem:[%s2742_s14 + $0x1c] sm:$0xf] %vm1233_vm5, %v1535_v62  ;;  %v1536_v8 = vpack.c.bf16 %v1161_v61, %v1161_v61  ;;  %v1163_v31 = vmul.f32 %v1865_v1, %v2932_v34 }
 0x36d   : > { %v1869_v52 = vpop.eup %1868  ;;  %v1537_v7 = vpack.c.bf16 %v1162_v50, %v1162_v50  ;;  %v1164_v53 = vmul.f32 %v1867_v11, %v2935_v37 }
 0x36e   : > { %v1871_v25 = vpop.eup %1870  ;;  %1242 = vst.msk [vmem:[%s2742_s14 + $0x20] sm:$0xf] %vm1233_vm5, %v1536_v8  ;;  %v1538_v54 = vpack.c.bf16 %v1163_v31, %v1163_v31  ;;  %v1118_v55 = vadd.f32 1.0, %v1869_v52 }
 0x36f   : > { %v1873_v27 = vpop.eup %1872  ;;  %1243 = vst.msk [vmem:[%s2742_s14 + $0x24] sm:$0xf] %vm1233_vm5, %v1537_v7  ;;  %v1539_v59 = vpack.c.bf16 %v1164_v53, %v1164_v53  ;;  %v1119_v32 = vadd.f32 1.0, %v1871_v25 }
 0x370   : > { %1244 = vst.msk [vmem:[%s2742_s14 + $0x28] sm:$0xf] %vm1233_vm5, %v1538_v54  ;;  %1876 = vrcp.f32 %v1118_v55  ;;  %v1120_v2 = vadd.f32 1.0, %v1873_v27 }
 0x371   : > { %1245 = vst.msk [vmem:[%s2742_s14 + $0x2c] sm:$0xf] %vm1233_vm5, %v1539_v59  ;;  %1878 = vrcp.f32 %v1119_v32 }
 0x372   : > { %1880 = vrcp.f32 %v1120_v2 }
 0x375   : > { %v1875_v34 = vpop.eup %1874 }
 0x376   : > { %v1165_v37 = vmul.f32 %v1875_v34, %v2949_v51 }
 0x378   : > { %v1540_v5 = vpack.c.bf16 %v1165_v37, %v1165_v37 }
 0x37a   : > { %v1877_v6 = vpop.eup %1876  ;;  %1246 = vst.msk [vmem:[%s2742_s14 + $0x30] sm:$0xf] %vm1233_vm5, %v1540_v5 }
 0x37b   : > { %v1879_v12 = vpop.eup %1878  ;;  %v1166_v14 = vmul.f32 %v1877_v6, %v2956_v13 }
 0x37c   : > { %v1881_v16 = vpop.eup %1880  ;;  %v1167_v17 = vmul.f32 %v1879_v12, %v2959_v15 }
 0x37d   : > { %v1541_v18 = vpack.c.bf16 %v1166_v14, %v1166_v14  ;;  %v1168_v19 = vmul.f32 %v1881_v16, %v2962_v38 }
 0x37e   : > { %v1542_v20 = vpack.c.bf16 %v1167_v17, %v1167_v17 }
 0x37f   : > { %1247 = vst.msk [vmem:[%s2742_s14 + $0x34] sm:$0xf] %vm1233_vm5, %v1541_v18  ;;  %v1543_v36 = vpack.c.bf16 %v1168_v19, %v1168_v19 }
 0x380   : > { %1248 = vst.msk [vmem:[%s2742_s14 + $0x38] sm:$0xf] %vm1233_vm5, %v1542_v20 }
 0x381   : > { %1249 = vst.msk [vmem:[%s2742_s14 + $0x3c] sm:$0xf] %vm1233_vm5, %v1543_v36 }
 0x382 PF: > { %s3176_s0 = sld [smem:[#allocation28_spill]]  ;;  %s3177_s25 = sld [smem:[#allocation27_spill]] }
 0x383   : > { %s3178_s23 = sld [smem:[#allocation29_spill]]  ;;  %s3180_s16 = sld [smem:[#allocation30_spill]] }
 0x384   : > { %s1267_s24 = sshll.u32 %s2742_s14, 4  ;;  %s3181_s19 = sld [smem:[#allocation41_spill]]  ;;  %s3019_s24 = int_to_ptr.vmem [resolvable:$true] %s1267_s24 }
 0x385   : > { %s3028_s6 = scalar_lea.sflag [#allocation8], %s431_s5  ;;  %s2082_s9 = scalar_lea.vmem %s3019_s24, 1024 }
 0x386   : > { %p2083_p5 = scmp.ne.s32.totalorder %s3019_s24, %s2082_s9  ;;  %s2253_s14 = smov [#allocation18]  }
 0x387   : > { %s2086_s17 = sshll.u32 %s2253_s14, 4  ;;  %s2087_s17 = int_to_ptr.vmem [resolvable:$false] %s2086_s17 }
 0x388   : > { %s1258_s4 = smul.u32 %s3177_s25, %s3176_s0  ;;  %s2088_s0 = scalar_lea.vmem %s2087_s17, 2048 }
 0x389   : > { %s1524_s22 = sshll.u32 %s3178_s23, 6  ;;  %p3182_p13 = scmp.ne.s32.totalorder %s3180_s16, 0 }
 0x38a   : > { %s1523_s27 = sshll.u32 %s1258_s4, 4  ;;  %p2089_p10 = scmp.lt.s32.totalorder %s3019_s24, %s2087_s17 }
 0x38b   : > { %s1264_s30 = sadd.s32 %s1524_s22, %s1523_s27  ;;  %p2084_p7 = pnand %p2083_p5, %p3182_p13 }
 0x38c   : > { %s1525_s21 = sshll.u32 %s1264_s30, 6  ;;  %p2090_p0 = scmp.lt.s32.totalorder %s2088_s0, %s2082_s9 }
 0x38d   : > { %s3024_s15 = scalar_lea.hbm %s3181_s19, %s1525_s21  ;;  %p2085_p2 = pneg %p2084_p7 }
 0x38e   : > { %p2091_p11 = por %p2090_p0, %p2089_p10 }
 0x390   : > { %p2092_p8 = pnand %p2091_p11, %p2085_p2 }
 0x392   : > { %2095 = shalt.err (!%p2092_p8)
}
 0x393   : > { %s2096_s5 = scalar_lea.hbm %s3024_s15, 1024  ;;  %s2100_s7 = scalar_lea.hbm %s3181_s19, 8192 }
 0x394   : > { %p2097_p12 = scmp.ne.s32.totalorder %s3024_s15, %s2096_s5  ;;  %p2101_p1 = scmp.lt.u32.totalorder %s3024_s15, %s3181_s19 }
 0x395   : > { %p2102_p3 = scmp.lt.u32.totalorder %s2100_s7, %s2096_s5  ;;  %p2104_p5 = scmp.lt.u32.totalorder %s2096_s5, %s3024_s15 }
 0x396   : > { %p2098_p9 = pnand %p2097_p12, %p3182_p13 }
 0x397   : > { %p2103_p4 = por %p2102_p3, %p2101_p1 }
 0x398   : > { %p2099_p6 = pneg %p2098_p9 }
 0x399   : > { %p2105_p7 = por %p2104_p5, %p2103_p4 }
 0x39b   : > { %p2106_p2 = pnand %p2105_p7, %p2099_p6 }
 0x39d   : > { %2109 = shalt.err (!%p2106_p2)
}
 0x39e   : > { %s2254_s27 = smov 64   ;;  %s2255_s30 = smov 4  }
 0x39f   : > { %1646 = dma.vmem_to_hbm [thread:$0]  (%p3182_p13), %s3019_s24, 1024, %s3024_s15, %s3028_s6, %s2254_s27, %s2254_s27, %s2255_s30  }
 0x3a0 PF: > { %s3183_s21 = sld [smem:[#allocation25_spill]]  ;;  %s3184_s20 = sld [smem:[#allocation31_spill]] }
 0x3a1   : > { %p1686_p10 = scmp.ge.s32.totalorder %s2236_s13, 2 }
 0x3a6   : > { %s1282_s2 = sand.u32 1, %s3183_s21   ;;  %p3185_p0 = scmp.ne.s32.totalorder %s3184_s20, 0 }
 0x3a7   : > { %s1283_s9 = scalar_lea.sflag [#allocation8], %s1282_s2 }
 0x3a8   : > { %p1672_p11 = pnand %p1686_p10, %p3185_p0 }
 0x3aa   : > { %2183 = dma.done.wait (!%p1672_p11), %s1283_s9, 1024  }
 0x3ab   : > { %2185 = vsyncadd (!%p1672_p11), %s1283_s9, 4294966272  ;;  %s28_s13 = sadd.s32 1, %s2236_s13   ;;  %s3187_s24 = sld [smem:[#allocation26_spill]] }
 0x3ac   : > { %p3057_p8 = scmp.ge.s32.totalorder %s28_s13, 18   ;;  %s3188_s16 = sld [smem:[#allocation33_spill]] }
 0x3ad   : > { %s3189_s15 = sld [smem:[#allocation34_spill]]  ;;  %s3190_s25 = smov %s2196_s26 }
 0x3ae   : > { %s3191_s26 = smov %s2550_s3  ;;  %s3192_s27 = smov %s2204_s28 }
 0x3af   : > { %s3193_s28 = smov %s2208_s29  ;;  %s3194_s29 = smov %s2547_s8 }
 0x3b0   : > { %s3195_s30 = smov %s2224_s10  ;;  %s3196_s8 = smov %s2228_s11 }
 0x3b1   : > { %s3197_s9 = smov %s2232_s12  ;;  %s3198_s10 = smov %s3202_s18 }
 0x3b2   : > { %s3199_s11 = smov %s3188_s16  ;;  %27 = sbr.rel (!%p3057_p8) target bundleno = 22 (0x16), region = 142 }
 0x3b3   : > { %s3200_s12 = smov %s3189_s15 }
 0x3b9   :  { %1288 = vsyncpa [#allocation7], 1 }
 0x3ba   :  { %1290 = vsyncpa [#allocation7 + $0x1], 1 }
 0x3bb   :  { %1291 = vsyncpa [#allocation10], 1 }
 0x3bc   :  { %1293 = vsyncpa [#allocation10 + $0x1], 1 }
 0x3bd   :  { %1294 = vsyncpa [#allocation13], 1 }
 0x3be   :  { %1295 = vsyncpa [#allocation16], 1 }
 0x3bf   :  { %1296 = vsyncpa [#allocation8], 1 }
 0x3c0   :  { %1298 = vsyncpa [#allocation8 + $0x1], 1 }

// kernel: frustum_tv_up_block.3
= control target key start
LH: loop header
LB: loop body
LE: loop exit
PB: predicated region body
PF: predicated region fallthrough
CT: control target
= control target key end

     0   :  { %s12124_s0 = inlined_call_operand.hbm [shape: bf16[2,512,32], index: 0, kind: input, shape index: {}, may-alias: {0,1}]   ;;  %s12125_s1 = inlined_call_operand.hbm [shape: bf16[2,512,32], index: 1, kind: input, shape index: {}, may-alias: {0,1}]   ;;  %s12126_s2 = inlined_call_operand.hbm [shape: bf16[3,512,1], index: 2, kind: input, shape index: {}]   ;;  %s12127_s3 = inlined_call_operand.hbm [shape: bf16[8,32,128], index: 3, kind: input, shape index: {}]   ;;  %s12128_s4 = inlined_call_operand.hbm [shape: f32[1,128], index: 4, kind: input, shape index: {}]   ;;  %s12129_s5 = inlined_call_operand.hbm [shape: bf16[2,512,128], index: 5, kind: output, shape index: {}]  }
   0x1   :  { %12223 = sst [smem:[#allocation91_spill]] %s12124_s0 }
   0x2   :  { %12224 = sst [smem:[#allocation92_spill]] %s12127_s3 }
   0x3   :  { %12225 = sst [smem:[#allocation93_spill]] %s12129_s5 }
   0x4   :  { %10 = vsyncpa [#allocation3], 0 }
   0x5   :  { %12 = vsyncpa [#allocation3 + $0x1], 0 }
   0x6   :  { %13 = vsyncpa [#allocation6], 0 }
   0x7   :  { %15 = vsyncpa [#allocation6 + $0x1], 0 }
   0x8   :  { %16 = vsyncpa [#allocation9], 0 }
   0x9   :  { %17 = vsyncpa [#allocation4], 0 }
   0xa   :  { %19 = vsyncpa [#allocation4 + $0x1], 0  ;;  %s9723_s18 = smov 0   ;;  %s9725_s19 = smov 0  }
   0xb   :  { %s9727_s20 = smov 0   ;;  %s9729_s21 = smov 0  }
   0xc   :  { %s9731_s22 = smov 0   ;;  %s9733_s23 = smov 0  }
   0xd   :  { %s9735_s24 = smov 0   ;;  %s9737_s25 = smov 0  }
   0xe   :  { %s9739_s26 = smov 0   ;;  %s9741_s27 = smov 0  }
   0xf   :  { %s9743_s28 = smov 0   ;;  %s9745_s29 = smov 0  }
  0x10   :  { %s9747_s30 = smov 0   ;;  %s9749_s6 = smov 0  }
  0x11 LB: > { %12226 = sst [smem:[#allocation20_spill]] %s9624_s19  ;;  %s9794_s7 = sadd.s32 4294967295, %s9672_s6   ;;  %s9672_s6 = sphi %s9749_s6, %s25_s6   ;;  %s9668_s30 = sphi %s9747_s30, %s12460_s30   ;;  %s9664_s29 = sphi %s9745_s29, %s12459_s29   ;;  %s9660_s28 = sphi %s9743_s28, %s12458_s28   ;;  %s9656_s27 = sphi %s9741_s27, %s12457_s27   ;;  %s9652_s26 = sphi %s9739_s26, %s12456_s26   ;;  %s9648_s25 = sphi %s9737_s25, %s12455_s25   ;;  %s9644_s24 = sphi %s9735_s24, %s12454_s24   ;;  %s9640_s23 = sphi %s9733_s23, %s12453_s23   ;;  %s9636_s22 = sphi %s9731_s22, %s12452_s22   ;;  %s9632_s21 = sphi %s9729_s21, %s12445_s21   ;;  %s9628_s20 = sphi %s9727_s20, %s12451_s20   ;;  %s9624_s19 = sphi %s9725_s19, %s12450_s19   ;;  %s9620_s18 = sphi %s9723_s18, %s12443_s18  }
  0x12   : > { %12227 = sst [smem:[#allocation21_spill]] %s9636_s22  ;;  %s34_s9 = sadd.s32 1, %s9664_s29 }
  0x13   : > { %12228 = sst [smem:[#allocation22_spill]] %s9644_s24  ;;  %s37_s10 = sadd.s32 1, %s9668_s30 }
  0x14   : > { %12229 = sst [smem:[#allocation23_spill]] %s9656_s27  ;;  %p35_p0 = scmp.ge.s32.totalorder %s34_s9, 2 }
  0x15   : > { %12230 = sst [smem:[#allocation24_spill]] %s9660_s28  ;;  %s46_s11 = sadd.s32 1, %s9652_s26 }
  0x16   : > { %12231 = sst [smem:[#allocation25_spill]] %s9794_s7  ;;  %p12137_p1 = scmp.ne.s32.totalorder %s9652_s26, %s9648_s25 }
  0x17   : > { %p54_p2 = scmp.eq.s32.totalorder %s9672_s6, 0  ;;  %s12462_s9 = smov (%p35_p0, %s34_s9), 0 }
  0x18   : > { %12232 = sst [smem:[#allocation26_spill]] %s12462_s9  ;;  %s12464_s10 = smov (!%p35_p0, %s37_s10), %s9668_s30 }
  0x19   : > { %s9808_s12 = ssub.s32 %s9664_s29, %s12462_s9  ;;  %p9815_p3 = por %p54_p2, %p12137_p1 }
  0x1a   : > { %p39_p4 = scmp.ge.s32.totalorder %s12464_s10, 2  ;;  %p12136_p5 = scmp.ne.s32.totalorder %s9648_s25, %s9644_s24 }
  0x1b   : > { %s12233_s13 = scalar_select %p9815_p3, 1, 0 }
  0x1c   : > { %p12147_p6 = scmp.eq.s32.totalorder %s9794_s7, 0  ;;  %s8278_s14 = sshll.u32 %s9664_s29, 2 }
  0x1d   : > { %s12466_s10 = smov (%p39_p4, %s12464_s10), 0  ;;  %s8279_s16 = sadd.s32 4, %s8278_s14 }
  0x1e   : > { %12234 = sst [smem:[#allocation27_spill]] %s12466_s10  ;;  %p9830_p7 = por %p12147_p6, %p12136_p5 }
  0x1f   : > { %s41_s17 = ssub.s32 %s9668_s30, %s12466_s10  ;;  %p71_p8 = scmp.lt.s32.totalorder %s8279_s16, 7 }
  0x20   : > { %s12235_s15 = scalar_select %p9830_p7, 1, 0 }
  0x21   : > { %s43_s8 = sor.u32 %s9808_s12, %s41_s17  ;;  %s8280_s5 = sshll.u32 %s12462_s9, 2 }
  0x22   : > { %12236 = sst [smem:[#allocation28_spill]] %s12235_s15  ;;  %p44_p9 = scmp.eq.s32.totalorder %s43_s8, 0 }
  0x23   : > { %s8281_s28 = sadd.s32 4, %s8280_s5  ;;  %s12468_s16 = smov (!%p71_p8, %s8279_s16), 7 }
  0x24   : > { %s9841_s27 = scalar_select %p44_p9, %s9652_s26, %s46_s11  }
  0x25   : > { %p75_p10 = scmp.lt.s32.totalorder %s8281_s28, 7  ;;  %s82_s14 = sadd.s32 1, %s9640_s23 }
  0x26   : > { %12237 = sst [smem:[#allocation29_spill]] %s9841_s27  ;;  %p89_p11 = scmp.ne.s32.totalorder %s9640_s23, %s9636_s22 }
  0x27   : > { %p95_p12 = scmp.ne.s32.totalorder %s9636_s22, %s9632_s21  ;;  %s12470_s28 = smov (!%p75_p10, %s8281_s28), 7 }
  0x28   : > { %p9850_p13 = por %p89_p11, %p54_p2  ;;  %s78_s11 = ssub.s32 %s12468_s16, %s12470_s28 }
  0x29   : > { %p9856_p0 = por %p95_p12, %p12147_p6  ;;  %p106_p4 = scmp.eq.s32.totalorder %s9808_s12, 0 }
  0x2a   : > { %s12238_s5 = scalar_select %p9850_p13, 1, 0 }
  0x2b   : > { %s12239_s8 = scalar_select %p9856_p0, 1, 0 }
  0x2c   : > { %s79_s21 = sor.u32 %s78_s11, %s41_s17  ;;  %s108_s10 = sadd.s32 1, %s9628_s20 }
  0x2d   : > { %12240 = sst [smem:[#allocation30_spill]] %s12239_s8  ;;  %p80_p8 = scmp.eq.s32.totalorder %s79_s21, 0 }
  0x2e   : > { %p115_p9 = scmp.ne.s32.totalorder %s9628_s20, %s9624_s19  ;;  %p121_p11 = scmp.ne.s32.totalorder %s9624_s19, %s9620_s18 }
  0x2f   : > { %s9866_s9 = scalar_select %p106_p4, %s9628_s20, %s108_s10  }
  0x30   : > { %s9869_s27 = scalar_select %p80_p8, %s9640_s23, %s82_s14  }
  0x31   : > { %12241 = sst [smem:[#allocation31_spill]] %s9866_s9  ;;  %p9873_p10 = por %p115_p9, %p54_p2 }
  0x32   : > { %12242 = sst [smem:[#allocation32_spill]] %s9869_s27  ;;  %p189_p12 = scmp.eq.s32.totalorder %s9794_s7, 3 }
  0x33   : > { %s12243_s22 = scalar_select %p9873_p10, 1, 0 }
  0x34   : > { %s12244_s8 = sadd.s32 4294967294, %s9672_s6   ;;  %p9884_p1 = por %p121_p11, %p12147_p6 }
  0x35   : > { %p195_p5 = scmp.eq.s32.totalorder %s12244_s8, 3  ;;  %p7874_p0 = scmp.ge.s32.totalorder %s9672_s6, 1 }
  0x36   : > { %s12245_s28 = scalar_select %p9884_p1, 1, 0 }
  0x37   : > { %p12247_p4 = scmp.ne.s32.totalorder %s9652_s26, %s9648_s25  ;;  %p12250_p2 = scmp.ne.s32.totalorder %s9648_s25, %s9644_s24 }
  0x38   : > { %12246 = sst [smem:[#allocation33_spill]] %s12245_s28  ;;  %p202_p9 = scmp.lt.s32.totalorder %s9672_s6, 5 }
  0x39   : > { %p9892_p7 = por %p189_p12, %p12247_p4  ;;  %p9899_p8 = por %p195_p5, %p12250_p2 }
  0x3a   : > { %p9904_p10 = pnand %p7874_p0, %p202_p9  ;;  %s9674_s17 = smov [#allocation8]  }
  0x3b   : > { %s12248_s10 = scalar_select %p9892_p7, 1, 0 }
  0x3c   : > { %s12251_s12 = scalar_select %p9899_p8, 1, 0 }
  0x3d   : > { %12249 = sst [smem:[#allocation34_spill]] %s12248_s10  ;;  %s214_s14 = sshll.u32 %s9674_s17, 4  ;;  %s215_s14 = int_to_ptr.vmem [resolvable:$true] %s214_s14 }
  0x3e   : > { %12252 = sst [smem:[#allocation35_spill]] %s12251_s12  ;;  %p9093_p11 = pneg %p9904_p10 }
  0x3f   : > { %s12253_s18 = scalar_select %p9904_p10, 1, 0 }
  0x40   : > { %s9675_s8 = smov [#allocation10]   ;;  %p9912_p12 = pnand %p9093_p11, %p12147_p6 }
  0x41   : > { %s228_s11 = sshll.u32 %s9675_s8, 4  ;;  %s12255_s3 = sld [smem:[#allocation92_spill]]  ;;  %s9916_s11 = int_to_ptr.vmem [resolvable:$true] %s228_s11 }
  0x42   : > { %p9404_p0 = pneg %p9912_p12 }
  0x47   : > { %s9402_s12 = scalar_lea.hbm %s12255_s3, 2048 }
  0x48   : > { %p9403_p5 = scmp.ne.s32.totalorder %s12255_s3, %s9402_s12  ;;  %p9409_p9 = scmp.lt.u32.totalorder %s9402_s12, %s12255_s3 }
  0x4a   : > { %p9405_p4 = pnand %p9404_p0, %p9403_p5 }
  0x4c   : > { %p9406_p2 = pneg %p9405_p4 }
  0x4e   : > { %p9411_p11 = pnand %p9409_p9, %p9406_p2 }
  0x50   : > { %9414 = shalt.err (!%p9411_p11)
}
  0x51   : > { %s9415_s28 = scalar_lea.vmem %s215_s14, 2048  ;;  %p9423_p1 = scmp.lt.s32.totalorder %s215_s14, %s215_s14 }
  0x52   : > { %p9416_p6 = scmp.ne.s32.totalorder %s215_s14, %s9415_s28  ;;  %p9424_p10 = scmp.lt.s32.totalorder %s9415_s28, %s9415_s28 }
  0x54   : > { %p9418_p8 = pnand %p9416_p6, %p9404_p0  ;;  %p9425_p13 = por %p9424_p10, %p9423_p1 }
  0x56   : > { %p9419_p7 = pneg %p9418_p8 }
  0x58   : > { %p9426_p3 = pnand %p9425_p13, %p9419_p7 }
  0x5a   : > { %9429 = shalt.err (!%p9426_p3)
}
  0x5b   : > { %s9676_s24 = smov 64   ;;  %s9677_s27 = smov 4  }
  0x5c   : > { %9096 = dma.hbm_to_vmem [thread:$0]  (!%p9912_p12), %s12255_s3, 2048, %s215_s14, [#allocation9], %s9676_s24, %s9676_s24, %s9677_s27  }
  0x5d   : > { %s9430_s8 = scalar_lea.hbm %s12128_s4, 16 }
  0x5e   : > { %p9431_p6 = scmp.ne.s32.totalorder %s12128_s4, %s9430_s8  ;;  %p9437_p7 = scmp.lt.u32.totalorder %s9430_s8, %s12128_s4 }
  0x60   : > { %p9433_p1 = pnand %p9431_p6, %p9404_p0 }
  0x62   : > { %p9434_p3 = pneg %p9433_p1 }
  0x64   : > { %p9439_p13 = pnand %p9437_p7, %p9434_p3 }
  0x66   : > { %9442 = shalt.err (!%p9439_p13)
}
  0x67   : > { %s9443_s14 = scalar_lea.vmem %s9916_s11, 16  ;;  %s9450_s19 = scalar_lea.vmem %s9916_s11, 32 }
  0x68   : > { %p9444_p10 = scmp.ne.s32.totalorder %s9916_s11, %s9443_s14  ;;  %p9451_p4 = scmp.lt.s32.totalorder %s9916_s11, %s9916_s11 }
  0x69   : > { %p9452_p2 = scmp.lt.s32.totalorder %s9450_s19, %s9443_s14 }
  0x6a   : > { %p9446_p8 = pnand %p9444_p10, %p9404_p0 }
  0x6b   : > { %p9453_p9 = por %p9452_p2, %p9451_p4 }
  0x6c   : > { %p9447_p5 = pneg %p9446_p8 }
  0x6e   : > { %p9454_p11 = pnand %p9453_p9, %p9447_p5 }
  0x70   : > { %9457 = shalt.err (!%p9454_p11)
}
  0x71   : > { %9099 = dma.hbm_to_vmem [thread:$0]  (!%p9912_p12), %s12128_s4, 16, %s9916_s11, [#allocation9]  }
  0x72   : > { %p7877_p6 = scmp.ge.s32.totalorder %s9672_s6, 4 }
  0x73   : > { %s239_s24 = sand.u32 (!%p7877_p6), 1, %s9652_s26   ;;  %s7879_s27 = sshll.u32 (!%p7877_p6), %s9664_s29, 5 }
  0x74   : > { %235 = sbr.rel (%p7877_p6) target bundleno = 190 (0xbe), region = 24  ;;  %s7878_s9 = sshll.u32 (!%p7877_p6), %s239_s24, 7 }
  0x75   : > { %s7880_s10 = sshll.u32 (!%p7877_p6), %s9668_s30, 6  ;;  %s243_s12 = scalar_lea.vmem (!%p7877_p6), [#allocation2], %s7878_s9 }
  0x76   : > { %s249_s21 = sadd.s32 (!%p7877_p6), %s7880_s10, %s7879_s27  ;;  %s252_s17 = sshll.u32 (!%p7877_p6), %s243_s12, 4  ;;  %s9972_s17 = int_to_ptr.vmem [resolvable:$true] %s252_s17 }
  0x77   : > { %s7881_s8 = sshll.u32 (!%p7877_p6), %s249_s21, 6  ;;  %s12256_s0 = sld [smem:[#allocation91_spill]] (!%p7877_p6) }
  0x78   : > { %s9980_s7 = scalar_lea.sflag (!%p7877_p6), [#allocation3], %s239_s24  ;;  %p12257_p0 = scmp.ne.s32.totalorder (!%p7877_p6), %s12233_s13, 0 }
  0x7d   : > { %s9977_s14 = scalar_lea.hbm %s12256_s0, %s7881_s8  ;;  %s9462_s21 = scalar_lea.hbm %s12256_s0, 8192 }
  0x7e   : > { %s9458_s15 = scalar_lea.hbm %s9977_s14, 2048  ;;  %p9463_p7 = scmp.lt.u32.totalorder %s9977_s14, %s12256_s0 }
  0x7f   : > { %p9459_p12 = scmp.ne.s32.totalorder %s9977_s14, %s9458_s15  ;;  %p9464_p13 = scmp.lt.u32.totalorder %s9462_s21, %s9458_s15 }
  0x80   : > { %p9466_p8 = scmp.lt.u32.totalorder %s9458_s15, %s9977_s14 }
  0x81   : > { %p9460_p1 = pnand %p9459_p12, %p12257_p0  ;;  %p9465_p10 = por %p9464_p13, %p9463_p7 }
  0x83   : > { %p9461_p3 = pneg %p9460_p1  ;;  %p9467_p5 = por %p9466_p8, %p9465_p10 }
  0x85   : > { %p9468_p4 = pnand %p9467_p5, %p9461_p3 }
  0x87   : > { %9471 = shalt.err (!%p9468_p4)
}
  0x88   : > { %s9472_s24 = scalar_lea.vmem %s9972_s17, 2048  ;;  %s9678_s8 = smov [#allocation2]  }
  0x89   : > { %p9473_p2 = scmp.ne.s32.totalorder %s9972_s17, %s9472_s24  ;;  %s9476_s28 = sshll.u32 %s9678_s8, 4  ;;  %s9477_s28 = int_to_ptr.vmem [resolvable:$false] %s9476_s28 }
  0x8a   : > { %s9478_s27 = scalar_lea.vmem %s9477_s28, 4096  ;;  %p9479_p6 = scmp.lt.s32.totalorder %s9972_s17, %s9477_s28 }
  0x8b   : > { %p9474_p9 = pnand %p9473_p2, %p12257_p0  ;;  %p9480_p12 = scmp.lt.s32.totalorder %s9478_s27, %s9472_s24 }
  0x8d   : > { %p9475_p11 = pneg %p9474_p9  ;;  %p9481_p1 = por %p9480_p12, %p9479_p6 }
  0x8f   : > { %p9482_p7 = pnand %p9481_p1, %p9475_p11 }
  0x91   : > { %9485 = shalt.err (!%p9482_p7)
}
  0x92   : > { %s9679_s15 = smov 64   ;;  %s9680_s9 = smov 4  }
  0x93   : > { %9074 = dma.hbm_to_vmem [thread:$0]  (%p12257_p0), %s9977_s14, 2048, %s9972_s17, %s9980_s7, %s9679_s15, %s9679_s15, %s9680_s9  }
  0x94   : > { %s264_s21 = sand.u32 1, %s9640_s23   ;;  %s7884_s11 = sshll.u32 %s12468_s16, 3 }
  0x95   : > { %s7882_s12 = sshll.u32 %s264_s21, 5  ;;  %s276_s24 = sadd.s32 %s7884_s11, %s7880_s10 }
  0x96   : > { %s7886_s8 = sshll.u32 %s276_s24, 6  ;;  %s266_s28 = scalar_lea.vmem [#allocation5], %s7882_s12 }
  0x97   : > { %s279_s27 = sshll.u32 %s266_s28, 4  ;;  %s10014_s3 = scalar_lea.hbm %s12125_s1, %s7886_s8  ;;  %s10016_s27 = int_to_ptr.vmem [resolvable:$true] %s279_s27 }
  0x98   : > { %s12258_s13 = sand.u32 1, %s9672_s6   ;;  %s9486_s16 = scalar_lea.hbm %s10014_s3, 512 }
  0x99   : > { %s10020_s17 = scalar_lea.sflag [#allocation6], %s12258_s13  ;;  %p9487_p0 = scmp.ne.s32.totalorder %s10014_s3, %s9486_s16 }
  0x9a   : > { %p12259_p3 = scmp.ne.s32.totalorder %s12238_s5, 0  ;;  %s9490_s0 = scalar_lea.hbm %s12125_s1, 8192 }
  0x9b   : > { %p9491_p8 = scmp.lt.u32.totalorder %s10014_s3, %s12125_s1  ;;  %p9492_p5 = scmp.lt.u32.totalorder %s9490_s0, %s9486_s16 }
  0x9c   : > { %p9488_p13 = pnand %p9487_p0, %p12259_p3  ;;  %p9494_p2 = scmp.lt.u32.totalorder %s9486_s16, %s10014_s3 }
  0x9d   : > { %p9493_p4 = por %p9492_p5, %p9491_p8 }
  0x9e   : > { %p9489_p10 = pneg %p9488_p13 }
  0x9f   : > { %p9495_p9 = por %p9494_p2, %p9493_p4 }
  0xa1   : > { %p9496_p11 = pnand %p9495_p9, %p9489_p10 }
  0xa3   : > { %9499 = shalt.err (!%p9496_p11)
}
  0xa4   : > { %s9500_s21 = scalar_lea.vmem %s10016_s27, 512  ;;  %s9681_s12 = smov [#allocation5]  }
  0xa5   : > { %p9501_p6 = scmp.ne.s32.totalorder %s10016_s27, %s9500_s21  ;;  %s9504_s11 = sshll.u32 %s9681_s12, 4  ;;  %s9505_s11 = int_to_ptr.vmem [resolvable:$false] %s9504_s11 }
  0xa6   : > { %s9506_s24 = scalar_lea.vmem %s9505_s11, 1024  ;;  %p9507_p7 = scmp.lt.s32.totalorder %s10016_s27, %s9505_s11 }
  0xa7   : > { %p9502_p12 = pnand %p9501_p6, %p12259_p3  ;;  %p9508_p0 = scmp.lt.s32.totalorder %s9506_s24, %s9500_s21 }
  0xa9   : > { %p9503_p1 = pneg %p9502_p12  ;;  %p9509_p13 = por %p9508_p0, %p9507_p7 }
  0xab   : > { %p9510_p8 = pnand %p9509_p13, %p9503_p1 }
  0xad   : > { %9513 = shalt.err (!%p9510_p8)
}
  0xae   : > { %9075 = dma.hbm_to_vmem [thread:$0]  (%p12259_p3), %s10014_s3, 512, %s10016_s27, %s10020_s17, %s9679_s15, %s9679_s15, %s9680_s9  }
  0xaf   : > { %s291_s8 = sand.u32 1, %s9628_s20   ;;  %s8284_s28 = sshll.u32 %s9664_s29, 11 }
  0xb0   : > { %s9068_s13 = smul.u32 384, %s291_s8  ;;  %s299_s5 = scalar_lea.hbm %s12126_s2, %s8284_s28 }
  0xb1   : > { %p12260_p10 = scmp.ne.s32.totalorder %s12243_s22, 0  ;;  %s9682_s9 = smov 4096  }
  0xb2   : > { %s293_s3 = scalar_lea.vmem [#allocation7], %s9068_s13  ;;  %s9683_s27 = smov 2048  }
  0xb3   : > { %s9076_s14 = scalar_select %p12260_p10, [#allocation0], [#allocation14] }
  0xb4   : > { %s312_s15 = sshll.u32 %s293_s3, 4  ;;  %9077 = sst [smem:[#allocation13]] (%p12260_p10), %s9682_s9  ;;  %s313_s15 = int_to_ptr.vmem [resolvable:$true] %s312_s15 }
  0xb5   : > { %s304_s0 = sld [smem:[%s9076_s14]]   ;;  %s9684_s19 = smov 32  }
  0xb6   : > { %9078 = sst [smem:[#allocation13 + $0x1]] (%p12260_p10), %s9683_s27  ;;  %s9685_s7 = smov 64  }
  0xb7   : > { %9079 = sst [smem:[#allocation13 + $0x2]] (%p12260_p10), %s9684_s19  ;;  %s9686_s11 = smov 4  }
  0xb8   : > { %9080 = sst [smem:[#allocation13 + $0x3]] (%p12260_p10), %s9685_s7  ;;  %s9687_s24 = smov [#allocation12]  }
  0xb9   : > { %9081 = sst [smem:[#allocation13 + $0x4]] (%p12260_p10), %s9685_s7 }
  0xba   : > { %9082 = sst [smem:[#allocation13 + $0x5]] (%p12260_p10), %s9686_s11 }
  0xbb   : > { %s7889_s21 = sshll.u32 %s304_s0, 26 }
  0xbc   : > { %s7890_s12 = sadd.s32 134217728, %s7889_s21 }
  0xbd   : > { %9083 = dma.general (%p12260_p10), %s299_s5, 6144, %s313_s15, %s10020_s17, %s9687_s24, [#allocation13], %s7890_s12, 0  }
  0xbe PF: > { %p12261_p3 = scmp.ne.s32.totalorder %s12253_s18, 0 }
  0xc0   : > { %337 = sbr.rel (%p12261_p3) target bundleno = 1068 (0x42c), region = 40 }
  0xc7   : > { %s12262_s8 = sld [smem:[#allocation28_spill]]  ;;  %s10072_s28 = sand.u32 1, %s9648_s25  }
  0xc8   : > { %s7892_s13 = sshll.u32 %s10072_s28, 7  ;;  %s340_s16 = scalar_lea.sflag [#allocation3], %s10072_s28 }
  0xc9   : > { %s10078_s10 = scalar_lea.vmem [#allocation2], %s7892_s13 }
  0xcd   : > { %p12263_p5 = scmp.ne.s32.totalorder %s12262_s8, 0 }
  0xcf   : > { %9599 = dma.done.wait (%p12263_p5), %s340_s16, 2048  }
  0xd0   : > { %9601 = vsyncadd (%p12263_p5), %s340_s16, 4294965248  ;;  %s12264_s22 = sld [smem:[#allocation25_spill]]  ;;  %s12265_s18 = sld [smem:[#allocation21_spill]] }
  0xd1   : > { %s12266_s17 = sld [smem:[#allocation30_spill]] }
  0xd6   : > { %s348_s5 = sand.u32 1, %s12264_s22   ;;  %s350_s14 = sand.u32 1, %s12265_s18  }
  0xd7   : > { %s7893_s0 = sshll.u32 %s350_s14, 5  ;;  %s349_s3 = scalar_lea.sflag [#allocation6], %s348_s5 }
  0xd8   : > { %s10086_s15 = scalar_lea.vmem [#allocation5], %s7893_s0  ;;  %p12267_p4 = scmp.ne.s32.totalorder %s12266_s17, 0 }
  0xda   : > { %9603 = dma.done.wait (%p12267_p4), %s349_s3, 512  }
  0xdb   : > { %9605 = vsyncadd (%p12267_p4), %s349_s3, 4294966784  ;;  %s12268_s9 = sld [smem:[#allocation20_spill]]  ;;  %s12269_s27 = sld [smem:[#allocation33_spill]] }
  0xe1   : > { %s359_s19 = sand.u32 1, %s12268_s9   ;;  %p12270_p2 = scmp.ne.s32.totalorder %s12269_s27, 0 }
  0xe2   : > { %s9069_s7 = smul.u32 384, %s359_s19 }
  0xe4   : > { %s10093_s21 = scalar_lea.vmem [#allocation7], %s9069_s7 }
  0xe5   : > { %9607 = dma.done.wait (%p12270_p2), %s349_s3, 6144  }
  0xe6   : > { %9609 = vsyncadd (%p12270_p2), %s349_s3, 4294961152  ;;  %p12271_p9 = scmp.eq.s32.totalorder %s12264_s22, 0 }
  0xe8   : > { %9611 = dma.done.wait (%p12271_p9), [#allocation9], 2064   ;;  %p12272_p11 = pmov %p12271_p9 }
  0xe9   : > { %v9688_v0 = vmov 0   ;;  %v10104_v1 = vld [vmem:[%s10093_s21 + $0x108] sm:$0xf]  ;;  %v10107_v2 = vld [vmem:[%s10093_s21 + $0x100] sm:$0xf]  ;;  %v9239_v15 = vld [vmem:[#allocation8 + $0x10] sm:$0xff]  }
  0xea   : > { %9613 = vsyncadd (%p12272_p11), [#allocation9], 4294965232  ;;  %9238 = vset.pattern.permute.xlu1 %v9688_v0  ;;  %9237 = vset.pattern.permute.xlu0 %v9688_v0  ;;  %12273 = vst [vmem:[#allocation36_spill] sm:$0xff] %v10104_v1  ;;  %v10112_v3 = vld [vmem:[%s10093_s21 + $0x10c] sm:$0xf]  ;;  %v9240_v16 = vld [vmem:[#allocation8 + $0x18] sm:$0xff]  }
  0xeb   : > { %12274 = vst [vmem:[#allocation37_spill] sm:$0xff] %v10107_v2  ;;  %703 = vperm.xlu1 %9238, %v10104_v1   ;;  %679 = vperm.xlu0 %9237, %v10107_v2   ;;  %12275 = vst [vmem:[#allocation38_spill] sm:$0xff] %v10112_v3  ;;  %v10115_v4 = vld [vmem:[%s10093_s21 + $0x104] sm:$0xf]  ;;  %v10120_v5 = vld [vmem:[%s10093_s21 + $0x114] sm:$0xf] }
  0xec   : > { %12276 = vst [vmem:[#allocation39_spill] sm:$0xff] %v10115_v4  ;;  %12277 = vst [vmem:[#allocation40_spill] sm:$0xff] %v10120_v5  ;;  %v10123_v6 = vld [vmem:[%s10093_s21 + $0x110] sm:$0xf]  ;;  %v10128_v7 = vld [vmem:[%s10093_s21 + $0x11c] sm:$0xf]  ;;  %8556 = vmatprep.subr.bf16.mxu1 %v9239_v15 }
  0xed   : > { %12278 = vst [vmem:[#allocation41_spill] sm:$0xff] %v10123_v6  ;;  %12279 = vst [vmem:[#allocation42_spill] sm:$0xff] %v10128_v7  ;;  %v10131_v8 = vld [vmem:[%s10093_s21 + $0x118] sm:$0xf]  ;;  %v10136_v9 = vld [vmem:[%s10093_s21 + $0x124] sm:$0xf]  ;;  %8557 = vmatpush3.bf16.msra.mxu1 %v9239_v15 }
  0xee   : > { %12280 = vst [vmem:[#allocation43_spill] sm:$0xff] %v10131_v8  ;;  %v10139_v10 = vld [vmem:[%s10093_s21 + $0x120] sm:$0xf]  ;;  %v10144_v11 = vld [vmem:[%s10093_s21 + $0x12c] sm:$0xf]  ;;  %8558 = vmatprep.subr.bf16.mxu1 %v9240_v16  ;;  %vm1453_vm1 = vcmask 261120  }
  0xef   : > { %715 = vperm.xlu1 %9238, %v10112_v3   ;;  %691 = vperm.xlu0 %9237, %v10115_v4   ;;  %v10147_v12 = vld [vmem:[%s10093_s21 + $0x128] sm:$0xf]  ;;  %v10150_v13 = vld [vmem:[%s10093_s21 + $0x134] sm:$0xf]  ;;  %v10155_v14 = vld [vmem:[%s10093_s21 + $0x130] sm:$0xf] }
  0xf0   : > { %v10160_v17 = vld [vmem:[%s10093_s21 + $0x13c] sm:$0xf]  ;;  %v10163_v18 = vld [vmem:[%s10093_s21 + $0x138] sm:$0xf]  ;;  %v10166_v19 = vld [vmem:[%s10093_s21 + $0x144] sm:$0xf] }
  0xf1   : > { %v10171_v20 = vld [vmem:[%s10093_s21 + $0x140] sm:$0xf]  ;;  %8559 = vmatpush3.bf16.msra.mxu1 %v9240_v16  ;;  %v10174_v21 = vld [vmem:[%s10093_s21 + $0x14c] sm:$0xf]  ;;  %v10179_v22 = vld [vmem:[%s10093_s21 + $0x148] sm:$0xf] }
  0xf2   : > { %v10182_v23 = vld [vmem:[%s10093_s21 + $0x154] sm:$0xf]  ;;  %v10187_v24 = vld [vmem:[%s10093_s21 + $0x150] sm:$0xf]  ;;  %v10190_v25 = vld [vmem:[%s10093_s21 + $0x15c] sm:$0xf] }
  0xf3   : > { %739 = vperm.xlu1 %9238, %v10120_v5   ;;  %727 = vperm.xlu0 %9237, %v10123_v6   ;;  %v10195_v26 = vld [vmem:[%s10093_s21 + $0x158] sm:$0xf]  ;;  %v7974_v27 = vld [vmem:[%s10093_s21 + $0x164] sm:$0xf]  ;;  %v10201_v28 = vld [vmem:[%s10093_s21 + $0x160] sm:$0xf] }
  0xf4   : > { %12281 = vst [vmem:[#allocation44_spill] sm:$0xff] %v10201_v28  ;;  %v7976_v29 = vld [vmem:[%s10093_s21 + $0x16c] sm:$0xf]  ;;  %v7975_v30 = vld [vmem:[%s10093_s21 + $0x168] sm:$0xf]  ;;  %vm2405_vm3 = vcmask 1043456  }
  0xf5   : > { %v7978_v31 = vld [vmem:[%s10093_s21 + $0x174] sm:$0xf]  ;;  %v7977_v32 = vld [vmem:[%s10093_s21 + $0x170] sm:$0xf]  ;;  %v10209_v33 = vld [vmem:[%s10093_s21 + $0x80] sm:$0xf] }
  0xf6   : > { %v10212_v34 = vld [vmem:[%s10093_s21] sm:$0xf]  ;;  %v7980_v36 = vld [vmem:[%s10093_s21 + $0x17c] sm:$0xf]  ;;  %v7979_v37 = vld [vmem:[%s10093_s21 + $0x178] sm:$0xf] }
  0xf7   : > { %763 = vperm.xlu1 %9238, %v10128_v7   ;;  %751 = vperm.xlu0 %9237, %v10131_v8   ;;  %12282 = vst [vmem:[#allocation45_spill] sm:$0xff] %v10212_v34  ;;  %v10216_v35 = vmul.bf16 %v10209_v33, %v10212_v34  ;;  %v10223_v39 = vld [vmem:[%s10093_s21 + $0x84] sm:$0xf]  ;;  %v10229_v41 = vld [vmem:[%s10093_s21 + $0x88] sm:$0xf]  ;;  %s11976_s12 = scalar_lea.vmem [#allocation11], %s7892_s13 }
  0xf8   : > { %v10226_v40 = vld [vmem:[%s10093_s21 + $0x4] sm:$0xf]  ;;  %v10236_v43 = vld [vmem:[%s10093_s21 + $0x8] sm:$0xf]  ;;  %v10245_v46 = vld [vmem:[%s10093_s21 + $0x8c] sm:$0xf] }
  0xf9   : > { %12283 = vst [vmem:[#allocation46_spill] sm:$0xff] %v10216_v35  ;;  %12284 = vst [vmem:[#allocation47_spill] sm:$0xff] %v10226_v40  ;;  %v10233_v42 = vmul.bf16 %v10223_v39, %v10226_v40  ;;  %v10240_v44 = vmul.bf16 %v10229_v41, %v10236_v43  ;;  %v10252_v48 = vld [vmem:[%s10093_s21 + $0x90] sm:$0xf]  ;;  %v10255_v49 = vld [vmem:[%s10093_s21 + $0xc] sm:$0xf] }
  0xfa   : > { %12286 = vst [vmem:[#allocation49_spill] sm:$0xff] %v10236_v43  ;;  %12288 = vst [vmem:[#allocation51_spill] sm:$0xff] %v10255_v49  ;;  %v10258_v50 = vld [vmem:[%s10093_s21 + $0x10] sm:$0xf]  ;;  %v10262_v51 = vmul.bf16 %v10245_v46, %v10255_v49  ;;  %v10269_v53 = vld [vmem:[%s10093_s21 + $0x94] sm:$0xf] }
  0xfb   : > { %787 = vperm.xlu1 %9238, %v10136_v9   ;;  %775 = vperm.xlu0 %9237, %v10139_v10   ;;  %12285 = vst [vmem:[#allocation48_spill] sm:$0xff] %v10233_v42  ;;  %12287 = vst [vmem:[#allocation50_spill] sm:$0xff] %v10240_v44  ;;  %v10266_v52 = vmul.bf16 %v10252_v48, %v10258_v50  ;;  %v10276_v56 = vld [vmem:[%s10093_s21 + $0x14] sm:$0xf]  ;;  %v10281_v57 = vld [vmem:[%s10093_s21 + $0x98] sm:$0xf] }
  0xfc   : > { %12289 = vst [vmem:[#allocation52_spill] sm:$0xff] %v10258_v50  ;;  %12290 = vst [vmem:[#allocation53_spill] sm:$0xff] %v10262_v51  ;;  %v10285_v58 = vmul.bf16 %v10269_v53, %v10276_v56  ;;  %v10288_v59 = vld [vmem:[%s10093_s21 + $0x18] sm:$0xf]  ;;  %v10291_v60 = vld [vmem:[%s10093_s21 + $0x9c] sm:$0xf] }
  0xfd   : > { %12291 = vst [vmem:[#allocation54_spill] sm:$0xff] %v10266_v52  ;;  %12292 = vst [vmem:[#allocation55_spill] sm:$0xff] %v10276_v56  ;;  %v10295_v61 = vmul.bf16 %v10281_v57, %v10288_v59  ;;  %v10298_v62 = vld [vmem:[%s10093_s21 + $0x1c] sm:$0xf]  ;;  %v10345_v15 = vld [vmem:[%s10093_s21 + $0xb8] sm:$0xf] }
  0xfe   : > { %12293 = vst [vmem:[#allocation56_spill] sm:$0xff] %v10285_v58  ;;  %12294 = vst [vmem:[#allocation57_spill] sm:$0xff] %v10288_v59  ;;  %v10304_v0 = vmul.bf16 %v10291_v60, %v10298_v62  ;;  %v10342_v16 = vld [vmem:[%s10093_s21 + $0xbc] sm:$0xf]  ;;  %v10350_v63 = vld [vmem:[%s10093_s21 + $0xc4] sm:$0xf]  ;;  %v685_v59 = vlaneseq }
  0xff   : > { %811 = vperm.xlu1 %9238, %v10144_v11   ;;  %799 = vperm.xlu0 %9237, %v10147_v12   ;;  %12295 = vst [vmem:[#allocation58_spill] sm:$0xff] %v10295_v61  ;;  %12296 = vst [vmem:[#allocation59_spill] sm:$0xff] %v10298_v62  ;;  %v10353_v55 = vld [vmem:[%s10093_s21 + $0xc0] sm:$0xf]  ;;  %v10358_v54 = vld [vmem:[%s10093_s21 + $0xcc] sm:$0xf] }
 0x100   : > { %12297 = vst [vmem:[#allocation60_spill] sm:$0xff] %v10304_v0  ;;  %v10361_v47 = vld [vmem:[%s10093_s21 + $0xc8] sm:$0xf]  ;;  %v10366_v45 = vld [vmem:[%s10093_s21 + $0xd4] sm:$0xf]  ;;  %v686_v43 = vshrl.u32 %v685_v59, 7 }
 0x101   : > { %v10369_v38 = vld [vmem:[%s10093_s21 + $0xd0] sm:$0xf]  ;;  %v10374_v0 = vld [vmem:[%s10093_s21 + $0xdc] sm:$0xf]  ;;  %v10377_v61 = vld [vmem:[%s10093_s21 + $0xd8] sm:$0xf] }
 0x102   : > { %v7942_v58 = vld [vmem:[%s10093_s21 + $0xe4] sm:$0xf]  ;;  %v10383_v52 = vld [vmem:[%s10093_s21 + $0xe0] sm:$0xf]  ;;  %v7944_v51 = vld [vmem:[%s10093_s21 + $0xec] sm:$0xf] }
 0x103   : > { %835 = vperm.xlu1 %9238, %v10150_v13   ;;  %823 = vperm.xlu0 %9237, %v10155_v14   ;;  %v7943_v44 = vld [vmem:[%s10093_s21 + $0xe8] sm:$0xf]  ;;  %v7946_v42 = vld [vmem:[%s10093_s21 + $0xf4] sm:$0xf]  ;;  %v7945_v35 = vld [vmem:[%s10093_s21 + $0xf0] sm:$0xf] }
 0x104   : > { %v9689_v62 = vmov 839922192   ;;  %v7948_v49 = vld [vmem:[%s10093_s21 + $0xfc] sm:$0xf]  ;;  %v7947_v50 = vld [vmem:[%s10093_s21 + $0xf8] sm:$0xf] }
 0x105   : > { %v683_v56 = vunpack.c.l.s4 %v9689_v62  ;;  %vm1141_vm0 = vsmask.f32 256  ;;  %vm1308_vm2 = vsmask.f32 7424  ;;  %vm3188_vm4 = vsmask.f32 4352 }
 0x106   : > { %vm3371_vm5 = vsmask.f32 3328  ;;  %s12434_s11 = sld [smem:[#allocation23_spill]]  ;;  %s12435_s24 = sld [smem:[#allocation24_spill]] }
 0x107   : > { %859 = vperm.xlu1 %9238, %v10160_v17   ;;  %847 = vperm.xlu0 %9237, %v10163_v18   ;;  %v684_v40 = vunpack.c.0.s8 %v683_v56  ;;  %s7715_s22 = sshll.u32 %s11976_s12, 4  ;;  %s12437_s14 = sld [smem:[#allocation93_spill]]  ;;  %s12039_s22 = int_to_ptr.vmem [resolvable:$true] %s7715_s22 }
 0x108   : > { %s7700_s3 = scalar_lea.sflag [#allocation4], %s10072_s28  ;;  %s9690_s9 = smov [#allocation11]  }
 0x109   : > { %s9518_s27 = sshll.u32 %s9690_s9, 4  ;;  %s9519_s27 = int_to_ptr.vmem [resolvable:$false] %s9518_s27 }
 0x10a   : > { %s9520_s19 = scalar_lea.vmem %s9519_s27, 4096  ;;  %p9521_p0 = scmp.lt.s32.totalorder %s12039_s22, %s9519_s27 }
 0x10b   : > { %883 = vperm.xlu1 %9238, %v10166_v19   ;;  %871 = vperm.xlu0 %9237, %v10171_v20  }
 0x10c   : > { %s8273_s8 = sshll.u32 %s12434_s11, 5  ;;  %s8274_s13 = sshll.u32 %s12435_s24, 6 }
 0x10d   : > { %s7712_s16 = sadd.s32 %s8274_s13, %s8273_s8 }
 0x10e   : > { %s8275_s18 = sshll.u32 %s7712_s16, 6 }
 0x10f   : > { %907 = vperm.xlu1 %9238, %v10174_v21   ;;  %895 = vperm.xlu0 %9237, %v10179_v22   ;;  %s12044_s0 = scalar_lea.hbm %s12437_s14, %s8275_s18 }
 0x113   : > { %931 = vperm.xlu1 %9238, %v10182_v23   ;;  %919 = vperm.xlu0 %9237, %v10187_v24  }
 0x117   : > { %955 = vperm.xlu1 %9238, %v10190_v25   ;;  %943 = vperm.xlu0 %9237, %v10195_v26  }
 0x11b   : > { %979 = vperm.xlu1 %9238, %v7974_v27   ;;  %967 = vperm.xlu0 %9237, %v10201_v28   ;;  %v10315_v27 = vld [vmem:[%s10093_s21 + $0xa4] sm:$0xf] }
 0x11f   : > { %1003 = vperm.xlu1 %9238, %v7976_v29   ;;  %991 = vperm.xlu0 %9237, %v7975_v30   ;;  %v10318_v29 = vld [vmem:[%s10093_s21 + $0xa0] sm:$0xf]  ;;  %v10323_v30 = vld [vmem:[%s10093_s21 + $0xac] sm:$0xf] }
 0x123   : > { %1027 = vperm.xlu1 %9238, %v7978_v31   ;;  %1015 = vperm.xlu0 %9237, %v7977_v32   ;;  %v10326_v31 = vld [vmem:[%s10093_s21 + $0xa8] sm:$0xf]  ;;  %v10330_v32 = vld [vmem:[#allocation8] sm:$0xff]  }
 0x124   : > { %8592 = vmatprep.subr.bf16.mxu1 %v10330_v32 }
 0x127   : > { %1051 = vperm.xlu1 %9238, %v7980_v36   ;;  %1039 = vperm.xlu0 %9237, %v7979_v37   ;;  %v10333_v36 = vld [vmem:[%s10093_s21 + $0xb4] sm:$0xf]  ;;  %v10336_v37 = vld [vmem:[%s10093_s21 + $0xb0] sm:$0xf] }
 0x12b   : > { %1898 = vperm.xlu1 %9238, %v10223_v39   ;;  %1886 = vperm.xlu0 %9237, %v10209_v33  }
 0x12f   : > { %1922 = vperm.xlu1 %9238, %v10245_v46   ;;  %1910 = vperm.xlu0 %9237, %v10229_v41  }
 0x133   : > { %1946 = vperm.xlu1 %9238, %v10269_v53   ;;  %1934 = vperm.xlu0 %9237, %v10252_v48  }
 0x137   : > { %1970 = vperm.xlu1 %9238, %v10291_v60   ;;  %1958 = vperm.xlu0 %9237, %v10281_v57  }
 0x13b   : > { %1994 = vperm.xlu1 %9238, %v10315_v27   ;;  %1982 = vperm.xlu0 %9237, %v10318_v29  }
 0x13f   : > { %2018 = vperm.xlu1 %9238, %v10323_v30   ;;  %2006 = vperm.xlu0 %9237, %v10326_v31  }
 0x143   : > { %2042 = vperm.xlu1 %9238, %v10333_v36   ;;  %2030 = vperm.xlu0 %9237, %v10336_v37  }
 0x147   : > { %2066 = vperm.xlu1 %9238, %v10342_v16   ;;  %2054 = vperm.xlu0 %9237, %v10345_v15  }
 0x14b   : > { %2090 = vperm.xlu1 %9238, %v10350_v63   ;;  %2078 = vperm.xlu0 %9237, %v10353_v55  }
 0x14f   : > { %2114 = vperm.xlu1 %9238, %v10358_v54   ;;  %2102 = vperm.xlu0 %9237, %v10361_v47  }
 0x153   : > { %2138 = vperm.xlu1 %9238, %v10366_v45   ;;  %2126 = vperm.xlu0 %9237, %v10369_v38  }
 0x157   : > { %2162 = vperm.xlu1 %9238, %v10374_v0   ;;  %2150 = vperm.xlu0 %9237, %v10377_v61  }
 0x15b   : > { %2186 = vperm.xlu1 %9238, %v7942_v58   ;;  %2174 = vperm.xlu0 %9237, %v10383_v52   ;;  %v2693_v58 = vmul.bf16 %v10115_v4, %v10223_v39  ;;  %v2697_v39 = vmul.bf16 %v10120_v5, %v10269_v53  ;;  %v10723_v5 = vld [vmem:[%s10093_s21 + $0x68] sm:$0xf] }
 0x15c   : > { %12319 = vst [vmem:[#allocation64_spill] sm:$0xff] %v10723_v5 }
 0x15f   : > { %2210 = vperm.xlu1 %9238, %v7944_v51   ;;  %2198 = vperm.xlu0 %9237, %v7943_v44   ;;  %v2692_v51 = vmul.bf16 %v10107_v2, %v10209_v33  ;;  %v10396_v44 = vsub.s32 %v684_v40, %v686_v43  ;;  %v2696_v33 = vmul.bf16 %v10123_v6, %v10252_v48 }
 0x160   : > { %v2699_v48 = vmul.bf16 %v10128_v7, %v10291_v60  ;;  %v10422_v60 = vld [vmem:[%s10078_s10 + $0x8] sm:$0xff]  }
 0x163   : > { %2234 = vperm.xlu1 %9238, %v7946_v42   ;;  %2222 = vperm.xlu0 %9237, %v7945_v35   ;;  %v2695_v35 = vmul.bf16 %v10112_v3, %v10245_v46  ;;  %v2694_v42 = vmul.bf16 %v10104_v1, %v10229_v41  ;;  %v9275_v3 = vld [vmem:[%s10093_s21 + $0x100] sm:$0xf] }
 0x164   : > { %v9276_v1 = vld [vmem:[%s10093_s21] sm:$0xf] }
 0x165   : > { %v4531_v4 = vmul.bf16 %v9276_v1, %v9275_v3  ;;  %v9279_v3 = vld [vmem:[%s10093_s21 + $0x108] sm:$0xf] }
 0x167   : > { %2258 = vperm.xlu1 %9238, %v7948_v49   ;;  %2246 = vperm.xlu0 %9237, %v7947_v50  }
 0x16a   : > { %v704_v34 = vpop.permute.xlu1 %703  ;;  %v680_v28 = vpop.permute.xlu0 %679 }
 0x16b   : > { %2738 = vperm.xlu1 %9238, %v2693_v58   ;;  %2726 = vperm.xlu0 %9237, %v2692_v51   ;;  %v712_v49 = vrot.slane %v704_v34, %v10396_v44  ;;  %v688_v40 = vrot.slane %v680_v28, %v10396_v44 }
 0x16e   : > { %v716_v50 = vpop.permute.xlu1 %715  ;;  %v692_v56 = vpop.permute.xlu0 %691 }
 0x16f   : > { %v724_v43 = vrot.slane %v716_v50, %v10396_v44  ;;  %v700_v59 = vrot.slane %v692_v56, %v10396_v44  ;;  %2762 = vperm.xlu1 %9238, %v2695_v35   ;;  %2750 = vperm.xlu0 %9237, %v2694_v42   ;;  %v2698_v35 = vmul.bf16 %v10131_v8, %v10281_v57  ;;  %v10720_v8 = vld [vmem:[%s10093_s21 + $0x64] sm:$0xf] }
 0x170   : > { %12318 = vst [vmem:[#allocation63_spill] sm:$0xff] %v10720_v8 }
 0x171   : > { %v7982_v46 = vcombine.low %v712_v49, %v724_v43  ;;  %v7981_v41 = vcombine.low %v688_v40, %v700_v59  ;;  %v10417_v40 = vld [vmem:[%s10078_s10] sm:$0xff]  }
 0x172   : > { %v740_v34 = vpop.permute.xlu1 %739  ;;  %v728_v62 = vpop.permute.xlu0 %727 }
 0x173   : > { %v1150_v58 = vshrl.u32 %v7982_v46, 16  ;;  %v1143_v51 = vshrl.u32 %v7981_v41, 16  ;;  %2786 = vperm.xlu1 %9238, %v2697_v39   ;;  %2774 = vperm.xlu0 %9237, %v2696_v33   ;;  %v748_v28 = vrot.slane %v740_v34, %v10396_v44  ;;  %v736_v53 = vrot.slane %v728_v62, %v10396_v44 }
 0x174   : > { %v1153_v49 = vshll.u32 %v7982_v46, 16  ;;  %v1146_v56 = vshll.u32 %v7981_v41, 16  ;;  %v2701_v33 = vmul.bf16 %v10136_v9, %v10315_v27  ;;  %v2700_v41 = vmul.bf16 %v10139_v10, %v10318_v29 }
 0x175   : > { %v1152_v42 = vrot.slane %v1150_v58, 7  ;;  %v1145_v50 = vrot.slane %v1143_v51, 7  ;;  %v7983_v43 = vcombine.low %v736_v53, %v748_v28  ;;  %v2703_v58 = vmul.bf16 %v10144_v11, %v10323_v30 }
 0x176   : > { %v764_v59 = vpop.permute.xlu1 %763  ;;  %v752_v39 = vpop.permute.xlu0 %751  ;;  %v2702_v9 = vmul.bf16 %v10147_v12, %v10326_v31  ;;  %v2705_v10 = vmul.bf16 %v10150_v13, %v10333_v36  ;;  %v2704_v12 = vmul.bf16 %v10155_v14, %v10336_v37  ;;  %v2707_v36 = vmul.bf16 %v10160_v17, %v10342_v16  ;;  %v10448_v37 = vld [vmem:[%s10078_s10 + $0x18] sm:$0xff]  }
 0x177   : > { %v1155_v34 = vor.u32 %v1153_v49, %v1152_v42  ;;  %v1148_v62 = vor.u32 %v1146_v56, %v1145_v50  ;;  %v772_v7 = vrot.slane %v764_v59, %v10396_v44  ;;  %v760_v57 = vrot.slane %v752_v39, %v10396_v44  ;;  %2810 = vperm.xlu1 %9238, %v2699_v48  }
 0x178   : > { %v1158_v46 = vshrl.u32 %v7983_v43, 16  ;;  %2798 = vperm.xlu0 %9237, %v2698_v35   ;;  %v1161_v48 = vshll.u32 %v7983_v43, 16  ;;  %v10442_v43 = vld [vmem:[%s10078_s10 + $0x10] sm:$0xff]   ;;  %v2706_v16 = vmul.bf16 %v10163_v18, %v10345_v15 }
 0x179   : > { %v7984_v27 = vcombine.low %v760_v57, %v772_v7  ;;  %v1156_v51 = vsel %vm1141_vm0, %v1145_v50, %v1155_v34  ;;  %v1286_v28 = vmul.bf16 %v10417_v40, %v1148_v62 }
 0x17a   : > { %v1160_v53 = vrot.slane %v1158_v46, 7  ;;  %v788_v49 = vpop.permute.xlu1 %787  ;;  %v776_v35 = vpop.permute.xlu0 %775  ;;  %v1287_v56 = vmul.bf16 %v10422_v60, %v1156_v51 }
 0x17b   : > { %v1166_v11 = vshrl.u32 %v7984_v27, 16  ;;  %v796_v29 = vrot.slane %v788_v49, %v10396_v44  ;;  %v784_v7 = vrot.slane %v776_v35, %v10396_v44  ;;  %2834 = vperm.xlu1 %9238, %v2701_v33   ;;  %v1312_v31 = vshll.u32 %v1286_v28, 16 }
 0x17c   : > { %v1163_v30 = vor.u32 %v1161_v48, %v1160_v53  ;;  %2822 = vperm.xlu0 %9237, %v2700_v41   ;;  %v1317_v50 = vshll.u32 %v1287_v56, 16  ;;  %v1169_v39 = vshll.u32 %v7984_v27, 16  ;;  %v1310_v33 = vshrl.u32 %v1286_v28, 16 }
 0x17d   : > { %v1168_v59 = vrot.slane %v1166_v11, 7  ;;  %v7985_v13 = vcombine.low %v784_v7, %v796_v29  ;;  %v1314_v57 = vrot.slane %v1312_v31, 1  ;;  %v1321_v49 = vshrl.u32 %v1287_v56, 16 }
 0x17e   : > { %v812_v34 = vpop.permute.xlu1 %811  ;;  %v800_v62 = vpop.permute.xlu0 %799  ;;  %v1319_v46 = vrot.slane %v1317_v50, 1  ;;  %v1164_v14 = vsel %vm1141_vm0, %v1152_v42, %v1163_v30 }
 0x17f   : > { %v1171_v41 = vor.u32 %v1169_v39, %v1168_v59  ;;  %v1174_v51 = vshrl.u32 %v7985_v13, 16  ;;  %v820_v48 = vrot.slane %v812_v34, %v10396_v44  ;;  %2858 = vperm.xlu1 %9238, %v2703_v58   ;;  %v808_v27 = vrot.slane %v800_v62, %v10396_v44  ;;  %v10462_v62 = vld [vmem:[%s10078_s10 + $0x20] sm:$0xff]  }
 0x180   : > { %2846 = vperm.xlu0 %9237, %v2702_v9   ;;  %v1315_v35 = vor.u32 %v1314_v57, %v1310_v33  ;;  %v1288_v17 = vmul.bf16 %v10442_v43, %v1164_v14  ;;  %v1177_v11 = vshll.u32 %v7985_v13, 16  ;;  %v1323_v42 = vor.u32 %v1321_v49, %v1319_v46 }
 0x181   : > { %v1176_v28 = vrot.slane %v1174_v51, 7  ;;  %v1172_v29 = vsel %vm1141_vm0, %v1160_v53, %v1171_v41  ;;  %v7986_v7 = vcombine.low %v808_v27, %v820_v48 }
 0x182   : > { %v836_v30 = vpop.permute.xlu1 %835  ;;  %v824_v31 = vpop.permute.xlu0 %823  ;;  %v1320_v58 = vsel %vm1308_vm2, %v1315_v35, %v1319_v46  ;;  %v1325_v56 = vshll.u32 %v1288_v17, 16  ;;  %v1289_v9 = vmul.bf16 %v10448_v37, %v1172_v29  ;;  %v1329_v53 = vshrl.u32 %v1288_v17, 16 }
 0x183   : > { %v1179_v50 = vor.u32 %v1177_v11, %v1176_v28  ;;  %v844_v39 = vrot.slane %v836_v30, %v10396_v44  ;;  %v832_v34 = vrot.slane %v824_v31, %v10396_v44  ;;  %8560 = vmatprep.mubr.msk.bf16.mxu1 %vm1453_vm1, %v1320_v58  ;;  %2882 = vperm.xlu1 %9238, %v2705_v10   ;;  %v1182_v18 = vshrl.u32 %v7986_v7, 16  ;;  %v9259_v10 = vld [vmem:[#allocation8 + $0x8] sm:$0xff]  }
 0x184   : > { %2870 = vperm.xlu0 %9237, %v2704_v12   ;;  %v1327_v15 = vrot.slane %v1325_v56, 1  ;;  %v1333_v13 = vshll.u32 %v1289_v9, 16  ;;  %v1185_v33 = vshll.u32 %v7986_v7, 16  ;;  %v2708_v29 = vmul.bf16 %v10171_v20, %v10353_v55  ;;  %v10476_v30 = vld [vmem:[%s10078_s10 + $0x28] sm:$0xff]  }
 0x185   : > { %v7987_v57 = vcombine.low %v832_v34, %v844_v39  ;;  %v1180_v46 = vsel %vm1141_vm0, %v1168_v59, %v1179_v50  ;;  %v1184_v14 = vrot.slane %v1182_v18, 7  ;;  %v2709_v59 = vmul.bf16 %v10166_v19, %v10350_v63  ;;  %v10485_v39 = vld [vmem:[#allocation8 + $0x20] sm:$0xff]  }
 0x186   : > { %v1328_v41 = vsel %vm1308_vm2, %v1323_v42, %v1327_v15  ;;  %v860_v51 = vpop.permute.xlu1 %859  ;;  %v848_v48 = vpop.permute.xlu0 %847  ;;  %v1331_v49 = vor.u32 %v1329_v53, %v1327_v15  ;;  %v1335_v27 = vrot.slane %v1333_v13, 1  ;;  %v1290_v7 = vmul.bf16 %v10462_v62, %v1180_v46 }
 0x187   : > { %v1190_v35 = vshrl.u32 %v7987_v57, 16  ;;  %8561 = vmatmul.mubr.msk.bf16.vlgmr.msra.gmra.mrb[0].mxu1 %vm1453_vm1, %v1328_v41  ;;  %v868_v12 = vrot.slane %v860_v51, %v10396_v44  ;;  %v856_v17 = vrot.slane %v848_v48, %v10396_v44  ;;  %2906 = vperm.xlu1 %9238, %v2707_v36   ;;  %v1187_v11 = vor.u32 %v1185_v33, %v1184_v14 }
 0x188   : > { %2894 = vperm.xlu0 %9237, %v2706_v16   ;;  %v1336_v42 = vsel %vm1308_vm2, %v1331_v49, %v1335_v27  ;;  %v1193_v58 = vshll.u32 %v7987_v57, 16  ;;  %v2711_v36 = vmul.bf16 %v10174_v21, %v10358_v54  ;;  %8593 = vmatpush3.bf16.msra.mxu1 %v10330_v32  ;;  %v1337_v16 = vshrl.u32 %v1289_v9, 16 }
 0x189   : > { %v1192_v31 = vrot.slane %v1190_v35, 7  ;;  %v7988_v56 = vcombine.low %v856_v17, %v868_v12  ;;  %8564 = vmatprep.mubr.msk.bf16.mxu1 %vm1453_vm1, %v1336_v42  ;;  %v1341_v50 = vshll.u32 %v1290_v7, 16  ;;  %v2710_v20 = vmul.bf16 %v10179_v22, %v10361_v47  ;;  %8594 = vmatprep.subr.bf16.mxu1 %v9259_v10  ;;  %v10493_v47 = vld [vmem:[%s10078_s10 + $0x30] sm:$0xff]   ;;  %v10505_v35 = vld [vmem:[%s10078_s10 + $0x38] sm:$0xff]  }
 0x18a   : > { %v884_v19 = vpop.permute.xlu1 %883  ;;  %v872_v63 = vpop.permute.xlu0 %871  ;;  %v1188_v55 = vsel %vm1141_vm0, %v1176_v28, %v1187_v11  ;;  %v2713_v21 = vmul.bf16 %v10182_v23, %v10366_v45  ;;  %v1339_v32 = vor.u32 %v1337_v16, %v1335_v27  ;;  %v2712_v13 = vmul.bf16 %v10187_v24, %v10369_v38 }
 0x18b   : > { %v1195_v34 = vor.u32 %v1193_v58, %v1192_v31  ;;  %v1198_v18 = vshrl.u32 %v7988_v56, 16  ;;  %v892_v15 = vrot.slane %v884_v19, %v10396_v44  ;;  %2930 = vperm.xlu1 %9238, %v2709_v59   ;;  %v880_v54 = vrot.slane %v872_v63, %v10396_v44 }
 0x18c   : > { %2918 = vperm.xlu0 %9237, %v2708_v29   ;;  %v1343_v9 = vrot.slane %v1341_v50, 1  ;;  %v1291_v22 = vmul.bf16 %v10476_v30, %v1188_v55  ;;  %v1201_v53 = vshll.u32 %v7988_v56, 16  ;;  %8595 = vmatpush3.bf16.msra.mxu1 %v9259_v10  ;;  %v1345_v41 = vshrl.u32 %v1290_v7, 16  ;;  %v10518_v55 = vld [vmem:[%s10078_s10 + $0x40] sm:$0xff]  }
 0x18d   : > { %v1200_v28 = vrot.slane %v1198_v18, 7  ;;  %v1196_v33 = vsel %vm1141_vm0, %v1184_v14, %v1195_v34  ;;  %v7989_v57 = vcombine.low %v880_v54, %v892_v15  ;;  %8628 = vmatprep.subr.bf16.mxu1 %v10485_v39  ;;  %v2715_v59 = vmul.bf16 %v10190_v25, %v10374_v0  ;;  %12298 = vst [vmem:[#allocation61_spill] sm:$0xff] %v10518_v55 }
 0x18e   : > { %v1344_v23 = vsel %vm1308_vm2, %v1339_v32, %v1343_v9  ;;  %v908_v45 = vpop.permute.xlu1 %907  ;;  %v896_v46 = vpop.permute.xlu0 %895  ;;  %v1349_v51 = vshll.u32 %v1291_v22, 16  ;;  %v1347_v14 = vor.u32 %v1345_v41, %v1343_v9  ;;  %v1292_v10 = vmul.bf16 %v10493_v47, %v1196_v33  ;;  %v12299_v33 = vld [vmem:[#allocation44_spill] sm:$0xff] }
 0x18f   : > { %v1203_v48 = vor.u32 %v1201_v53, %v1200_v28  ;;  %8565 = vmatmul.mubr.msk.bf16.gmra.mrb[4].mxu1 %vm1453_vm1, %v1344_v23  ;;  %v916_v49 = vrot.slane %v908_v45, %v10396_v44  ;;  %v904_v24 = vrot.slane %v896_v46, %v10396_v44  ;;  %2954 = vperm.xlu1 %9238, %v2711_v36   ;;  %v1206_v38 = vshrl.u32 %v7989_v57, 16 }
 0x190   : > { %2942 = vperm.xlu0 %9237, %v2710_v20   ;;  %v1351_v27 = vrot.slane %v1349_v51, 1  ;;  %v1353_v17 = vshrl.u32 %v1291_v22, 16  ;;  %v1209_v29 = vshll.u32 %v7989_v57, 16  ;;  %v1357_v36 = vshll.u32 %v1292_v10, 16  ;;  %v10529_v51 = vld [vmem:[%s10078_s10 + $0x48] sm:$0xff]  }
 0x191   : > { %v7990_v12 = vcombine.low %v904_v24, %v916_v49  ;;  %v1204_v11 = vsel %vm1141_vm0, %v1192_v31, %v1203_v48  ;;  %v1208_v42 = vrot.slane %v1206_v38, 7  ;;  %v2714_v25 = vmul.bf16 %v10195_v26, %v10377_v61  ;;  %12300 = vst [vmem:[#allocation44_spill] sm:$0xff] %v10529_v51 }
 0x192   : > { %v1352_v7 = vsel %vm1308_vm2, %v1347_v14, %v1351_v27  ;;  %v932_v58 = vpop.permute.xlu1 %931  ;;  %v920_v56 = vpop.permute.xlu0 %919  ;;  %v1355_v31 = vor.u32 %v1353_v17, %v1351_v27  ;;  %v1359_v50 = vrot.slane %v1357_v36, 1  ;;  %v1293_v20 = vmul.bf16 %v10505_v35, %v1204_v11  ;;  %v12301_v11 = vld [vmem:[#allocation45_spill] sm:$0xff] }
 0x193   : > { %v1214_v19 = vshrl.u32 %v7990_v12, 16  ;;  %8568 = vmatprep.mubr.msk.bf16.mxu1 %vm1453_vm1, %v1352_v7  ;;  %v940_v63 = vrot.slane %v932_v58, %v10396_v44  ;;  %v928_v16 = vrot.slane %v920_v56, %v10396_v44  ;;  %2978 = vperm.xlu1 %9238, %v2713_v21   ;;  %v1211_v0 = vor.u32 %v1209_v29, %v1208_v42  ;;  %v10539_v56 = vld [vmem:[%s10078_s10 + $0x50] sm:$0xff]  }
 0x194   : > { %2966 = vperm.xlu0 %9237, %v2712_v13   ;;  %v1217_v18 = vshll.u32 %v7990_v12, 16  ;;  %v1360_v54 = vsel %vm1308_vm2, %v1355_v31, %v1359_v50  ;;  %v1361_v21 = vshrl.u32 %v1292_v10, 16  ;;  %v1365_v22 = vshll.u32 %v1293_v20, 16  ;;  %12302 = vst [vmem:[#allocation45_spill] sm:$0xff] %v10539_v56 }
 0x195   : > { %v1216_v34 = vrot.slane %v1214_v19, 7  ;;  %v7991_v15 = vcombine.low %v928_v16, %v940_v63  ;;  %v1212_v26 = vsel %vm1141_vm0, %v1200_v28, %v1211_v0  ;;  %v2716_v57 = vmul.bf16 %v12299_v33, %v10383_v52 }
 0x196   : > { %v956_v32 = vpop.permute.xlu1 %955  ;;  %v944_v9 = vpop.permute.xlu0 %943  ;;  %v1363_v45 = vor.u32 %v1361_v21, %v1359_v50  ;;  %v1367_v46 = vrot.slane %v1365_v22, 1  ;;  %v1294_v41 = vmul.bf16 %v10518_v55, %v1212_v26  ;;  %v1369_v52 = vshrl.u32 %v1293_v20, 16  ;;  %v12304_v21 = vld [vmem:[#allocation47_spill] sm:$0xff] }
 0x197   : > { %v1219_v61 = vor.u32 %v1217_v18, %v1216_v34  ;;  %v1222_v53 = vshrl.u32 %v7991_v15, 16  ;;  %8569 = vmatmul.mubr.msk.bf16.gmra.mrb[8].mxu1 %vm1453_vm1, %v1360_v54  ;;  %v964_v13 = vrot.slane %v956_v32, %v10396_v44  ;;  %3002 = vperm.xlu1 %9238, %v2715_v59   ;;  %v952_v23 = vrot.slane %v944_v9, %v10396_v44  ;;  %v12303_v32 = vld [vmem:[#allocation49_spill] sm:$0xff] }
 0x198   : > { %2990 = vperm.xlu0 %9237, %v2714_v25   ;;  %v1225_v48 = vshll.u32 %v7991_v15, 16  ;;  %v1368_v38 = vsel %vm1308_vm2, %v1363_v45, %v1367_v46  ;;  %v1373_v10 = vshll.u32 %v1294_v41, 16  ;;  %v1377_v19 = vshrl.u32 %v1294_v41, 16 }
 0x199   : > { %v1224_v28 = vrot.slane %v1222_v53, 7  ;;  %v1220_v49 = vsel %vm1141_vm0, %v1208_v42, %v1219_v61  ;;  %v7992_v24 = vcombine.low %v952_v23, %v964_v13  ;;  %8572 = vmatprep.mubr.msk.bf16.mxu1 %vm1453_vm1, %v1368_v38  ;;  %v1371_v42 = vor.u32 %v1369_v52, %v1367_v46  ;;  %v10550_v61 = vld [vmem:[%s10078_s10 + $0x58] sm:$0xff]  }
 0x19a   : > { %v980_v14 = vpop.permute.xlu1 %979  ;;  %v968_v27 = vpop.permute.xlu0 %967  ;;  %v1375_v7 = vrot.slane %v1373_v10, 1  ;;  %v1295_v58 = vmul.bf16 %v10529_v51, %v1220_v49  ;;  %12305 = vst [vmem:[#allocation49_spill] sm:$0xff] %v10550_v61  ;;  %v9262_v49 = vld [vmem:[#allocation8 + $0x40] sm:$0xff]  }
 0x19b   : > { %v1227_v12 = vor.u32 %v1225_v48, %v1224_v28  ;;  %v988_v17 = vrot.slane %v980_v14, %v10396_v44  ;;  %v976_v59 = vrot.slane %v968_v27, %v10396_v44  ;;  %3779 = vperm.xlu1 %9238, %v12301_v11   ;;  %v1230_v29 = vshrl.u32 %v7992_v24, 16  ;;  %v12306_v27 = vld [vmem:[#allocation52_spill] sm:$0xff]  ;;  %v12307_v10 = vld [vmem:[#allocation51_spill] sm:$0xff]  ;;  %8700 = vmatprep.subr.bf16.mxu0 %v9262_v49 }
 0x19c   : > { %3014 = vperm.xlu0 %9237, %v2716_v57   ;;  %v1233_v25 = vshll.u32 %v7992_v24, 16  ;;  %v1376_v0 = vsel %vm1308_vm2, %v1371_v42, %v1375_v7  ;;  %v1381_v20 = vshll.u32 %v1295_v58, 16  ;;  %v1385_v46 = vshrl.u32 %v1295_v58, 16  ;;  %v10561_v11 = vld [vmem:[%s10078_s10 + $0x60] sm:$0xff]   ;;  %8701 = vmatpush3.bf16.msra.mxu0 %v9262_v49 }
 0x19d   : > { %v7993_v36 = vcombine.low %v976_v59, %v988_v17  ;;  %v1228_v63 = vsel %vm1141_vm0, %v1216_v34, %v1227_v12  ;;  %v1232_v16 = vrot.slane %v1230_v29, 7  ;;  %v1379_v34 = vor.u32 %v1377_v19, %v1375_v7  ;;  %12308 = vst [vmem:[#allocation47_spill] sm:$0xff] %v10561_v11  ;;  %v12312_v49 = vld [vmem:[#allocation59_spill] sm:$0xff] }
 0x19e   : > { %v1004_v31 = vpop.permute.xlu1 %1003  ;;  %v992_v50 = vpop.permute.xlu0 %991  ;;  %v1383_v22 = vrot.slane %v1381_v20, 1  ;;  %v1296_v26 = vmul.bf16 %v10539_v56, %v1228_v63  ;;  %v12309_v20 = vld [vmem:[#allocation57_spill] sm:$0xff] }
 0x19f   : > { %v1238_v18 = vshrl.u32 %v7993_v36, 16  ;;  %8573 = vmatmul.mubr.msk.bf16.gmra.mrb[12].mxu1 %vm1453_vm1, %v1376_v0  ;;  %v1012_v15 = vrot.slane %v1004_v31, %v10396_v44  ;;  %v1000_v54 = vrot.slane %v992_v50, %v10396_v44  ;;  %3803 = vperm.xlu1 %9238, %v12303_v32   ;;  %v1235_v9 = vor.u32 %v1233_v25, %v1232_v16 }
 0x1a0   : > { %3791 = vperm.xlu0 %9237, %v12304_v21   ;;  %v1241_v13 = vshll.u32 %v7993_v36, 16  ;;  %v1384_v57 = vsel %vm1308_vm2, %v1379_v34, %v1383_v22  ;;  %v1389_v41 = vshll.u32 %v1296_v26, 16  ;;  %v1387_v12 = vor.u32 %v1385_v46, %v1383_v22  ;;  %v10575_v34 = vld [vmem:[%s10078_s10 + $0x68] sm:$0xff]  }
 0x1a1   : > { %v1240_v53 = vrot.slane %v1238_v18, 7  ;;  %v7994_v33 = vcombine.low %v1000_v54, %v1012_v15  ;;  %v1236_v48 = vsel %vm1141_vm0, %v1224_v28, %v1235_v9  ;;  %8576 = vmatprep.mubr.msk.bf16.mxu1 %vm1453_vm1, %v1384_v57  ;;  %v1393_v63 = vshrl.u32 %v1296_v26, 16  ;;  %v12310_v15 = vld [vmem:[#allocation55_spill] sm:$0xff]  ;;  %12311 = vst [vmem:[#allocation52_spill] sm:$0xff] %v10575_v34 }
 0x1a2   : > { %v1028_v23 = vpop.permute.xlu1 %1027  ;;  %v1016_v45 = vpop.permute.xlu0 %1015  ;;  %v1391_v17 = vrot.slane %v1389_v41, 1  ;;  %v1297_v59 = vmul.bf16 %v10550_v61, %v1236_v48  ;;  %v10571_v9 = vld [vmem:[%s10093_s21 + $0x20] sm:$0xf] }
 0x1a3   : > { %v1243_v24 = vor.u32 %v1241_v13, %v1240_v53  ;;  %v1246_v38 = vshrl.u32 %v7994_v33, 16  ;;  %v1036_v14 = vrot.slane %v1028_v23, %v10396_v44  ;;  %3827 = vperm.xlu1 %9238, %v12306_v27   ;;  %v1024_v52 = vrot.slane %v1016_v45, %v10396_v44  ;;  %v10588_v27 = vld [vmem:[%s10078_s10 + $0x70] sm:$0xff]  }
 0x1a4   : > { %3815 = vperm.xlu0 %9237, %v12307_v10   ;;  %v1249_v29 = vshll.u32 %v7994_v33, 16  ;;  %v1392_v58 = vsel %vm1308_vm2, %v1387_v12, %v1391_v17  ;;  %v1397_v25 = vshll.u32 %v1297_v59, 16  ;;  %v1395_v54 = vor.u32 %v1393_v63, %v1391_v17  ;;  %v10591_v12 = vld [vmem:[%s10093_s21 + $0x24] sm:$0xf]  ;;  %v10594_v17 = vld [vmem:[%s10093_s21 + $0x28] sm:$0xf] }
 0x1a5   : > { %v1248_v28 = vrot.slane %v1246_v38, 7  ;;  %v1244_v42 = vsel %vm1141_vm0, %v1232_v16, %v1243_v24  ;;  %v7995_v7 = vcombine.low %v1024_v52, %v1036_v14  ;;  %v9263_v16 = vld [vmem:[#allocation8 + $0x48] sm:$0xff]   ;;  %v1401_v26 = vshrl.u32 %v1297_v59, 16  ;;  %v10604_v63 = vld [vmem:[%s10078_s10 + $0x78] sm:$0xff]  }
 0x1a6   : > { %v1052_v36 = vpop.permute.xlu1 %1051  ;;  %v1040_v19 = vpop.permute.xlu0 %1039  ;;  %v1399_v32 = vrot.slane %v1397_v25, 1  ;;  %v1298_v21 = vmul.bf16 %v10561_v11, %v1244_v42  ;;  %8702 = vmatprep.subr.bf16.mxu0 %v9263_v16  ;;  %v10607_v25 = vld [vmem:[%s10086_s15] sm:$0xff]  }
 0x1a7   : > { %v1251_v0 = vor.u32 %v1249_v29, %v1248_v28  ;;  %8577 = vmatmul.mubr.msk.bf16.gmra.mrb[16].mxu1 %vm1453_vm1, %v1392_v58  ;;  %v1060_v31 = vrot.slane %v1052_v36, %v10396_v44  ;;  %v1048_v50 = vrot.slane %v1040_v19, %v10396_v44  ;;  %3851 = vperm.xlu1 %9238, %v12309_v20   ;;  %v1254_v18 = vshrl.u32 %v7995_v7, 16  ;;  %v10613_v20 = vld [vmem:[%s10093_s21 + $0x2c] sm:$0xf] }
 0x1a8   : > { %3839 = vperm.xlu0 %9237, %v12310_v15   ;;  %v1257_v57 = vshll.u32 %v7995_v7, 16  ;;  %v1400_v23 = vsel %vm1308_vm2, %v1395_v54, %v1399_v32  ;;  %v1405_v41 = vshll.u32 %v1298_v21, 16  ;;  %8703 = vmatpush3.bf16.msra.mxu0 %v9263_v16  ;;  %v1403_v24 = vor.u32 %v1401_v26, %v1399_v32  ;;  %12313 = vst [vmem:[#allocation51_spill] sm:$0xff] %v10607_v25 }
 0x1a9   : > { %v7996_v22 = vcombine.low %v1048_v50, %v1060_v31  ;;  %v1252_v13 = vsel %vm1141_vm0, %v1240_v53, %v1251_v0  ;;  %v1256_v33 = vrot.slane %v1254_v18, 7  ;;  %8580 = vmatprep.mubr.msk.bf16.mxu1 %vm1453_vm1, %v1400_v23  ;;  %v1409_v7 = vshrl.u32 %v1298_v21, 16  ;;  %v10633_v23 = vld [vmem:[%s10093_s21 + $0x38] sm:$0xf] }
 0x1aa   : > { %v10579_v45 = vpop.permute.xlu1 %1898  ;;  %v10581_v46 = vpop.permute.xlu0 %1886  ;;  %v1407_v38 = vrot.slane %v1405_v41, 1  ;;  %v1299_v14 = vmul.bf16 %v10575_v34, %v1252_v13 }
 0x1ab   : > { %v1262_v48 = vshrl.u32 %v7996_v22, 16  ;;  %3875 = vperm.xlu1 %9238, %v10571_v9   ;;  %v1259_v53 = vor.u32 %v1257_v57, %v1256_v33  ;;  %v1265_v10 = vshll.u32 %v7996_v22, 16  ;;  %v10630_v57 = vld [vmem:[%s10093_s21 + $0x34] sm:$0xf] }
 0x1ac   : > { %3863 = vperm.xlu0 %9237, %v12312_v49   ;;  %v1408_v59 = vsel %vm1308_vm2, %v1403_v24, %v1407_v38  ;;  %v1413_v58 = vshll.u32 %v1299_v14, 16  ;;  %v1411_v0 = vor.u32 %v1409_v7, %v1407_v38  ;;  %v1417_v32 = vshrl.u32 %v1299_v14, 16  ;;  %v10645_v7 = vld [vmem:[%s10093_s21 + $0x3c] sm:$0xf] }
 0x1ad   : > { %v1264_v52 = vrot.slane %v1262_v48, 7  ;;  %v1260_v36 = vsel %vm1141_vm0, %v1248_v28, %v1259_v53  ;;  %v10616_v28 = vld [vmem:[%s10093_s21 + $0x30] sm:$0xf] }
 0x1ae   : > { %v10597_v29 = vpop.permute.xlu1 %1922  ;;  %v10599_v42 = vpop.permute.xlu0 %1910  ;;  %v1415_v31 = vrot.slane %v1413_v58, 1  ;;  %v1300_v50 = vmul.bf16 %v10588_v27, %v1260_v36  ;;  %v10648_v58 = vld [vmem:[%s10093_s21 + $0x40] sm:$0xf] }
 0x1af   : > { %v1267_v19 = vor.u32 %v1265_v10, %v1264_v52  ;;  %8581 = vmatmul.mubr.msk.bf16.gmra.mrb[20].mxu1 %vm1453_vm1, %v1408_v59  ;;  %3899 = vperm.xlu1 %9238, %v10594_v17   ;;  %v1302_v26 = vmul.bf16 %v10607_v25, %v1264_v52  ;;  %v9277_v25 = vld [vmem:[%s10093_s21 + $0x104] sm:$0xf] }
 0x1b0   : > { %3887 = vperm.xlu0 %9237, %v10591_v12   ;;  %v1416_v18 = vsel %vm1308_vm2, %v1411_v0, %v1415_v31  ;;  %v1421_v21 = vshll.u32 %v1300_v50, 16  ;;  %v1419_v13 = vor.u32 %v1417_v32, %v1415_v31  ;;  %v1425_v41 = vshrl.u32 %v1300_v50, 16  ;;  %v10658_v50 = vld [vmem:[%s10093_s21 + $0x44] sm:$0xf] }
 0x1b1   : > { %v1268_v16 = vsel %vm1141_vm0, %v1256_v33, %v1267_v19  ;;  %8584 = vmatprep.mubr.msk.bf16.mxu1 %vm1453_vm1, %v1416_v18  ;;  %v1437_v10 = vshll.u32 %v1302_v26, 16  ;;  %v10675_v26 = vld [vmem:[%s10093_s21 + $0x50] sm:$0xf] }
 0x1b2   : > { %v10620_v15 = vpop.permute.xlu1 %1946  ;;  %v10622_v54 = vpop.permute.xlu0 %1934  ;;  %v1301_v22 = vmul.bf16 %v10604_v63, %v1268_v16  ;;  %v1423_v33 = vrot.slane %v1421_v21, 1  ;;  %v10661_v16 = vld [vmem:[%s10093_s21 + $0x48] sm:$0xf] }
 0x1b3   : > { %3923 = vperm.xlu1 %9238, %v10616_v28   ;;  %v1439_v31 = vrot.slane %v1437_v10, 1  ;;  %v10702_v10 = vld [vmem:[%s10093_s21 + $0x5c] sm:$0xf] }
 0x1b4   : > { %3911 = vperm.xlu0 %9237, %v10613_v20   ;;  %v1429_v48 = vshll.u32 %v1301_v22, 16  ;;  %v1424_v53 = vsel %vm1308_vm2, %v1419_v13, %v1423_v33  ;;  %v1427_v38 = vor.u32 %v1425_v41, %v1423_v33  ;;  %v1433_v52 = vshrl.u32 %v1301_v22, 16  ;;  %v10672_v22 = vld [vmem:[%s10093_s21 + $0x4c] sm:$0xf]  ;;  %v10686_v41 = vld [vmem:[%s10093_s21 + $0x54] sm:$0xf] }
 0x1b6   : > { %v10636_v49 = vpop.permute.xlu1 %1970  ;;  %v10638_v24 = vpop.permute.xlu0 %1958  ;;  %v1431_v14 = vrot.slane %v1429_v48, 1  ;;  %v10689_v48 = vld [vmem:[%s10093_s21 + $0x58] sm:$0xf] }
 0x1b7   : > { %8585 = vmatmul.mubr.msk.bf16.gmra.mrb[24].mxu1 %vm1453_vm1, %v1424_v53  ;;  %3947 = vperm.xlu1 %9238, %v10633_v23  }
 0x1b8   : > { %3935 = vperm.xlu0 %9237, %v10630_v57   ;;  %v1432_v59 = vsel %vm1308_vm2, %v1427_v38, %v1431_v14  ;;  %v1435_v0 = vor.u32 %v1433_v52, %v1431_v14  ;;  %v9261_v14 = vld [vmem:[#allocation8 + $0x28] sm:$0xff]   ;;  %v10699_v52 = vld [vmem:[#allocation8 + $0x50] sm:$0xff]  }
 0x1b9   : > { %8588 = vmatprep.mubr.msk.bf16.mxu1 %vm1453_vm1, %v1432_v59  ;;  %12315 = vst [vmem:[#allocation55_spill] sm:$0xff] %v10699_v52  ;;  %v10705_v59 = vld [vmem:[%s10093_s21 + $0x60] sm:$0xf]  ;;  %8736 = vmatprep.subr.bf16.mxu0 %v10699_v52 }
 0x1ba   : > { %v10651_v36 = vpop.permute.xlu1 %1994  ;;  %v10653_v19 = vpop.permute.xlu0 %1982  ;;  %v1440_v18 = vsel %vm1308_vm2, %v1435_v0, %v1439_v31 }
 0x1bb   : > { %3971 = vperm.xlu1 %9238, %v10648_v58  }
 0x1bc   : > { %3959 = vperm.xlu0 %9237, %v10645_v7  }
 0x1be   : > { %v10664_v32 = vpop.permute.xlu1 %2018  ;;  %v10666_v21 = vpop.permute.xlu0 %2006 }
 0x1bf   : > { %8589 = vmatmul.mubr.msk.bf16.gmra.mrb[28].mxu1 %vm1453_vm1, %v1440_v18  ;;  %3995 = vperm.xlu1 %9238, %v10661_v16   ;;  %v10714_v18 = vld [vmem:[#allocation8 + $0x30] sm:$0xff]  }
 0x1c0   : > { %3983 = vperm.xlu0 %9237, %v10658_v50   ;;  %8596 = vmatprep.mubr.msk.bf16.mxu1 %vm1453_vm1, %v10417_v40 }
 0x1c2   : > { %v10679_v13 = vpop.permute.xlu1 %2042  ;;  %v10681_v33 = vpop.permute.xlu0 %2030 }
 0x1c3   : > { %4019 = vperm.xlu1 %9238, %v10675_v26  }
 0x1c4   : > { %4007 = vperm.xlu0 %9237, %v10672_v22  }
 0x1c6   : > { %v10691_v53 = vpop.permute.xlu1 %2066  ;;  %v10693_v38 = vpop.permute.xlu0 %2054 }
 0x1c7   : > { %12314 = vst [vmem:[#allocation57_spill] sm:$0xff] %v10691_v53  ;;  %8597 = vmatmul.mubr.msk.bf16.vlgmr.msra.gmra.mrb[0].mxu1 %vm1453_vm1, %v10422_v60  ;;  %4043 = vperm.xlu1 %9238, %v10689_v48  }
 0x1c8   : > { %4031 = vperm.xlu0 %9237, %v10686_v41   ;;  %8600 = vmatprep.mubr.msk.bf16.mxu1 %vm1453_vm1, %v10442_v43 }
 0x1c9   : > { %8629 = vmatpush3.bf16.msra.mxu1 %v10485_v39 }
 0x1ca   : > { %v10710_v0 = vpop.permute.xlu1 %2090  ;;  %v10712_v31 = vpop.permute.xlu0 %2078  ;;  %8630 = vmatprep.subr.bf16.mxu1 %v9261_v14 }
 0x1cb   : > { %12316 = vst [vmem:[#allocation59_spill] sm:$0xff] %v10710_v0  ;;  %12317 = vst [vmem:[#allocation62_spill] sm:$0xff] %v10712_v31  ;;  %4067 = vperm.xlu1 %9238, %v10705_v59   ;;  %v9280_v0 = vld [vmem:[%s10093_s21 + $0x8] sm:$0xf] }
 0x1cc   : > { %4055 = vperm.xlu0 %9237, %v10702_v10   ;;  %v4533_v53 = vmul.bf16 %v9280_v0, %v9279_v3  ;;  %v9285_v3 = vld [vmem:[%s10093_s21 + $0x114] sm:$0xf] }
 0x1cd   : > { %8631 = vmatpush3.bf16.msra.mxu1 %v9261_v14  ;;  %v10737_v14 = vld [vmem:[%s10093_s21 + $0x6c] sm:$0xf] }
 0x1ce   : > { %v10725_v39 = vpop.permute.xlu1 %2114  ;;  %v10727_v6 = vpop.permute.xlu0 %2102  ;;  %8664 = vmatprep.subr.bf16.mxu1 %v10714_v18 }
 0x1cf   : > { %12320 = vst [vmem:[#allocation65_spill] sm:$0xff] %v10725_v39  ;;  %12321 = vst [vmem:[#allocation66_spill] sm:$0xff] %v10727_v6  ;;  %8601 = vmatmul.mubr.msk.bf16.gmra.mrb[4].mxu1 %vm1453_vm1, %v10448_v37  ;;  %4091 = vperm.xlu1 %9238, %v10723_v5   ;;  %v9278_v39 = vld [vmem:[%s10093_s21 + $0x4] sm:$0xf] }
 0x1d0   : > { %4079 = vperm.xlu0 %9237, %v10720_v8   ;;  %8604 = vmatprep.mubr.msk.bf16.mxu1 %vm1453_vm1, %v10462_v62  ;;  %v4532_v1 = vmul.bf16 %v9278_v39, %v9277_v25  ;;  %v9283_v25 = vld [vmem:[%s10093_s21 + $0x110] sm:$0xf] }
 0x1d1   : > { %v9284_v39 = vld [vmem:[%s10093_s21 + $0x10] sm:$0xf] }
 0x1d2   : > { %v10741_v2 = vpop.permute.xlu1 %2138  ;;  %v10743_v52 = vpop.permute.xlu0 %2126  ;;  %v4535_v8 = vmul.bf16 %v9284_v39, %v9283_v25  ;;  %v9287_v25 = vld [vmem:[%s10093_s21 + $0x118] sm:$0xf] }
 0x1d3   : > { %12322 = vst [vmem:[#allocation67_spill] sm:$0xff] %v10741_v2  ;;  %12323 = vst [vmem:[#allocation68_spill] sm:$0xff] %v10743_v52  ;;  %4565 = vperm.xlu1 %9238, %v4531_v4   ;;  %v9281_v2 = vld [vmem:[%s10093_s21 + $0x10c] sm:$0xf]  ;;  %v9288_v39 = vld [vmem:[%s10093_s21 + $0x18] sm:$0xf] }
 0x1d4   : > { %4103 = vperm.xlu0 %9237, %v10737_v14   ;;  %v9282_v52 = vld [vmem:[%s10093_s21 + $0xc] sm:$0xf] }
 0x1d5   : > { %v4534_v5 = vmul.bf16 %v9282_v52, %v9281_v2  ;;  %v10769_v2 = vld [vmem:[%s10093_s21 + $0x70] sm:$0xf] }
 0x1d6   : > { %v10750_v6 = vpop.permute.xlu1 %2162  ;;  %v10752_v31 = vpop.permute.xlu0 %2150 }
 0x1d7   : > { %12324 = vst [vmem:[#allocation69_spill] sm:$0xff] %v10750_v6  ;;  %12325 = vst [vmem:[#allocation70_spill] sm:$0xff] %v10752_v31  ;;  %8605 = vmatmul.mubr.msk.bf16.gmra.mrb[8].mxu1 %vm1453_vm1, %v10476_v30  ;;  %4589 = vperm.xlu1 %9238, %v4533_v53   ;;  %v9286_v6 = vld [vmem:[%s10093_s21 + $0x14] sm:$0xf] }
 0x1d8   : > { %4577 = vperm.xlu0 %9237, %v4532_v1   ;;  %8608 = vmatprep.mubr.msk.bf16.mxu1 %vm1453_vm1, %v10493_v47  ;;  %v4536_v31 = vmul.bf16 %v9286_v6, %v9285_v3  ;;  %v10779_v1 = vld [vmem:[%s10093_s21 + $0x74] sm:$0xf]  ;;  %v10782_v6 = vld [vmem:[%s10093_s21 + $0x78] sm:$0xf]  ;;  %v4537_v3 = vmul.bf16 %v9288_v39, %v9287_v25 }
 0x1d9   : > { %12330 = vst [vmem:[#allocation75_spill] sm:$0xff] %v10782_v6 }
 0x1da   : > { %v10762_v4 = vpop.permute.xlu1 %2186  ;;  %v10764_v0 = vpop.permute.xlu0 %2174 }
 0x1db   : > { %12326 = vst [vmem:[#allocation71_spill] sm:$0xff] %v10762_v4  ;;  %12327 = vst [vmem:[#allocation72_spill] sm:$0xff] %v10764_v0  ;;  %4613 = vperm.xlu1 %9238, %v4535_v8   ;;  %v9296_v0 = vld [vmem:[%s10093_s21 + $0x134] sm:$0xf] }
 0x1dc   : > { %4601 = vperm.xlu0 %9237, %v4534_v5  }
 0x1de   : > { %v10771_v52 = vpop.permute.xlu1 %2210  ;;  %v10773_v53 = vpop.permute.xlu0 %2198 }
 0x1df   : > { %12328 = vst [vmem:[#allocation73_spill] sm:$0xff] %v10771_v52  ;;  %12329 = vst [vmem:[#allocation74_spill] sm:$0xff] %v10773_v53  ;;  %8609 = vmatmul.mubr.msk.bf16.gmra.mrb[12].mxu1 %vm1453_vm1, %v10505_v35  ;;  %4115 = vperm.xlu1 %9238, %v10769_v2  }
 0x1e0   : > { %4625 = vperm.xlu0 %9237, %v4536_v31   ;;  %8612 = vmatprep.mubr.msk.bf16.mxu1 %vm1453_vm1, %v10518_v55  ;;  %v10795_v31 = vld [vmem:[%s10093_s21 + $0x7c] sm:$0xf]  ;;  %v9291_v55 = vld [vmem:[%s10093_s21 + $0x120] sm:$0xf] }
 0x1e1   : > { %12333 = vst [vmem:[#allocation78_spill] sm:$0xff] %v10795_v31  ;;  %v4539_v25 = vmul.bf16 %v9291_v55, %v10571_v9 }
 0x1e2   : > { %v10786_v5 = vpop.permute.xlu1 %2234  ;;  %v10788_v8 = vpop.permute.xlu0 %2222 }
 0x1e3   : > { %12331 = vst [vmem:[#allocation76_spill] sm:$0xff] %v10786_v5  ;;  %12332 = vst [vmem:[#allocation77_spill] sm:$0xff] %v10788_v8  ;;  %4139 = vperm.xlu1 %9238, %v10782_v6   ;;  %v9289_v5 = vld [vmem:[%s10093_s21 + $0x11c] sm:$0xf]  ;;  %v9293_v6 = vld [vmem:[%s10093_s21 + $0x128] sm:$0xf] }
 0x1e4   : > { %4127 = vperm.xlu0 %9237, %v10779_v1   ;;  %v9290_v8 = vld [vmem:[%s10093_s21 + $0x1c] sm:$0xf] }
 0x1e5   : > { %v4538_v4 = vmul.bf16 %v9290_v8, %v9289_v5  ;;  %v4541_v5 = vmul.bf16 %v9293_v6, %v10594_v17 }
 0x1e6   : > { %v10797_v52 = vpop.permute.xlu1 %2258  ;;  %v10799_v53 = vpop.permute.xlu0 %2246 }
 0x1e7   : > { %12334 = vst [vmem:[#allocation79_spill] sm:$0xff] %v10797_v52  ;;  %12335 = vst [vmem:[#allocation80_spill] sm:$0xff] %v10799_v53  ;;  %8613 = vmatmul.mubr.msk.bf16.gmra.mrb[16].mxu1 %vm1453_vm1, %v10529_v51  ;;  %4637 = vperm.xlu1 %9238, %v4537_v3   ;;  %v9292_v53 = vld [vmem:[%s10093_s21 + $0x124] sm:$0xf]  ;;  %v1919_v3 = vrot.slane %v10599_v42, %v10396_v44 }
 0x1e8   : > { %4151 = vperm.xlu0 %9237, %v10795_v31   ;;  %8616 = vmatprep.mubr.msk.bf16.mxu1 %vm1453_vm1, %v10539_v56  ;;  %v4540_v51 = vmul.bf16 %v9292_v53, %v10591_v12  ;;  %v9294_v56 = vld [vmem:[%s10093_s21 + $0x12c] sm:$0xf]  ;;  %v9295_v31 = vld [vmem:[%s10093_s21 + $0x130] sm:$0xf] }
 0x1e9   : > { %v4542_v53 = vmul.bf16 %v9294_v56, %v10613_v20  ;;  %v4543_v6 = vmul.bf16 %v9295_v31, %v10616_v28  ;;  %v9297_v31 = vld [vmem:[%s10093_s21 + $0x138] sm:$0xf] }
 0x1ea   : > { %v10810_v39 = vpop.permute.xlu1 %2738  ;;  %v10812_v52 = vpop.permute.xlu0 %2726 }
 0x1eb   : > { %4661 = vperm.xlu1 %9238, %v4539_v25   ;;  %v1895_v25 = vrot.slane %v10581_v46, %v10396_v44  ;;  %v1943_v46 = vrot.slane %v10622_v54, %v10396_v44  ;;  %v9299_v54 = vld [vmem:[%s10093_s21 + $0x140] sm:$0xf] }
 0x1ec   : > { %4649 = vperm.xlu0 %9237, %v4538_v4   ;;  %v1907_v4 = vrot.slane %v10579_v45, %v10396_v44 }
 0x1ed   : > { %v8033_v45 = vcombine.low %v1895_v25, %v1895_v25  ;;  %v4547_v25 = vmul.bf16 %v9299_v54, %v10648_v58 }
 0x1ee   : > { %v10818_v55 = vpop.permute.xlu1 %2762  ;;  %v10820_v8 = vpop.permute.xlu0 %2750  ;;  %v8034_v56 = vcombine.low %v1907_v4, %v1919_v3  ;;  %v1967_v3 = vrot.slane %v10638_v24, %v10396_v44  ;;  %v1955_v24 = vrot.slane %v10620_v15, %v10396_v44 }
 0x1ef   : > { %8617 = vmatmul.mubr.msk.bf16.gmra.mrb[20].mxu1 %vm1453_vm1, %v10550_v61  ;;  %4685 = vperm.xlu1 %9238, %v4541_v5   ;;  %v4545_v5 = vmul.bf16 %v9297_v31, %v10633_v23 }
 0x1f0   : > { %4673 = vperm.xlu0 %9237, %v4540_v51   ;;  %8620 = vmatprep.mubr.msk.bf16.mxu1 %vm1453_vm1, %v10561_v11  ;;  %v4544_v51 = vmul.bf16 %v9296_v0, %v10630_v57 }
 0x1f2   : > { %v10836_v42 = vpop.permute.xlu1 %2786  ;;  %v10838_v61 = vpop.permute.xlu0 %2774 }
 0x1f3   : > { %12336 = vst [vmem:[#allocation81_spill] sm:$0xff] %v10836_v42  ;;  %4709 = vperm.xlu1 %9238, %v4543_v6   ;;  %v2367_v42 = vmul.bf16 %v10422_v60, %v8034_v56  ;;  %v9298_v6 = vld [vmem:[%s10093_s21 + $0x13c] sm:$0xf]  ;;  %v2366_v60 = vmul.bf16 %v10417_v40, %v8033_v45  ;;  %v9301_v45 = vld [vmem:[%s10093_s21 + $0x148] sm:$0xf] }
 0x1f4   : > { %4697 = vperm.xlu0 %9237, %v4542_v53   ;;  %v1931_v53 = vrot.slane %v10597_v29, %v10396_v44  ;;  %v4546_v4 = vmul.bf16 %v9298_v6, %v10645_v7  ;;  %v8036_v6 = vcombine.low %v1955_v24, %v1967_v3  ;;  %v1979_v3 = vrot.slane %v10636_v49, %v10396_v44 }
 0x1f5   : > { %v10868_v31 = vrot.slane %v2367_v42, 4  ;;  %v2406_v15 = vrot.slane %v2366_v60, 4  ;;  %v9303_v60 = vld [vmem:[%s10093_s21 + $0xa4] sm:$0xf] }
 0x1f6   : > { %v10846_v11 = vpop.permute.xlu1 %2810  ;;  %v8035_v56 = vcombine.low %v1931_v53, %v1943_v46  ;;  %v4549_v46 = vmul.bf16 %v9301_v45, %v10661_v16  ;;  %v2369_v54 = vmul.bf16 %v10448_v37, %v8036_v6  ;;  %v10898_v24 = vmul.bf16 %v9303_v60, %v10591_v12  ;;  %v9304_v37 = vld [vmem:[%s10093_s21 + $0x14c] sm:$0xf] }
 0x1f7   : > { %8621 = vmatmul.mubr.msk.bf16.gmra.mrb[24].mxu1 %vm1453_vm1, %v10575_v34  ;;  %v10853_v0 = vpop.permute.xlu0 %2798  ;;  %4733 = vperm.xlu1 %9238, %v4545_v5   ;;  %v9300_v5 = vld [vmem:[%s10093_s21 + $0x144] sm:$0xf]  ;;  %v2408_v49 = vsel %vm2405_vm3, %v2406_v15, %v10868_v31  ;;  %v2003_v12 = vrot.slane %v10651_v36, %v10396_v44 }
 0x1f8   : > { %4721 = vperm.xlu0 %9237, %v4544_v51   ;;  %8624 = vmatprep.mubr.msk.bf16.mxu1 %vm1453_vm1, %v10588_v27  ;;  %v1991_v51 = vrot.slane %v10653_v19, %v10396_v44  ;;  %v4548_v40 = vmul.bf16 %v9300_v5, %v10658_v50  ;;  %v2368_v42 = vmul.bf16 %v10442_v43, %v8035_v56  ;;  %v9302_v19 = vld [vmem:[%s10093_s21 + $0xa0] sm:$0xf]  ;;  %v9306_v5 = vld [vmem:[%s10093_s21 + $0xac] sm:$0xf]  ;;  %v10927_v36 = vrot.slane %v2369_v54, 4 }
 0x1f9   : > { %v4550_v56 = vmul.bf16 %v9304_v37, %v10672_v22  ;;  %v10909_v15 = vmul.bf16 %v9306_v5, %v10613_v20  ;;  %v2039_v20 = vrot.slane %v10681_v33, %v10396_v44  ;;  %v2027_v5 = vrot.slane %v10664_v32, %v10396_v44 }
 0x1fa   : > { %v10866_v29 = vpop.permute.xlu1 %2834  ;;  %v2063_v54 = vrot.slane %v10693_v38, %v10396_v44 }
 0x1fb   : > { %v10870_v34 = vpop.permute.xlu0 %2822  ;;  %4757 = vperm.xlu1 %9238, %v4547_v25   ;;  %v2015_v25 = vrot.slane %v10666_v21, %v10396_v44  ;;  %v9305_v21 = vld [vmem:[%s10093_s21 + $0xa8] sm:$0xf] }
 0x1fc   : > { %4745 = vperm.xlu0 %9237, %v4546_v4   ;;  %v10885_v4 = vmul.bf16 %v9302_v19, %v10571_v9  ;;  %v8037_v9 = vcombine.low %v1979_v3, %v1991_v51  ;;  %v10905_v6 = vmul.bf16 %v9305_v21, %v10594_v17  ;;  %v9307_v51 = vld [vmem:[%s10093_s21 + $0x150] sm:$0xf]  ;;  %v2409_v3 = vrot.slane %v2368_v42, 4  ;;  %v9309_v17 = vld [vmem:[%s10093_s21 + $0xb4] sm:$0xf] }
 0x1fd   : > { %v4551_v45 = vmul.bf16 %v9307_v51, %v10675_v26  ;;  %v9308_v19 = vld [vmem:[%s10093_s21 + $0xb0] sm:$0xf]  ;;  %v9312_v51 = vld [vmem:[%s10093_s21 + $0x154] sm:$0xf] }
 0x1fe   : > { %v10881_v53 = vpop.permute.xlu1 %2858  ;;  %12337 = vst [vmem:[#allocation82_spill] sm:$0xff] %v10885_v4  ;;  %v2370_v33 = vmul.bf16 %v10462_v62, %v8037_v9  ;;  %v9315_v62 = vld [vmem:[%s10093_s21 + $0xc8] sm:$0xf]  ;;  %v9316_v9 = vld [vmem:[%s10093_s21 + $0x158] sm:$0xf] }
 0x1ff   : > { %8625 = vmatmul.mubr.msk.bf16.gmra.mrb[28].mxu1 %vm1453_vm1, %v10604_v63  ;;  %v10892_v43 = vpop.permute.xlu0 %2846  ;;  %4781 = vperm.xlu1 %9238, %v4549_v46   ;;  %v9310_v46 = vld [vmem:[%s10093_s21 + $0xb8] sm:$0xf]  ;;  %v10956_v32 = vmul.bf16 %v9315_v62, %v10661_v16  ;;  %v4553_v38 = vmul.bf16 %v9316_v9, %v10689_v48  ;;  %v9322_v62 = vld [vmem:[%s10093_s21 + $0xdc] sm:$0xf] }
 0x200   : > { %8632 = vmatprep.mubr.msk.bf16.mxu1 %vm1453_vm1, %v2408_v49  ;;  %4769 = vperm.xlu0 %9237, %v4548_v40   ;;  %v10917_v40 = vmul.bf16 %v9308_v19, %v10616_v28  ;;  %v10921_v49 = vmul.bf16 %v9309_v17, %v10630_v57  ;;  %v10931_v42 = vmul.bf16 %v9310_v46, %v10633_v23  ;;  %v9311_v28 = vld [vmem:[%s10093_s21 + $0xbc] sm:$0xf]  ;;  %v9313_v19 = vld [vmem:[%s10093_s21 + $0xc0] sm:$0xf] }
 0x201   : > { %v10935_v37 = vmul.bf16 %v9311_v28, %v10645_v7  ;;  %v8038_v57 = vcombine.low %v2003_v12, %v2015_v25  ;;  %v4552_v23 = vmul.bf16 %v9312_v51, %v10686_v41  ;;  %v10948_v7 = vmul.bf16 %v9313_v19, %v10648_v58  ;;  %v9314_v25 = vld [vmem:[%s10093_s21 + $0xc4] sm:$0xf]  ;;  %12339 = vst [vmem:[#allocation84_spill] sm:$0xff] %v10956_v32  ;;  %v9317_v58 = vld [vmem:[%s10093_s21 + $0xcc] sm:$0xf]  ;;  %v9265_v16 = vld [vmem:[#allocation8 + $0x38] sm:$0xff]  }
 0x202   : > { %v10925_v60 = vpop.permute.xlu1 %2882  ;;  %v10952_v12 = vmul.bf16 %v9314_v25, %v10658_v50  ;;  %v8039_v17 = vcombine.low %v2027_v5, %v2039_v20  ;;  %v10964_v46 = vmul.bf16 %v9317_v58, %v10672_v22  ;;  %v2410_v50 = vsel %vm2405_vm3, %v10868_v31, %v2409_v3  ;;  %v9321_v25 = vld [vmem:[%s10093_s21 + $0x15c] sm:$0xf]  ;;  %v9325_v58 = vld [vmem:[%s10093_s21 + $0x164] sm:$0xf] }
 0x203   : > { %v10937_v21 = vpop.permute.xlu0 %2870  ;;  %4805 = vperm.xlu1 %9238, %v4551_v45   ;;  %v2371_v51 = vmul.bf16 %v10476_v30, %v8038_v57  ;;  %v9318_v45 = vld [vmem:[%s10093_s21 + $0xd0] sm:$0xf]  ;;  %v2412_v31 = vsel %vm2405_vm3, %v2409_v3, %v10927_v36  ;;  %v2413_v5 = vrot.slane %v2370_v33, 4  ;;  %v9320_v57 = vld [vmem:[%s10093_s21 + $0xd8] sm:$0xf]  ;;  %v10993_v9 = vmul.bf16 %v9322_v62, %v10702_v10 }
 0x204   : > { %4793 = vperm.xlu0 %9237, %v4550_v56   ;;  %12338 = vst [vmem:[#allocation83_spill] sm:$0xff] %v10952_v12  ;;  %v2051_v56 = vrot.slane %v10679_v13, %v10396_v44  ;;  %12340 = vst [vmem:[#allocation85_spill] sm:$0xff] %v10964_v46  ;;  %v10973_v19 = vmul.bf16 %v9318_v45, %v10675_v26  ;;  %v9319_v13 = vld [vmem:[%s10093_s21 + $0xd4] sm:$0xf]  ;;  %v10986_v26 = vmul.bf16 %v9320_v57, %v10689_v48  ;;  %v9323_v3 = vld [vmem:[%s10093_s21 + $0x160] sm:$0xf] }
 0x205   : > { %v10977_v20 = vmul.bf16 %v9319_v13, %v10686_v41  ;;  %v4554_v41 = vmul.bf16 %v9321_v25, %v10702_v10  ;;  %12344 = vst [vmem:[#allocation89_spill] sm:$0xff] %v10993_v9  ;;  %v4555_v33 = vmul.bf16 %v9323_v3, %v10705_v59  ;;  %v9326_v10 = vld [vmem:[%s10093_s21 + $0xe4] sm:$0xf]  ;;  %v9327_v13 = vld [vmem:[%s10093_s21 + $0x168] sm:$0xf] }
 0x206   : > { %v10968_v28 = vpop.permute.xlu1 %2906  ;;  %12341 = vst [vmem:[#allocation86_spill] sm:$0xff] %v10973_v19  ;;  %v8040_v30 = vcombine.low %v2051_v56, %v2063_v54  ;;  %12343 = vst [vmem:[#allocation88_spill] sm:$0xff] %v10986_v26  ;;  %v9324_v54 = vld [vmem:[%s10093_s21 + $0xe0] sm:$0xf]  ;;  %v2372_v56 = vmul.bf16 %v10493_v47, %v8039_v17  ;;  %v9328_v62 = vld [vmem:[%s10093_s21 + $0x16c] sm:$0xf] }
 0x207   : > { %12342 = vst [vmem:[#allocation87_spill] sm:$0xff] %v10977_v20  ;;  %8633 = vmatmul.mubr.msk.bf16.vlgmr.msra.gmra.mrb[0].mxu1 %vm1453_vm1, %v2410_v50  ;;  %v10980_v22 = vpop.permute.xlu0 %2894  ;;  %v10999_v48 = vmul.bf16 %v9324_v54, %v10705_v59  ;;  %4829 = vperm.xlu1 %9238, %v4553_v38   ;;  %v2415_v59 = vrot.slane %v2371_v51, 4  ;;  %v12349_v38 = vld [vmem:[#allocation62_spill] sm:$0xff]  ;;  %v4558_v47 = vmul.bf16 %v9328_v62, %v10737_v14  ;;  %v12351_v14 = vld [vmem:[#allocation57_spill] sm:$0xff] }
 0x208   : > { %8636 = vmatprep.mubr.msk.bf16.mxu1 %vm1453_vm1, %v2412_v31  ;;  %4817 = vperm.xlu0 %9237, %v4552_v23   ;;  %v12346_v23 = vld [vmem:[#allocation63_spill] sm:$0xff]  ;;  %v12348_v31 = vld [vmem:[#allocation64_spill] sm:$0xff]  ;;  %v9329_v17 = vld [vmem:[%s10093_s21 + $0x170] sm:$0xf]  ;;  %v2075_v62 = vrot.slane %v12351_v14, %v10396_v44 }
 0x209   : > { %12345 = vst [vmem:[#allocation90_spill] sm:$0xff] %v10999_v48  ;;  %8665 = vmatpush3.bf16.msra.mxu1 %v10714_v18  ;;  %v4556_v50 = vmul.bf16 %v9325_v58, %v12346_v23  ;;  %v11007_v45 = vmul.bf16 %v9326_v10, %v12346_v23  ;;  %v4557_v57 = vmul.bf16 %v9327_v13, %v12348_v31  ;;  %v12350_v23 = vld [vmem:[#allocation66_spill] sm:$0xff]  ;;  %v12358_v9 = vld [vmem:[#allocation81_spill] sm:$0xff] }
 0x20a   : > { %v11011_v25 = vpop.permute.xlu1 %2930  ;;  %8666 = vmatprep.subr.bf16.mxu1 %v9265_v16  ;;  %v2087_v18 = vrot.slane %v12349_v38, %v10396_v44  ;;  %v4559_v3 = vmul.bf16 %v9329_v17, %v10769_v2  ;;  %v2373_v58 = vmul.bf16 %v10505_v35, %v8040_v30  ;;  %v2111_v10 = vrot.slane %v12350_v23, %v10396_v44  ;;  %v11025_v13 = vld [vmem:[%s10093_s21 + $0x174] sm:$0xf]  ;;  %v12352_v17 = vld [vmem:[#allocation59_spill] sm:$0xff] }
 0x20b   : > { %12347 = vst [vmem:[#allocation63_spill] sm:$0xff] %v11007_v45  ;;  %v11019_v54 = vpop.permute.xlu0 %2918  ;;  %v2414_v38 = vsel %vm2405_vm3, %v10927_v36, %v2413_v5  ;;  %v2747_v2 = vrot.slane %v10810_v39, %v10396_v44  ;;  %v2735_v35 = vrot.slane %v10812_v52, %v10396_v44  ;;  %4853 = vperm.xlu1 %9238, %v4555_v33   ;;  %v2417_v30 = vrot.slane %v2372_v56, 4  ;;  %v12353_v39 = vld [vmem:[#allocation68_spill] sm:$0xff]  ;;  %v12354_v52 = vld [vmem:[#allocation70_spill] sm:$0xff] }
 0x20c   : > { %4841 = vperm.xlu0 %9237, %v4554_v41   ;;  %v2099_v23 = vrot.slane %v12352_v17, %v10396_v44  ;;  %v2771_v41 = vrot.slane %v10818_v55, %v10396_v44  ;;  %v2759_v36 = vrot.slane %v10820_v8, %v10396_v44  ;;  %v8041_v14 = vcombine.low %v2075_v62, %v2087_v18  ;;  %v12355_v8 = vld [vmem:[#allocation65_spill] sm:$0xff]  ;;  %v12356_v62 = vld [vmem:[#allocation67_spill] sm:$0xff]  ;;  %v12360_v20 = vld [vmem:[#allocation78_spill] sm:$0xff] }
 0x20d   : > { %8667 = vmatpush3.bf16.msra.mxu1 %v9265_v16  ;;  %v2135_v45 = vrot.slane %v12353_v39, %v10396_v44  ;;  %v2159_v16 = vrot.slane %v12354_v52, %v10396_v44  ;;  %v2416_v55 = vsel %vm2405_vm3, %v2413_v5, %v2415_v59  ;;  %v11053_v56 = vrot.slane %v2373_v58, 4  ;;  %v12357_v52 = vld [vmem:[#allocation72_spill] sm:$0xff]  ;;  %v9331_v58 = vld [vmem:[%s10093_s21 + $0x178] sm:$0xf] }
 0x20e   : > { %v11043_v51 = vpop.permute.xlu1 %2954  ;;  %v2123_v17 = vrot.slane %v12355_v8, %v10396_v44  ;;  %v8042_v18 = vcombine.low %v2099_v23, %v2111_v10  ;;  %v2147_v39 = vrot.slane %v12356_v62, %v10396_v44  ;;  %v8068_v48 = vcombine.low %v2735_v35, %v2747_v2  ;;  %v12359_v8 = vld [vmem:[#allocation75_spill] sm:$0xff] }
 0x20f   : > { %8637 = vmatmul.mubr.msk.bf16.gmra.mrb[4].mxu1 %vm1453_vm1, %v2414_v38  ;;  %v11050_v33 = vpop.permute.xlu0 %2942  ;;  %v2183_v38 = vrot.slane %v12357_v52, %v10396_v44  ;;  %v2795_v26 = vrot.slane %v12358_v9, %v10396_v44  ;;  %v2783_v5 = vrot.slane %v10838_v61, %v10396_v44  ;;  %4877 = vperm.xlu1 %9238, %v4557_v57   ;;  %v9332_v23 = vld [vmem:[%s10093_s21 + $0x17c] sm:$0xf]  ;;  %v12361_v52 = vld [vmem:[#allocation61_spill] sm:$0xff]  ;;  %v12363_v57 = vld [vmem:[#allocation44_spill] sm:$0xff] }
 0x210   : > { %8640 = vmatprep.mubr.msk.bf16.mxu1 %vm1453_vm1, %v2416_v55  ;;  %4865 = vperm.xlu0 %9237, %v4556_v50   ;;  %v4561_v10 = vmul.bf16 %v9331_v58, %v12359_v8  ;;  %v4562_v62 = vmul.bf16 %v9332_v23, %v12360_v20  ;;  %v8069_v19 = vcombine.low %v2759_v36, %v2771_v41  ;;  %v12362_v9 = vld [vmem:[#allocation69_spill] sm:$0xff]  ;;  %v12364_v58 = vld [vmem:[#allocation71_spill] sm:$0xff]  ;;  %v12365_v20 = vld [vmem:[#allocation74_spill] sm:$0xff] }
 0x211   : > { %v2418_v50 = vsel %vm2405_vm3, %v2415_v59, %v2417_v30  ;;  %v2374_v2 = vmul.bf16 %v12361_v52, %v8041_v14  ;;  %v8043_v35 = vcombine.low %v2123_v17, %v2135_v45  ;;  %v2171_v46 = vrot.slane %v12362_v9, %v10396_v44 }
 0x212   : > { %v11070_v55 = vpop.permute.xlu1 %2978  ;;  %v8044_v32 = vcombine.low %v2147_v39, %v2159_v16  ;;  %v2375_v12 = vmul.bf16 %v12363_v57, %v8042_v18  ;;  %v2195_v8 = vrot.slane %v12364_v58, %v10396_v44  ;;  %v2207_v41 = vrot.slane %v12365_v20, %v10396_v44  ;;  %v12367_v58 = vld [vmem:[#allocation49_spill] sm:$0xff] }
 0x213   : > { %v11076_v61 = vpop.permute.xlu0 %2966  ;;  %v2420_v59 = vsel %vm2405_vm3, %v2417_v30, %v11053_v56  ;;  %v8045_v36 = vcombine.low %v2171_v46, %v2183_v38  ;;  %v3190_v45 = vshrl.u32 %v8068_v48, 16  ;;  %v3193_v14 = vshll.u32 %v8068_v48, 16  ;;  %4901 = vperm.xlu1 %9238, %v4559_v3   ;;  %v12368_v46 = vld [vmem:[#allocation77_spill] sm:$0xff] }
 0x214   : > { %4889 = vperm.xlu0 %9237, %v4558_v47   ;;  %v8070_v17 = vcombine.low %v2783_v5, %v2795_v26  ;;  %v3198_v16 = vshrl.u32 %v8069_v19, 16  ;;  %v3201_v39 = vshll.u32 %v8069_v19, 16  ;;  %v2819_v18 = vrot.slane %v10846_v11, %v10396_v44  ;;  %v12366_v47 = vld [vmem:[#allocation45_spill] sm:$0xff] }
 0x215   : > { %v2807_v23 = vrot.slane %v10853_v0, %v10396_v44  ;;  %v2421_v9 = vrot.slane %v2374_v2, 4  ;;  %v2376_v57 = vmul.bf16 %v12366_v47, %v8043_v35  ;;  %v2377_v30 = vmul.bf16 %v12367_v58, %v8044_v32  ;;  %v12370_v11 = vld [vmem:[#allocation73_spill] sm:$0xff]  ;;  %v12371_v0 = vld [vmem:[#allocation80_spill] sm:$0xff]  ;;  %v12373_v47 = vld [vmem:[#allocation47_spill] sm:$0xff] }
 0x216   : > { %v11089_v52 = vpop.permute.xlu1 %3002  ;;  %v2231_v48 = vrot.slane %v12368_v46, %v10396_v44  ;;  %v2423_v19 = vrot.slane %v2375_v12, 4  ;;  %v2219_v3 = vrot.slane %v12370_v11, %v10396_v44  ;;  %v8046_v38 = vcombine.low %v2195_v8, %v2207_v41  ;;  %v12374_v41 = vld [vmem:[#allocation76_spill] sm:$0xff] }
 0x217   : > { %8641 = vmatmul.mubr.msk.bf16.gmra.mrb[8].mxu1 %vm1453_vm1, %v2418_v50  ;;  %v11096_v26 = vpop.permute.xlu0 %2990  ;;  %v2255_v5 = vrot.slane %v12371_v0, %v10396_v44  ;;  %v12372_v32 = vmul.bf16 %v11025_v13, %v10779_v1  ;;  %v3192_v2 = vrot.slane %v3190_v45, 3  ;;  %v3195_v35 = vrot.slane %v3193_v14, 4  ;;  %4925 = vperm.xlu1 %9238, %v4561_v10   ;;  %v12376_v14 = vld [vmem:[#allocation52_spill] sm:$0xff] }
 0x218   : > { %12369 = vst [vmem:[#allocation64_spill] sm:$0xff] %v11096_v26  ;;  %8644 = vmatprep.mubr.msk.bf16.mxu1 %vm1453_vm1, %v2420_v59  ;;  %v3207_v20 = vshrl.u32 %v8070_v17, 16  ;;  %v3210_v50 = vshll.u32 %v8070_v17, 16  ;;  %v2378_v12 = vmul.bf16 %v12373_v47, %v8045_v36  ;;  %v3200_v58 = vrot.slane %v3198_v16, 3 }
 0x219   : > { %4913 = vperm.xlu0 %9237, %v12372_v32   ;;  %v3203_v46 = vrot.slane %v3201_v39, 4  ;;  %v8071_v11 = vcombine.low %v2807_v23, %v2819_v18  ;;  %v2243_v0 = vrot.slane %v12374_v41, %v10396_v44  ;;  %v8047_v26 = vcombine.low %v2219_v3, %v2231_v48  ;;  %v12377_v23 = vld [vmem:[#allocation46_spill] sm:$0xff] }
 0x21a   : > { %v3780_v8 = vpop.permute.xlu1 %3779  ;;  %v2422_v1 = vsel %vm2405_vm3, %v11053_v56, %v2421_v9  ;;  %v2425_v13 = vrot.slane %v2376_v57, 4  ;;  %v2427_v45 = vrot.slane %v2377_v30, 4  ;;  %v2379_v10 = vmul.bf16 %v12376_v14, %v8046_v38  ;;  %v12378_v57 = vld [vmem:[#allocation79_spill] sm:$0xff] }
 0x21b   : > { %v11109_v59 = vpop.permute.xlu0 %3014  ;;  %v2424_v36 = vsel %vm2405_vm3, %v2421_v9, %v2423_v19  ;;  %v8048_v17 = vcombine.low %v2243_v0, %v2255_v5  ;;  %v3196_v16 = vor.u32 %v3195_v35, %v3192_v2  ;;  %v3209_v39 = vrot.slane %v3207_v20, 3  ;;  %5612 = vperm.xlu1 %9238, %v12377_v23  }
 0x21c   : > { %12375 = vst [vmem:[#allocation62_spill] sm:$0xff] %v11109_v59  ;;  %v3212_v18 = vrot.slane %v3210_v50, 4  ;;  %v2429_v48 = vrot.slane %v2378_v12, 4  ;;  %v3204_v3 = vor.u32 %v3203_v46, %v3200_v58  ;;  %v3216_v32 = vshrl.u32 %v8071_v11, 16  ;;  %v12380_v12 = vld [vmem:[#allocation50_spill] sm:$0xff]  ;;  %v12386_v59 = vld [vmem:[#allocation55_spill] sm:$0xff] }
 0x21d   : > { %4937 = vperm.xlu0 %9237, %v4562_v62   ;;  %v3219_v47 = vshll.u32 %v8071_v11, 16  ;;  %v2380_v56 = vmul.bf16 %v10588_v27, %v8047_v26  ;;  %v2267_v30 = vrot.slane %v12378_v57, %v10396_v44  ;;  %v2843_v62 = vrot.slane %v10866_v29, %v10396_v44  ;;  %v12379_v27 = vld [vmem:[#allocation48_spill] sm:$0xff]  ;;  %v12382_v57 = vld [vmem:[#allocation54_spill] sm:$0xff] }
 0x21e   : > { %v3804_v41 = vpop.permute.xlu1 %3803  ;;  %v2831_v9 = vrot.slane %v10870_v34, %v10396_v44  ;;  %v2431_v5 = vrot.slane %v2379_v10, 4  ;;  %v3788_v2 = vrot.slane %v3780_v8, %v10396_v44  ;;  %v2426_v26 = vsel %vm2405_vm3, %v2423_v19, %v2425_v13  ;;  %v9333_v29 = vld [vmem:[%s10078_s10] sm:$0xff]  }
 0x21f   : > { %8645 = vmatmul.mubr.msk.bf16.gmra.mrb[12].mxu1 %vm1453_vm1, %v2422_v1  ;;  %v3792_v38 = vpop.permute.xlu0 %3791  ;;  %v2381_v20 = vmul.bf16 %v10604_v63, %v8048_v17  ;;  %v11131_v50 = vmul.bf16 %v9333_v29, %v3196_v16  ;;  %v3213_v34 = vor.u32 %v3212_v18, %v3209_v39  ;;  %5636 = vperm.xlu1 %9238, %v12380_v12   ;;  %v3218_v11 = vrot.slane %v3216_v32, 3  ;;  %v12381_v18 = vld [vmem:[#allocation53_spill] sm:$0xff] }
 0x220   : > { %v3800_v35 = vrot.slane %v3792_v38, %v10396_v44  ;;  %8648 = vmatprep.mubr.msk.bf16.mxu1 %vm1453_vm1, %v2424_v36  ;;  %v2428_v58 = vsel %vm2405_vm3, %v2425_v13, %v2427_v45  ;;  %v3205_v46 = vsel %vm3188_vm4, %v3196_v16, %v3204_v3  ;;  %v3221_v8 = vrot.slane %v3219_v47, 4  ;;  %v11143_v13 = vld [vmem:[%s10078_s10 + $0x20] sm:$0xff]  }
 0x221   : > { %5624 = vperm.xlu0 %9237, %v12379_v27   ;;  %v2433_v14 = vrot.slane %v2380_v56, 4  ;;  %v8049_v19 = vcombine.low %v2267_v30, %v2267_v30  ;;  %v8072_v10 = vcombine.low %v2831_v9, %v2843_v62  ;;  %v11137_v36 = vsel %vm2405_vm3, %v2427_v45, %v2429_v48  ;;  %v9335_v45 = vld [vmem:[%s10078_s10 + $0x8] sm:$0xff]  }
 0x222   : > { %v3828_v0 = vpop.permute.xlu1 %3827  ;;  %v8102_v1 = vcombine.low %v3788_v2, %v3800_v35  ;;  %v3812_v17 = vrot.slane %v3804_v41, %v10396_v44  ;;  %v11147_v32 = vsel %vm2405_vm3, %v2429_v48, %v2431_v5  ;;  %v11149_v47 = vrot.slane %v2381_v20, 4  ;;  %v12383_v2 = vld [vmem:[#allocation51_spill] sm:$0xff] }
 0x223   : > { %v3816_v63 = vpop.permute.xlu0 %3815  ;;  %v3214_v56 = vsel %vm3188_vm4, %v3204_v3, %v3213_v34  ;;  %5660 = vperm.xlu1 %9238, %v12382_v57   ;;  %v11154_v41 = vmul.bf16 %v9335_v45, %v3205_v46  ;;  %v3373_v30 = vshrl.u32 %v11131_v50, 16  ;;  %v11157_v62 = vor.u32 %v3221_v8, %v3218_v11  ;;  %v11222_v57 = vld [vmem:[%s10078_s10 + $0x38] sm:$0xff]  }
 0x224   : > { %v3824_v39 = vrot.slane %v3816_v63, %v10396_v44  ;;  %v4257_v16 = vmul.bf16 %v11143_v13, %v8102_v1  ;;  %v2867_v9 = vrot.slane %v10881_v53, %v10396_v44  ;;  %v2855_v48 = vrot.slane %v10892_v43, %v10396_v44  ;;  %v11172_v53 = vld [vmem:[%s10078_s10 + $0x28] sm:$0xff]   ;;  %v9269_v63 = vld [vmem:[#allocation8 + $0x58] sm:$0xff]  }
 0x225   : > { %5648 = vperm.xlu0 %9237, %v12381_v18   ;;  %v11165_v35 = vmul.bf16 %v12383_v2, %v8049_v19  ;;  %v3225_v20 = vshrl.u32 %v8072_v10, 16  ;;  %v3228_v29 = vshll.u32 %v8072_v10, 16  ;;  %v11169_v11 = vsel %vm2405_vm3, %v2431_v5, %v2433_v14  ;;  %v12384_v19 = vld [vmem:[#allocation56_spill] sm:$0xff] }
 0x226   : > { %v8103_v38 = vcombine.low %v3812_v17, %v3824_v39  ;;  %8704 = vmatprep.mubr.msk.bf16.mxu0 %vm1453_vm1, %v4257_v16  ;;  %v3852_v3 = vpop.permute.xlu1 %3851  ;;  %v3836_v8 = vrot.slane %v3828_v0, %v10396_v44  ;;  %v3376_v10 = vshll.u32 %v11131_v50, 16  ;;  %v12385_v39 = vld [vmem:[#allocation58_spill] sm:$0xff]  ;;  %v11184_v5 = vsel %vm2405_vm3, %v2433_v14, %v11149_v47 }
 0x227   : > { %8649 = vmatmul.mubr.msk.bf16.gmra.mrb[16].mxu1 %vm1453_vm1, %v2426_v26  ;;  %v3840_v46 = vpop.permute.xlu0 %3839  ;;  %v9337_v26 = vld [vmem:[%s10078_s10 + $0x10] sm:$0xff]   ;;  %5684 = vperm.xlu1 %9238, %v12385_v39   ;;  %v11186_v16 = vrot.slane %v3373_v30, 4  ;;  %v3381_v0 = vshrl.u32 %v11154_v41, 16  ;;  %v8073_v45 = vcombine.low %v2855_v48, %v2867_v9  ;;  %v3227_v2 = vrot.slane %v3225_v20, 3  ;;  %v12387_v48 = vld [vmem:[#allocation60_spill] sm:$0xff] }
 0x228   : > { %v4258_v43 = vmul.bf16 %v11172_v53, %v8103_v38  ;;  %v3848_v1 = vrot.slane %v3840_v46, %v10396_v44  ;;  %8652 = vmatprep.mubr.msk.bf16.mxu1 %vm1453_vm1, %v2428_v58  ;;  %v3351_v17 = vmul.bf16 %v9337_v26, %v3214_v56  ;;  %v3223_v58 = vsel %vm3188_vm4, %v3213_v34, %v11157_v62  ;;  %v11199_v39 = vld [vmem:[%s10078_s10 + $0x30] sm:$0xff]  }
 0x229   : > { %5672 = vperm.xlu0 %9237, %v12384_v19   ;;  %v3384_v56 = vshll.u32 %v11154_v41, 16  ;;  %v3230_v46 = vrot.slane %v3228_v29, 4  ;;  %v2891_v14 = vrot.slane %v10925_v60, %v10396_v44  ;;  %v2879_v30 = vrot.slane %v10937_v21, %v10396_v44 }
 0x22a   : > { %v8104_v38 = vcombine.low %v3836_v8, %v3848_v1  ;;  %8705 = vmatmul.mubr.msk.bf16.vlgmr.msra.gmra.mrb[0].mxu0 %vm1453_vm1, %v4258_v43  ;;  %v3876_v50 = vpop.permute.xlu1 %3875  ;;  %v3860_v9 = vrot.slane %v3852_v3, %v10396_v44  ;;  %v11205_v20 = vrot.slane %v3376_v10, 5  ;;  %v2915_v60 = vrot.slane %v10968_v28, %v10396_v44  ;;  %v11212_v43 = vld [vmem:[#allocation8 + $0x60] sm:$0xff]   ;;  %v9339_v10 = vld [vmem:[%s10078_s10 + $0x18] sm:$0xff]  }
 0x22b   : > { %v3864_v26 = vpop.permute.xlu0 %3863  ;;  %8737 = vmatpush3.bf16.msra.mxu0 %v12386_v59  ;;  %v2903_v21 = vrot.slane %v10980_v22, %v10396_v44  ;;  %5708 = vperm.xlu1 %9238, %v10885_v4   ;;  %v3390_v59 = vshrl.u32 %v3351_v17, 16  ;;  %v3393_v29 = vshll.u32 %v3351_v17, 16  ;;  %v3234_v3 = vshrl.u32 %v8073_v45, 16 }
 0x22c   : > { %v4259_v34 = vmul.bf16 %v11199_v39, %v8104_v38  ;;  %v3872_v41 = vrot.slane %v3864_v26, %v10396_v44  ;;  %8738 = vmatprep.subr.bf16.mxu0 %v9269_v63  ;;  %v3237_v8 = vshll.u32 %v8073_v45, 16  ;;  %v3352_v38 = vmul.bf16 %v9339_v10, %v3223_v58 }
 0x22d   : > { %5696 = vperm.xlu0 %9237, %v12387_v48   ;;  %v11216_v26 = vor.u32 %v3230_v46, %v3227_v2  ;;  %v8074_v28 = vcombine.low %v2879_v30, %v2891_v14  ;;  %v3383_v4 = vrot.slane %v3381_v0, 4  ;;  %v3386_v17 = vrot.slane %v3384_v56, 5 }
 0x22e   : > { %v8105_v1 = vcombine.low %v3860_v9, %v3872_v41  ;;  %8708 = vmatprep.mubr.msk.bf16.mxu0 %vm1453_vm1, %v4259_v34  ;;  %v3900_v48 = vpop.permute.xlu1 %3899  ;;  %v2437_v19 = vrot.slane %v11165_v35, 4  ;;  %v3884_v34 = vrot.slane %v3876_v50, %v10396_v44  ;;  %v3392_v0 = vrot.slane %v3390_v59, 4 }
 0x22f   : > { %8653 = vmatmul.mubr.msk.bf16.gmra.mrb[20].mxu1 %vm1453_vm1, %v11137_v36  ;;  %v3888_v22 = vpop.permute.xlu0 %3887  ;;  %8739 = vmatpush3.bf16.msra.mxu0 %v9269_v63  ;;  %v8075_v36 = vcombine.low %v2903_v21, %v2915_v60  ;;  %v3379_v63 = vor.u32 %v11205_v20, %v11186_v16  ;;  %v3395_v56 = vrot.slane %v3393_v29, 5  ;;  %v3236_v50 = vrot.slane %v3234_v3, 3  ;;  %v11239_v21 = vld [vmem:[%s10078_s10 + $0x40] sm:$0xff]  }
 0x230   : > { %v4260_v45 = vmul.bf16 %v11222_v57, %v8105_v1  ;;  %v3896_v58 = vrot.slane %v3888_v22, %v10396_v44  ;;  %8656 = vmatprep.mubr.msk.bf16.mxu1 %vm1453_vm1, %v11147_v32  ;;  %5732 = vperm.xlu1 %9238, %v10905_v6   ;;  %v3239_v2 = vrot.slane %v3237_v8, 4  ;;  %v3399_v32 = vshrl.u32 %v3352_v38, 16 }
 0x231   : > { %5720 = vperm.xlu0 %9237, %v10898_v24   ;;  %8772 = vmatprep.subr.bf16.mxu0 %v11212_v43  ;;  %v3232_v14 = vsel %vm3188_vm4, %v11157_v62, %v11216_v26  ;;  %v3243_v30 = vshrl.u32 %v8074_v28, 16  ;;  %v3387_v60 = vor.u32 %v3386_v17, %v3383_v4  ;;  %v3402_v16 = vshll.u32 %v3352_v38, 16 }
 0x232   : > { %v8106_v46 = vcombine.low %v3884_v34, %v3896_v58  ;;  %8709 = vmatmul.mubr.msk.bf16.gmra.mrb[4].mxu0 %vm1453_vm1, %v4260_v45  ;;  %v3924_v41 = vpop.permute.xlu1 %3923  ;;  %v3246_v20 = vshll.u32 %v8074_v28, 16  ;;  %v3908_v29 = vrot.slane %v3900_v48, %v10396_v44  ;;  %v3252_v8 = vshrl.u32 %v8075_v36, 16 }
 0x233   : > { %v3912_v9 = vpop.permute.xlu0 %3911  ;;  %v3255_v1 = vshll.u32 %v8075_v36, 16  ;;  %v2939_v62 = vrot.slane %v11011_v25, %v10396_v44  ;;  %v2927_v4 = vrot.slane %v11019_v54, %v10396_v44  ;;  %v11250_v10 = vor.u32 %v3239_v2, %v3236_v50  ;;  %v11265_v36 = vld [vmem:[%s10078_s10 + $0x48] sm:$0xff]  }
 0x234   : > { %v4261_v59 = vmul.bf16 %v11239_v21, %v8106_v46  ;;  %v3920_v3 = vrot.slane %v3912_v9, %v10396_v44  ;;  %5756 = vperm.xlu1 %9238, %v10917_v40   ;;  %v11253_v48 = vor.u32 %v3395_v56, %v3392_v0  ;;  %v3401_v28 = vrot.slane %v3399_v32, 4  ;;  %v11275_v46 = vld [vmem:[%s10093_s21 + $0xe8] sm:$0xf] }
 0x235   : > { %5744 = vperm.xlu0 %9237, %v10909_v15   ;;  %v2963_v22 = vrot.slane %v11043_v51, %v10396_v44  ;;  %v2951_v25 = vrot.slane %v11050_v33, %v10396_v44  ;;  %v3404_v45 = vrot.slane %v3402_v16, 5  ;;  %v11262_v34 = vmul.bf16 %v11143_v13, %v3232_v14 }
 0x236   : > { %v8107_v38 = vcombine.low %v3908_v29, %v3920_v3  ;;  %8712 = vmatprep.mubr.msk.bf16.mxu0 %vm1453_vm1, %v4261_v59  ;;  %v3948_v17 = vpop.permute.xlu1 %3947  ;;  %v3245_v58 = vrot.slane %v3243_v30, 3  ;;  %v3932_v51 = vrot.slane %v3924_v41, %v10396_v44  ;;  %v3248_v33 = vrot.slane %v3246_v20, 4 }
 0x237   : > { %8657 = vmatmul.mubr.msk.bf16.gmra.mrb[24].mxu1 %vm1453_vm1, %v11169_v11  ;;  %v3936_v54 = vpop.permute.xlu0 %3935  ;;  %v3254_v11 = vrot.slane %v3252_v8, 3  ;;  %v3257_v50 = vrot.slane %v3255_v1, 4  ;;  %v8076_v2 = vcombine.low %v2927_v4, %v2939_v62  ;;  %v11279_v32 = vmul.bf16 %v11275_v46, %v12348_v31 }
 0x238   : > { %v4262_v0 = vmul.bf16 %v11265_v36, %v8107_v38  ;;  %v3944_v56 = vrot.slane %v3936_v54, %v10396_v44  ;;  %8660 = vmatprep.mubr.msk.bf16.mxu1 %vm1453_vm1, %v11184_v5  ;;  %5780 = vperm.xlu1 %9238, %v10931_v42   ;;  %v3241_v14 = vsel %vm3188_vm4, %v11216_v26, %v11250_v10  ;;  %v11297_v26 = vld [vmem:[%s10078_s10 + $0x50] sm:$0xff]   ;;  %v12388_v54 = vld [vmem:[#allocation64_spill] sm:$0xff] }
 0x239   : > { %5768 = vperm.xlu0 %9237, %v10921_v49   ;;  %v2438_v30 = vsel %vm2405_vm3, %v11149_v47, %v2437_v19  ;;  %v8077_v9 = vcombine.low %v2951_v25, %v2963_v22  ;;  %v3388_v20 = vsel %vm3371_vm5, %v3379_v63, %v3387_v60  ;;  %v11292_v31 = vsel %vm3371_vm5, %v3387_v60, %v11253_v48 }
 0x23a   : > { %v8108_v5 = vcombine.low %v3932_v51, %v3944_v56  ;;  %8713 = vmatmul.mubr.msk.bf16.gmra.mrb[8].mxu0 %vm1453_vm1, %v4262_v0  ;;  %v3972_v16 = vpop.permute.xlu1 %3971  ;;  %v11294_v59 = vor.u32 %v3404_v45, %v3401_v28  ;;  %v3956_v35 = vrot.slane %v3948_v17, %v10396_v44  ;;  %v3408_v47 = vshrl.u32 %v11262_v34, 16  ;;  %v11319_v0 = vld [vmem:[%s10078_s10 + $0x58] sm:$0xff]  }
 0x23b   : > { %v3960_v41 = vpop.permute.xlu0 %3959  ;;  %v3249_v19 = vor.u32 %v3248_v33, %v3245_v58  ;;  %v11304_v63 = vor.u32 %v3257_v50, %v3254_v11  ;;  %v3261_v60 = vshrl.u32 %v8076_v2, 16  ;;  %v3354_v8 = vmul.bf16 %v11172_v53, %v3241_v14  ;;  %v12389_v56 = vld [vmem:[#allocation83_spill] sm:$0xff]  ;;  %v12390_v11 = vld [vmem:[#allocation84_spill] sm:$0xff] }
 0x23c   : > { %v4263_v29 = vmul.bf16 %v11297_v26, %v8108_v5  ;;  %v3968_v3 = vrot.slane %v3960_v41, %v10396_v44  ;;  %5804 = vperm.xlu1 %9238, %v10948_v7   ;;  %v3264_v1 = vshll.u32 %v8076_v2, 16  ;;  %v2987_v62 = vrot.slane %v11070_v55, %v10396_v44 }
 0x23d   : > { %5792 = vperm.xlu0 %9237, %v10935_v37   ;;  %v2975_v4 = vrot.slane %v11076_v61, %v10396_v44  ;;  %v3270_v28 = vshrl.u32 %v8077_v9, 16  ;;  %v3273_v22 = vshll.u32 %v8077_v9, 16  ;;  %v3011_v25 = vrot.slane %v11089_v52, %v10396_v44 }
 0x23e   : > { %v8109_v38 = vcombine.low %v3956_v35, %v3968_v3  ;;  %8716 = vmatprep.mubr.msk.bf16.mxu0 %vm1453_vm1, %v4263_v29  ;;  %v2999_v17 = vrot.slane %v12388_v54, %v10396_v44  ;;  %v3996_v58 = vpop.permute.xlu1 %3995  ;;  %v3980_v61 = vrot.slane %v3972_v16, %v10396_v44  ;;  %v3411_v52 = vshll.u32 %v11262_v34, 16 }
 0x23f   : > { %8661 = vmatmul.mubr.msk.bf16.gmra.mrb[28].mxu1 %vm1453_vm1, %v2438_v30  ;;  %v3984_v45 = vpop.permute.xlu0 %3983  ;;  %v3250_v33 = vsel %vm3188_vm4, %v11250_v10, %v3249_v19  ;;  %v3406_v50 = vsel %vm3371_vm5, %v11253_v48, %v11294_v59  ;;  %v3417_v2 = vshrl.u32 %v3354_v8, 16  ;;  %v3420_v14 = vshll.u32 %v3354_v8, 16 }
 0x240   : > { %v4264_v55 = vmul.bf16 %v11319_v0, %v8109_v38  ;;  %v3992_v51 = vrot.slane %v3984_v45, %v10396_v44  ;;  %8668 = vmatprep.mubr.msk.bf16.mxu1 %vm1453_vm1, %v3388_v20  ;;  %5828 = vperm.xlu1 %9238, %v12390_v11   ;;  %v3263_v5 = vrot.slane %v3261_v60, 3  ;;  %v3266_v30 = vrot.slane %v3264_v1, 4  ;;  %v11337_v38 = vld [vmem:[%s10078_s10 + $0x60] sm:$0xff]   ;;  %v12391_v1 = vld [vmem:[#allocation85_spill] sm:$0xff] }
 0x241   : > { %5816 = vperm.xlu0 %9237, %v12389_v56   ;;  %v8078_v9 = vcombine.low %v2975_v4, %v2987_v62  ;;  %v3272_v16 = vrot.slane %v3270_v28, 3  ;;  %v3275_v34 = vrot.slane %v3273_v22, 4  ;;  %v8079_v20 = vcombine.low %v2999_v17, %v3011_v25  ;;  %v12392_v62 = vld [vmem:[#allocation86_spill] sm:$0xff] }
 0x242   : > { %v8110_v41 = vcombine.low %v3980_v61, %v3992_v51  ;;  %8717 = vmatmul.mubr.msk.bf16.gmra.mrb[12].mxu0 %vm1453_vm1, %v4264_v55  ;;  %v4020_v10 = vpop.permute.xlu1 %4019  ;;  %v3410_v35 = vrot.slane %v3408_v47, 4  ;;  %v3259_v3 = vsel %vm3188_vm4, %v3249_v19, %v11304_v63  ;;  %v4004_v60 = vrot.slane %v3996_v58, %v10396_v44 }
 0x243   : > { %v4008_v29 = vpop.permute.xlu0 %4007  ;;  %v3413_v4 = vrot.slane %v3411_v52, 5  ;;  %v3419_v28 = vrot.slane %v3417_v2, 4  ;;  %v3422_v22 = vrot.slane %v3420_v14, 5  ;;  %v3355_v47 = vmul.bf16 %v11199_v39, %v3250_v33  ;;  %v11352_v2 = vld [vmem:[%s10078_s10 + $0x68] sm:$0xff]  }
 0x244   : > { %v4265_v48 = vmul.bf16 %v11337_v38, %v8110_v41  ;;  %v4016_v8 = vrot.slane %v4008_v29, %v10396_v44  ;;  %5852 = vperm.xlu1 %9238, %v12392_v62   ;;  %v3267_v25 = vor.u32 %v3266_v30, %v3263_v5  ;;  %v3279_v19 = vshrl.u32 %v8078_v9, 16  ;;  %v12393_v30 = vld [vmem:[#allocation87_spill] sm:$0xff] }
 0x245   : > { %5840 = vperm.xlu0 %9237, %v12391_v1   ;;  %v3282_v54 = vshll.u32 %v8078_v9, 16  ;;  %v11346_v45 = vor.u32 %v3275_v34, %v3272_v16  ;;  %v3288_v58 = vshrl.u32 %v8079_v20, 16  ;;  %v3291_v55 = vshll.u32 %v8079_v20, 16  ;;  %v12394_v9 = vld [vmem:[#allocation88_spill] sm:$0xff] }
 0x246   : > { %v8111_v17 = vcombine.low %v4004_v60, %v4016_v8  ;;  %8720 = vmatprep.mubr.msk.bf16.mxu0 %vm1453_vm1, %v4265_v48  ;;  %v4044_v51 = vpop.permute.xlu1 %4043  ;;  %v3356_v52 = vmul.bf16 %v11222_v57, %v3259_v3  ;;  %v4028_v14 = vrot.slane %v4020_v10, %v10396_v44  ;;  %v3414_v41 = vor.u32 %v3413_v4, %v3410_v35 }
 0x247   : > { %8669 = vmatmul.mubr.msk.bf16.vlgmr.msra.gmra.mrb[0].mxu1 %vm1453_vm1, %v11292_v31  ;;  %v4032_v61 = vpop.permute.xlu0 %4031  ;;  %v11360_v31 = vor.u32 %v3422_v22, %v3419_v28  ;;  %v3426_v16 = vshrl.u32 %v3355_v47, 16  ;;  %v3429_v34 = vshll.u32 %v3355_v47, 16  ;;  %v3268_v20 = vsel %vm3188_vm4, %v11304_v63, %v3267_v25  ;;  %v11368_v22 = vld [vmem:[%s10078_s10 + $0x70] sm:$0xff]  }
 0x248   : > { %v4266_v33 = vmul.bf16 %v11352_v2, %v8111_v17  ;;  %v4040_v5 = vrot.slane %v4032_v61, %v10396_v44  ;;  %8672 = vmatprep.mubr.msk.bf16.mxu1 %vm1453_vm1, %v3406_v50  ;;  %5876 = vperm.xlu1 %9238, %v12394_v9   ;;  %v3281_v29 = vrot.slane %v3279_v19, 3  ;;  %v3284_v10 = vrot.slane %v3282_v54, 4  ;;  %12395 = vst [vmem:[#allocation66_spill] sm:$0xff] %v11368_v22  ;;  %v12396_v54 = vld [vmem:[#allocation89_spill] sm:$0xff]  ;;  %v12397_v61 = vld [vmem:[#allocation90_spill] sm:$0xff] }
 0x249   : > { %5864 = vperm.xlu0 %9237, %v12393_v30   ;;  %v3290_v50 = vrot.slane %v3288_v58, 3  ;;  %v3293_v48 = vrot.slane %v3291_v55, 4  ;;  %v3435_v35 = vshrl.u32 %v3356_v52, 16  ;;  %v3438_v4 = vshll.u32 %v3356_v52, 16  ;;  %v11375_v17 = vld [vmem:[%s10093_s21 + $0xec] sm:$0xf] }
 0x24a   : > { %v8112_v3 = vcombine.low %v4028_v14, %v4040_v5  ;;  %8721 = vmatmul.mubr.msk.bf16.gmra.mrb[16].mxu0 %vm1453_vm1, %v4266_v33  ;;  %v4068_v8 = vpop.permute.xlu1 %4067  ;;  %v3277_v28 = vsel %vm3188_vm4, %v3267_v25, %v11346_v45  ;;  %v4052_v47 = vrot.slane %v4044_v51, %v10396_v44  ;;  %v9350_v58 = vld [vmem:[%s10093_s21 + $0x6c] sm:$0xf]  ;;  %v3415_v25 = vsel %vm3371_vm5, %v11294_v59, %v3414_v41 }
 0x24b   : > { %v4056_v60 = vpop.permute.xlu0 %4055  ;;  %v11379_v55 = vmul.bf16 %v9350_v58, %v11375_v17  ;;  %v3428_v52 = vrot.slane %v3426_v16, 4  ;;  %v3431_v33 = vrot.slane %v3429_v34, 5  ;;  %v3285_v14 = vor.u32 %v3284_v10, %v3281_v29  ;;  %v11393_v29 = vld [vmem:[%s10078_s10 + $0x78] sm:$0xff]  }
 0x24c   : > { %v4267_v63 = vmul.bf16 %v11368_v22, %v8112_v3  ;;  %v4064_v19 = vrot.slane %v4056_v60, %v10396_v44  ;;  %5900 = vperm.xlu1 %9238, %v12397_v61   ;;  %v3424_v5 = vsel %vm3371_vm5, %v3414_v41, %v11360_v31  ;;  %v3357_v3 = vmul.bf16 %v11239_v21, %v3268_v20  ;;  %v12400_v20 = vld [vmem:[#allocation63_spill] sm:$0xff] }
 0x24d   : > { %5888 = vperm.xlu0 %9237, %v12396_v54   ;;  %v11388_v60 = vor.u32 %v3293_v48, %v3290_v50  ;;  %v3437_v59 = vrot.slane %v3435_v35, 4  ;;  %v3440_v16 = vrot.slane %v3438_v4, 5  ;;  %v3358_v34 = vmul.bf16 %v11265_v36, %v3277_v28  ;;  %12399 = vst [vmem:[#allocation59_spill] sm:$0xff] %v11393_v29  ;;  %v11401_v50 = vld [vmem:[%s10093_s21 + $0xf0] sm:$0xf] }
 0x24e   : > { %v8113_v51 = vcombine.low %v4052_v47, %v4064_v19  ;;  %8724 = vmatprep.mubr.msk.bf16.mxu0 %vm1453_vm1, %v4267_v63  ;;  %v4092_v22 = vpop.permute.xlu1 %4091  ;;  %v4076_v63 = vrot.slane %v4068_v8, %v10396_v44  ;;  %12401 = vst [vmem:[#allocation68_spill] sm:$0xff] %v11401_v50  ;;  %v9353_v48 = vld [vmem:[%s10093_s21 + $0x70] sm:$0xf]  ;;  %v3432_v4 = vor.u32 %v3431_v33, %v3428_v52  ;;  %v3444_v47 = vshrl.u32 %v3357_v3, 16 }
 0x24f   : > { %12398 = vst [vmem:[#allocation57_spill] sm:$0xff] %v11388_v60  ;;  %8673 = vmatmul.mubr.msk.bf16.gmra.mrb[4].mxu1 %vm1453_vm1, %v3415_v25  ;;  %v4080_v58 = vpop.permute.xlu0 %4079  ;;  %v11405_v35 = vmul.bf16 %v9353_v48, %v11401_v50  ;;  %v3286_v8 = vsel %vm3188_vm4, %v11346_v45, %v3285_v14  ;;  %v3447_v19 = vshll.u32 %v3357_v3, 16  ;;  %v3295_v48 = vsel %vm3188_vm4, %v3285_v14, %v11388_v60  ;;  %v11414_v50 = vld [vmem:[%s10086_s15] sm:$0xff]   ;;  %v11419_v45 = vld [vmem:[%s10086_s15 + $0x8] sm:$0xff]  }
 0x250   : > { %v4268_v10 = vmul.bf16 %v11393_v29, %v8113_v51  ;;  %v4088_v41 = vrot.slane %v4080_v58, %v10396_v44  ;;  %8676 = vmatprep.mubr.msk.bf16.mxu1 %vm1453_vm1, %v3424_v5  ;;  %5924 = vperm.xlu1 %9238, %v11279_v32   ;;  %v3441_v5 = vor.u32 %v3440_v16, %v3437_v59  ;;  %v3453_v58 = vshrl.u32 %v3358_v34, 16 }
 0x251   : > { %5912 = vperm.xlu0 %9237, %v12400_v20   ;;  %v3456_v29 = vshll.u32 %v3358_v34, 16  ;;  %12402 = vst [vmem:[#allocation70_spill] sm:$0xff] %v11414_v50  ;;  %v4100_v33 = vrot.slane %v4092_v22, %v10396_v44  ;;  %12403 = vst [vmem:[#allocation65_spill] sm:$0xff] %v11419_v45  ;;  %v3359_v3 = vmul.bf16 %v11297_v26, %v3286_v8  ;;  %v3446_v16 = vrot.slane %v3444_v47, 4  ;;  %v12404_v47 = vld [vmem:[#allocation37_spill] sm:$0xff] }
 0x252   : > { %v8114_v28 = vcombine.low %v4076_v63, %v4088_v41  ;;  %8725 = vmatmul.mubr.msk.bf16.gmra.mrb[20].mxu0 %vm1453_vm1, %v4268_v10  ;;  %v4566_v51 = vpop.permute.xlu1 %4565  ;;  %v3433_v14 = vsel %vm3371_vm5, %v11360_v31, %v3432_v4  ;;  %v3449_v34 = vrot.slane %v3447_v19, 5  ;;  %v3442_v41 = vsel %vm3371_vm5, %v3432_v4, %v3441_v5 }
 0x253   : > { %v4104_v25 = vpop.permute.xlu0 %4103  ;;  %v3360_v60 = vmul.bf16 %v11319_v0, %v3295_v48  ;;  %v12405_v19 = vmul.bf16 %v12404_v47, %v12377_v23  ;;  %v3462_v4 = vshrl.u32 %v3359_v3, 16 }
 0x254   : > { %v4269_v52 = vmul.bf16 %v11414_v50, %v8114_v28  ;;  %v4112_v10 = vrot.slane %v4104_v25, %v10396_v44  ;;  %5948 = vperm.xlu1 %9238, %v11405_v35   ;;  %v3455_v28 = vrot.slane %v3453_v58, 4  ;;  %v3458_v25 = vrot.slane %v3456_v29, 5 }
 0x255   : > { %5936 = vperm.xlu0 %9237, %v11379_v55   ;;  %v3465_v29 = vshll.u32 %v3359_v3, 16  ;;  %v3450_v48 = vor.u32 %v3449_v34, %v3446_v16  ;;  %v12410_v3 = vld [vmem:[#allocation38_spill] sm:$0xff]  ;;  %v3464_v16 = vrot.slane %v3462_v4, 4 }
 0x256   : > { %v8115_v59 = vcombine.low %v4100_v33, %v4112_v10  ;;  %8728 = vmatprep.mubr.msk.bf16.mxu0 %vm1453_vm1, %v4269_v52  ;;  %v4590_v63 = vpop.permute.xlu1 %4589  ;;  %v4574_v33 = vrot.slane %v4566_v51, %v10396_v44  ;;  %v12406_v52 = vld [vmem:[#allocation39_spill] sm:$0xff] }
 0x257   : > { %8677 = vmatmul.mubr.msk.bf16.gmra.mrb[8].mxu1 %vm1453_vm1, %v3433_v14  ;;  %v4578_v22 = vpop.permute.xlu0 %4577  ;;  %v12407_v10 = vmul.bf16 %v12406_v52, %v12379_v27  ;;  %v3459_v14 = vor.u32 %v3458_v25, %v3455_v28  ;;  %v4598_v23 = vrot.slane %v4590_v63, %v10396_v44  ;;  %v12408_v27 = vld [vmem:[#allocation36_spill] sm:$0xff]  ;;  %v3467_v34 = vrot.slane %v3465_v29, 5  ;;  %v11452_v25 = vld [vmem:[%s10093_s21 + $0xf4] sm:$0xf] }
 0x258   : > { %v4270_v8 = vmul.bf16 %v11419_v45, %v8115_v59  ;;  %v4586_v31 = vrot.slane %v4578_v22, %v10396_v44  ;;  %8680 = vmatprep.mubr.msk.bf16.mxu1 %vm1453_vm1, %v3442_v41  ;;  %v3471_v22 = vshrl.u32 %v3360_v60, 16  ;;  %v3474_v41 = vshll.u32 %v3360_v60, 16  ;;  %v9356_v63 = vld [vmem:[%s10093_s21 + $0x74] sm:$0xf] }
 0x259   : > { %6451 = vperm.xlu0 %9237, %v12405_v19   ;;  %6463 = vperm.xlu1 %9238, %v12407_v10   ;;  %v12409_v19 = vmul.bf16 %v12408_v27, %v12380_v12  ;;  %v3451_v60 = vsel %vm3371_vm5, %v3441_v5, %v3450_v48  ;;  %v11456_v52 = vmul.bf16 %v9356_v63, %v11452_v25 }
 0x25a   : > { %v8136_v58 = vcombine.low %v4574_v33, %v4586_v31  ;;  %8729 = vmatmul.mubr.msk.bf16.gmra.mrb[24].mxu0 %vm1453_vm1, %v4270_v8  ;;  %v4614_v51 = vpop.permute.xlu1 %4613  ;;  %v12411_v8 = vmul.bf16 %v12410_v3, %v12381_v18  ;;  %v3460_v10 = vsel %vm3371_vm5, %v3450_v48, %v3459_v14  ;;  %v3473_v4 = vrot.slane %v3471_v22, 4  ;;  %v9358_v3 = vld [vmem:[%s10093_s21 + $0x78] sm:$0xf]  ;;  %v12416_v22 = vld [vmem:[#allocation40_spill] sm:$0xff] }
 0x25b   : > { %v4602_v59 = vpop.permute.xlu0 %4601  ;;  %v4622_v5 = vrot.slane %v4614_v51, %v10396_v44  ;;  %v3468_v51 = vor.u32 %v3467_v34, %v3464_v16  ;;  %v11486_v16 = vld [vmem:[%s10093_s21 + $0xfc] sm:$0xf] }
 0x25c   : > { %v5028_v45 = vshrl.u32 %v8136_v58, 16  ;;  %v4610_v47 = vrot.slane %v4602_v59, %v10396_v44  ;;  %v5031_v31 = vshll.u32 %v8136_v58, 16 }
 0x25d   : > { %6475 = vperm.xlu0 %9237, %v12409_v19   ;;  %6487 = vperm.xlu1 %9238, %v12411_v8   ;;  %v11467_v19 = vld [vmem:[%s10093_s21 + $0xf8] sm:$0xf] }
 0x25e   : > { %v5030_v33 = vrot.slane %v5028_v45, 7  ;;  %v8137_v28 = vcombine.low %v4598_v23, %v4610_v47  ;;  %v4116_v18 = vpop.permute.xlu1 %4115  ;;  %v3476_v45 = vrot.slane %v3474_v41, 5  ;;  %v12412_v23 = vld [vmem:[#allocation41_spill] sm:$0xff]  ;;  %v12413_v47 = vld [vmem:[#allocation54_spill] sm:$0xff]  ;;  %12415 = vst [vmem:[#allocation67_spill] sm:$0xff] %v11467_v19  ;;  %v11471_v48 = vmul.bf16 %v9358_v3, %v11467_v19  ;;  %v12417_v41 = vld [vmem:[#allocation56_spill] sm:$0xff] }
 0x25f   : > { %8681 = vmatmul.mubr.msk.bf16.gmra.mrb[12].mxu1 %vm1453_vm1, %v3451_v60  ;;  %v4626_v12 = vpop.permute.xlu0 %4625  ;;  %v12414_v27 = vmul.bf16 %v12412_v23, %v12413_v47  ;;  %v12418_v8 = vmul.bf16 %v12416_v22, %v12417_v41  ;;  %v4124_v3 = vrot.slane %v4116_v18, %v10396_v44  ;;  %v11481_v19 = vld [vmem:[%s10086_s15 + $0x10] sm:$0xff]  }
 0x260   : > { %v5033_v29 = vor.u32 %v5031_v31, %v5030_v33  ;;  %v5035_v58 = vshrl.u32 %v8137_v28, 16  ;;  %v4634_v59 = vrot.slane %v4626_v12, %v10396_v44  ;;  %8684 = vmatprep.mubr.msk.bf16.mxu1 %vm1453_vm1, %v3460_v10  ;;  %v5038_v63 = vshll.u32 %v8137_v28, 16 }
 0x261   : > { %6499 = vperm.xlu0 %9237, %v12414_v27   ;;  %6511 = vperm.xlu1 %9238, %v12418_v8   ;;  %v11477_v47 = vor.u32 %v3476_v45, %v3473_v4  ;;  %v3469_v28 = vsel %vm3371_vm5, %v3459_v14, %v3468_v51 }
 0x262   : > { %v5171_v31 = vmul.bf16 %v11143_v13, %v5033_v29  ;;  %v5037_v60 = vrot.slane %v5035_v58, 7  ;;  %v8138_v12 = vcombine.low %v4622_v5, %v4634_v59  ;;  %v4140_v23 = vpop.permute.xlu1 %4139  ;;  %v9360_v13 = vld [vmem:[%s10093_s21 + $0x7c] sm:$0xf] }
 0x263   : > { %v4128_v10 = vpop.permute.xlu0 %4127  ;;  %v11490_v34 = vmul.bf16 %v9360_v13, %v11486_v16  ;;  %v3478_v41 = vsel %vm3371_vm5, %v3468_v51, %v11477_v47  ;;  %v12420_v51 = vld [vmem:[#allocation43_spill] sm:$0xff] }
 0x264   : > { %v5040_v27 = vor.u32 %v5038_v63, %v5037_v60  ;;  %v5043_v50 = vshrl.u32 %v8138_v12, 16  ;;  %v4136_v22 = vrot.slane %v4128_v10, %v10396_v44  ;;  %v5196_v4 = vshll.u32 %v5171_v31, 16 }
 0x265   : > { %5960 = vperm.xlu0 %9237, %v11456_v52   ;;  %5972 = vperm.xlu1 %9238, %v11471_v48   ;;  %v5046_v18 = vshll.u32 %v8138_v12, 16  ;;  %v4148_v10 = vrot.slane %v4140_v23, %v10396_v44  ;;  %v11505_v12 = vld [vmem:[%s10086_s15 + $0x18] sm:$0xff]  }
 0x266   : > { %v11494_v45 = vrot.slane %v5043_v50, 7  ;;  %v8116_v29 = vcombine.low %v4124_v3, %v4136_v22  ;;  %v5041_v58 = vsel %vm1141_vm0, %v5030_v33, %v5040_v27  ;;  %v4638_v59 = vpop.permute.xlu1 %4637  ;;  %v5198_v63 = vrot.slane %v5196_v4, 1  ;;  %v9361_v27 = vld [vmem:[%s10093_s21 + $0x120] sm:$0xf]  ;;  %v12419_v3 = vld [vmem:[#allocation82_spill] sm:$0xff] }
 0x267   : > { %8685 = vmatmul.mubr.msk.bf16.gmra.mrb[16].mxu1 %vm1453_vm1, %v3469_v28  ;;  %v4152_v5 = vpop.permute.xlu0 %4151  ;;  %v5172_v8 = vmul.bf16 %v11172_v53, %v5041_v58  ;;  %v6425_v22 = vmul.bf16 %v9361_v27, %v12419_v3  ;;  %v12421_v53 = vld [vmem:[#allocation58_spill] sm:$0xff]  ;;  %v5194_v28 = vshrl.u32 %v5171_v31, 16 }
 0x268   : > { %v5048_v14 = vor.u32 %v5046_v18, %v11494_v45  ;;  %v4271_v50 = vmul.bf16 %v11481_v19, %v8116_v29  ;;  %v4160_v33 = vrot.slane %v4152_v5, %v10396_v44  ;;  %8688 = vmatprep.mubr.msk.bf16.mxu1 %vm1453_vm1, %v3478_v41  ;;  %v12422_v13 = vmul.bf16 %v12420_v51, %v12421_v53  ;;  %v12423_v53 = vld [vmem:[#allocation42_spill] sm:$0xff] }
 0x269   : > { %5984 = vperm.xlu0 %9237, %v11490_v34   ;;  %v5201_v4 = vshll.u32 %v5172_v8, 16  ;;  %v5199_v41 = vor.u32 %v5198_v63, %v5194_v28  ;;  %v4646_v51 = vrot.slane %v4638_v59, %v10396_v44 }
 0x26a   : > { %6523 = vperm.xlu1 %9238, %v12422_v13   ;;  %v5049_v23 = vsel %vm1141_vm0, %v5037_v60, %v5048_v14  ;;  %v8117_v18 = vcombine.low %v4148_v10, %v4160_v33  ;;  %8732 = vmatprep.mubr.msk.bf16.mxu0 %vm1453_vm1, %v4271_v50  ;;  %v4662_v5 = vpop.permute.xlu1 %4661  ;;  %v12424_v13 = vld [vmem:[#allocation60_spill] sm:$0xff] }
 0x26b   : > { %v11518_v29 = vmul.bf16 %v11199_v39, %v5049_v23  ;;  %v4650_v58 = vpop.permute.xlu0 %4649  ;;  %v5203_v27 = vrot.slane %v5201_v4, 1  ;;  %v12425_v60 = vmul.bf16 %v12423_v53, %v12424_v13  ;;  %v9362_v50 = vld [vmem:[%s10093_s21 + $0x124] sm:$0xf]  ;;  %v9363_v10 = vld [vmem:[%s10093_s21 + $0x128] sm:$0xf]  ;;  %v4670_v23 = vrot.slane %v4662_v5, %v10396_v44 }
 0x26c   : > { %v4272_v3 = vmul.bf16 %v11505_v12, %v8117_v18  ;;  %v4658_v31 = vrot.slane %v4650_v58, %v10396_v44  ;;  %v6426_v39 = vmul.bf16 %v9362_v50, %v10898_v24  ;;  %v6427_v63 = vmul.bf16 %v9363_v10, %v10905_v6  ;;  %v9364_v24 = vld [vmem:[%s10093_s21 + $0x12c] sm:$0xf] }
 0x26d   : > { %6535 = vperm.xlu0 %9237, %v12425_v60   ;;  %v5204_v14 = vsel %vm1308_vm2, %v5199_v41, %v5203_v27  ;;  %v5209_v33 = vshll.u32 %v11518_v29, 16  ;;  %v5205_v58 = vshrl.u32 %v5172_v8, 16  ;;  %v6428_v6 = vmul.bf16 %v9364_v24, %v10909_v15  ;;  %v9365_v41 = vld [vmem:[%s10093_s21 + $0x130] sm:$0xf] }
 0x26e   : > { %6547 = vperm.xlu1 %9238, %v6425_v22   ;;  %v8139_v59 = vcombine.low %v4646_v51, %v4658_v31  ;;  %8733 = vmatmul.mubr.msk.bf16.gmra.mrb[28].mxu0 %vm1453_vm1, %v4272_v3  ;;  %v4686_v4 = vpop.permute.xlu1 %4685  ;;  %v6429_v51 = vmul.bf16 %v9365_v41, %v10917_v40  ;;  %v9366_v40 = vld [vmem:[%s10093_s21 + $0x134] sm:$0xf] }
 0x26f   : > { %v4674_v28 = vpop.permute.xlu0 %4673  ;;  %8740 = vmatprep.mubr.msk.bf16.mxu0 %vm1453_vm1, %v5204_v14  ;;  %v5211_v3 = vrot.slane %v5209_v33, 1  ;;  %v5207_v60 = vor.u32 %v5205_v58, %v5203_v27  ;;  %v4694_v8 = vrot.slane %v4686_v4, %v10396_v44  ;;  %v6430_v33 = vmul.bf16 %v9366_v40, %v10921_v49 }
 0x270   : > { %v5051_v22 = vshrl.u32 %v8139_v59, 16  ;;  %v4682_v18 = vrot.slane %v4674_v28, %v10396_v44  ;;  %v5054_v53 = vshll.u32 %v8139_v59, 16  ;;  %v9367_v28 = vld [vmem:[%s10093_s21 + $0x138] sm:$0xf] }
 0x271   : > { %6559 = vperm.xlu0 %9237, %v6426_v39   ;;  %v5212_v15 = vsel %vm1308_vm2, %v5207_v60, %v5211_v3  ;;  %v6431_v59 = vmul.bf16 %v9367_v28, %v10931_v42 }
 0x272   : > { %6571 = vperm.xlu1 %9238, %v6427_v63   ;;  %v5053_v31 = vrot.slane %v5051_v22, 7  ;;  %v8140_v13 = vcombine.low %v4670_v23, %v4682_v18  ;;  %v4710_v5 = vpop.permute.xlu1 %4709  ;;  %v9272_v63 = vld [vmem:[#allocation8 + $0x68] sm:$0xff]  }
 0x273   : > { %v4698_v14 = vpop.permute.xlu0 %4697  ;;  %v4718_v42 = vrot.slane %v4710_v5, %v10396_v44 }
 0x274   : > { %v5056_v50 = vor.u32 %v5054_v53, %v5053_v31  ;;  %v5059_v10 = vshrl.u32 %v8140_v13, 16  ;;  %v4706_v39 = vrot.slane %v4698_v14, %v10396_v44  ;;  %v5062_v23 = vshll.u32 %v8140_v13, 16  ;;  %v9369_v13 = vld [vmem:[%s10093_s21 + $0x140] sm:$0xf] }
 0x275   : > { %6583 = vperm.xlu0 %9237, %v6428_v6  }
 0x276   : > { %6595 = vperm.xlu1 %9238, %v6429_v51   ;;  %v5057_v27 = vsel %vm1141_vm0, %v11494_v45, %v5056_v50  ;;  %v5061_v22 = vrot.slane %v5059_v10, 7  ;;  %v8141_v4 = vcombine.low %v4694_v8, %v4706_v39  ;;  %8741 = vmatmul.mubr.msk.bf16.vlgmr.msra.gmra.mrb[0].mxu0 %vm1453_vm1, %v5212_v15  ;;  %v4734_v58 = vpop.permute.xlu1 %4733  ;;  %v11554_v45 = vld [vmem:[#allocation8 + $0x70] sm:$0xff]   ;;  %v9368_v51 = vld [vmem:[%s10093_s21 + $0x13c] sm:$0xf] }
 0x277   : > { %v4722_v18 = vpop.permute.xlu0 %4721  ;;  %v5174_v24 = vmul.bf16 %v11222_v57, %v5057_v27  ;;  %8773 = vmatpush3.bf16.msra.mxu0 %v11212_v43  ;;  %v6432_v53 = vmul.bf16 %v9368_v51, %v10935_v37  ;;  %v6433_v57 = vmul.bf16 %v9369_v13, %v10948_v7  ;;  %v5213_v43 = vshrl.u32 %v11518_v29, 16  ;;  %v9371_v27 = vld [vmem:[%s10093_s21 + $0x148] sm:$0xf] }
 0x278   : > { %v5064_v49 = vor.u32 %v5062_v23, %v5061_v22  ;;  %v5067_v6 = vshrl.u32 %v8141_v4, 16  ;;  %v4730_v41 = vrot.slane %v4722_v18, %v10396_v44  ;;  %8774 = vmatprep.subr.bf16.mxu0 %v9272_v63  ;;  %v5070_v50 = vshll.u32 %v8141_v4, 16 }
 0x279   : > { %6607 = vperm.xlu0 %9237, %v6430_v33   ;;  %v5217_v60 = vshll.u32 %v5174_v24, 16  ;;  %v5215_v15 = vor.u32 %v5213_v43, %v5211_v3  ;;  %v9370_v33 = vld [vmem:[%s10093_s21 + $0x144] sm:$0xf]  ;;  %v4742_v29 = vrot.slane %v4734_v58, %v10396_v44  ;;  %v6435_v23 = vmul.bf16 %v9371_v27, %v12390_v11  ;;  %v9375_v27 = vld [vmem:[%s10093_s21 + $0x158] sm:$0xf] }
 0x27a   : > { %6619 = vperm.xlu1 %9238, %v6431_v59   ;;  %v5065_v14 = vsel %vm1141_vm0, %v5053_v31, %v5064_v49  ;;  %v5069_v5 = vrot.slane %v5067_v6, 7  ;;  %v8142_v10 = vcombine.low %v4718_v42, %v4730_v41  ;;  %v4758_v39 = vpop.permute.xlu1 %4757  ;;  %v6434_v28 = vmul.bf16 %v9370_v33, %v12389_v56  ;;  %v9372_v41 = vld [vmem:[%s10093_s21 + $0x14c] sm:$0xf] }
 0x27b   : > { %v4746_v8 = vpop.permute.xlu0 %4745  ;;  %v5219_v40 = vrot.slane %v5217_v60, 1  ;;  %v5175_v37 = vmul.bf16 %v11239_v21, %v5065_v14  ;;  %8775 = vmatpush3.bf16.msra.mxu0 %v9272_v63  ;;  %v5221_v56 = vshrl.u32 %v5174_v24, 16  ;;  %v6436_v51 = vmul.bf16 %v9372_v41, %v12391_v1  ;;  %v9373_v60 = vld [vmem:[%s10093_s21 + $0x150] sm:$0xf] }
 0x27c   : > { %v5072_v7 = vor.u32 %v5070_v50, %v5069_v5  ;;  %v5075_v59 = vshrl.u32 %v8142_v10, 16  ;;  %v4754_v31 = vrot.slane %v4746_v8, %v10396_v44  ;;  %8808 = vmatprep.subr.bf16.mxu0 %v11554_v45  ;;  %v5078_v18 = vshll.u32 %v8142_v10, 16 }
 0x27d   : > { %6631 = vperm.xlu0 %9237, %v6432_v53   ;;  %v5220_v3 = vsel %vm1308_vm2, %v5215_v15, %v5219_v40  ;;  %v5225_v4 = vshll.u32 %v5175_v37, 16  ;;  %v5223_v6 = vor.u32 %v5221_v56, %v5219_v40  ;;  %v4766_v24 = vrot.slane %v4758_v39, %v10396_v44 }
 0x27e   : > { %6643 = vperm.xlu1 %9238, %v6433_v57   ;;  %v5073_v21 = vsel %vm1141_vm0, %v5061_v22, %v5072_v7  ;;  %v5077_v63 = vrot.slane %v5075_v59, 7  ;;  %v8143_v49 = vcombine.low %v4742_v29, %v4754_v31  ;;  %8744 = vmatprep.mubr.msk.bf16.mxu0 %vm1453_vm1, %v5220_v3  ;;  %v4782_v57 = vpop.permute.xlu1 %4781  ;;  %v6437_v14 = vmul.bf16 %v9373_v60, %v12392_v62 }
 0x27f   : > { %v4770_v58 = vpop.permute.xlu0 %4769  ;;  %v5227_v42 = vrot.slane %v5225_v4, 1  ;;  %v5176_v53 = vmul.bf16 %v11265_v36, %v5073_v21  ;;  %v5229_v50 = vshrl.u32 %v5175_v37, 16  ;;  %v4790_v37 = vrot.slane %v4782_v57, %v10396_v44  ;;  %v9378_v57 = vld [vmem:[%s10093_s21 + $0x15c] sm:$0xf] }
 0x280   : > { %v5080_v13 = vor.u32 %v5078_v18, %v5077_v63  ;;  %v5083_v11 = vshrl.u32 %v8143_v49, 16  ;;  %v4778_v22 = vrot.slane %v4770_v58, %v10396_v44  ;;  %v5086_v8 = vshll.u32 %v8143_v49, 16  ;;  %v9376_v49 = vld [vmem:[%s10093_s21 + $0x164] sm:$0xf] }
 0x281   : > { %6655 = vperm.xlu0 %9237, %v6434_v28   ;;  %v5228_v43 = vsel %vm1308_vm2, %v5223_v6, %v5227_v42  ;;  %v5233_v10 = vshll.u32 %v5176_v53, 16  ;;  %v5231_v40 = vor.u32 %v5229_v50, %v5227_v42  ;;  %v9374_v28 = vld [vmem:[%s10093_s21 + $0x154] sm:$0xf]  ;;  %v5237_v56 = vshrl.u32 %v5176_v53, 16  ;;  %v9377_v58 = vld [vmem:[%s10093_s21 + $0xe4] sm:$0xf] }
 0x282   : > { %6667 = vperm.xlu1 %9238, %v6435_v23   ;;  %v5081_v1 = vsel %vm1141_vm0, %v5069_v5, %v5080_v13  ;;  %v5085_v36 = vrot.slane %v5083_v11, 7  ;;  %v8144_v15 = vcombine.low %v4766_v24, %v4778_v22  ;;  %8745 = vmatmul.mubr.msk.bf16.gmra.mrb[4].mxu0 %vm1453_vm1, %v5228_v43  ;;  %v6438_v7 = vmul.bf16 %v9374_v28, %v12393_v30  ;;  %v4806_v31 = vpop.permute.xlu1 %4805 }
 0x283   : > { %v4794_v39 = vpop.permute.xlu0 %4793  ;;  %v5235_v33 = vrot.slane %v5233_v10, 1  ;;  %v5177_v59 = vmul.bf16 %v11297_v26, %v5081_v1  ;;  %v6439_v23 = vmul.bf16 %v9375_v27, %v12394_v9  ;;  %v2717_v6 = vmul.bf16 %v9377_v58, %v9376_v49 }
 0x284   : > { %v5088_v29 = vor.u32 %v5086_v8, %v5085_v36  ;;  %v5091_v62 = vshrl.u32 %v8144_v15, 16  ;;  %v4802_v5 = vrot.slane %v4794_v39, %v10396_v44  ;;  %v5094_v21 = vshll.u32 %v8144_v15, 16 }
 0x285   : > { %6679 = vperm.xlu0 %9237, %v6436_v51   ;;  %v5236_v3 = vsel %vm1308_vm2, %v5231_v40, %v5235_v33  ;;  %v5241_v30 = vshll.u32 %v5177_v59, 16  ;;  %v5239_v41 = vor.u32 %v5237_v56, %v5235_v33  ;;  %v4814_v53 = vrot.slane %v4806_v31, %v10396_v44  ;;  %v9379_v40 = vld [vmem:[%s10093_s21 + $0x160] sm:$0xf] }
 0x286   : > { %6691 = vperm.xlu1 %9238, %v6437_v14   ;;  %v5089_v26 = vsel %vm1141_vm0, %v5077_v63, %v5088_v29  ;;  %v5093_v4 = vrot.slane %v5091_v62, 7  ;;  %v8145_v18 = vcombine.low %v4790_v37, %v4802_v5  ;;  %8748 = vmatprep.mubr.msk.bf16.mxu0 %vm1453_vm1, %v5236_v3  ;;  %v4830_v24 = vpop.permute.xlu1 %4829  ;;  %v6440_v43 = vmul.bf16 %v9378_v57, %v12396_v54 }
 0x287   : > { %v4818_v42 = vpop.permute.xlu0 %4817  ;;  %v5243_v51 = vrot.slane %v5241_v30, 1  ;;  %v5178_v13 = vmul.bf16 %v11319_v0, %v5089_v26  ;;  %v5245_v60 = vshrl.u32 %v5177_v59, 16  ;;  %v6441_v33 = vmul.bf16 %v9379_v40, %v12397_v61 }
 0x288   : > { %v5096_v11 = vor.u32 %v5094_v21, %v5093_v4  ;;  %v5099_v9 = vshrl.u32 %v8145_v18, 16  ;;  %v4826_v63 = vrot.slane %v4818_v42, %v10396_v44  ;;  %v5102_v10 = vshll.u32 %v8145_v18, 16  ;;  %v9381_v42 = vld [vmem:[%s10093_s21 + $0x168] sm:$0xf] }
 0x289   : > { %6703 = vperm.xlu0 %9237, %v6438_v7   ;;  %v5244_v22 = vsel %vm1308_vm2, %v5239_v41, %v5243_v51  ;;  %v5249_v14 = vshll.u32 %v5178_v13, 16  ;;  %v5247_v15 = vor.u32 %v5245_v60, %v5243_v51  ;;  %v4838_v59 = vrot.slane %v4830_v24, %v10396_v44 }
 0x28a   : > { %6715 = vperm.xlu1 %9238, %v6439_v23   ;;  %v5097_v50 = vsel %vm1141_vm0, %v5085_v36, %v5096_v11  ;;  %v5101_v0 = vrot.slane %v5099_v9, 7  ;;  %v8146_v1 = vcombine.low %v4814_v53, %v4826_v63  ;;  %8749 = vmatmul.mubr.msk.bf16.gmra.mrb[8].mxu0 %vm1453_vm1, %v5244_v22  ;;  %v4854_v29 = vpop.permute.xlu1 %4853  ;;  %v6442_v37 = vmul.bf16 %v9376_v49, %v12400_v20  ;;  %v9380_v23 = vld [vmem:[%s10093_s21 + $0x16c] sm:$0xf] }
 0x28b   : > { %v4842_v8 = vpop.permute.xlu0 %4841  ;;  %v5251_v39 = vrot.slane %v5249_v14, 1  ;;  %v5179_v28 = vmul.bf16 %v11337_v38, %v5097_v50  ;;  %v5253_v5 = vshrl.u32 %v5178_v13, 16  ;;  %v2719_v56 = vmul.bf16 %v9380_v23, %v11375_v17 }
 0x28c   : > { %v5104_v7 = vor.u32 %v5102_v10, %v5101_v0  ;;  %v5107_v54 = vshrl.u32 %v8146_v1, 16  ;;  %v4850_v36 = vrot.slane %v4842_v8, %v10396_v44  ;;  %v5110_v3 = vshll.u32 %v8146_v1, 16 }
 0x28d   : > { %6727 = vperm.xlu0 %9237, %v6440_v43   ;;  %v5252_v62 = vsel %vm1308_vm2, %v5247_v15, %v5251_v39  ;;  %v5257_v31 = vshll.u32 %v5179_v28, 16  ;;  %v5255_v26 = vor.u32 %v5253_v5, %v5251_v39  ;;  %v4862_v49 = vrot.slane %v4854_v29, %v10396_v44  ;;  %v12426_v43 = vld [vmem:[#allocation66_spill] sm:$0xff] }
 0x28e   : > { %3026 = vperm.xlu1 %9238, %v2717_v6   ;;  %v5105_v61 = vsel %vm1141_vm0, %v5093_v4, %v5104_v7  ;;  %v5109_v38 = vrot.slane %v5107_v54, 7  ;;  %v8147_v27 = vcombine.low %v4838_v59, %v4850_v36  ;;  %8752 = vmatprep.mubr.msk.bf16.mxu0 %vm1453_vm1, %v5252_v62  ;;  %v4878_v6 = vpop.permute.xlu1 %4877  ;;  %v2718_v41 = vmul.bf16 %v9381_v42, %v11275_v46  ;;  %v9382_v7 = vld [vmem:[%s10093_s21 + $0x174] sm:$0xf]  ;;  %v12427_v62 = vld [vmem:[#allocation59_spill] sm:$0xff] }
 0x28f   : > { %v4866_v30 = vpop.permute.xlu0 %4865  ;;  %v5259_v21 = vrot.slane %v5257_v31, 1  ;;  %v5180_v18 = vmul.bf16 %v11352_v2, %v5105_v61  ;;  %v5261_v17 = vshrl.u32 %v5179_v28, 16  ;;  %v6443_v57 = vmul.bf16 %v9381_v42, %v11279_v32  ;;  %v12429_v42 = vld [vmem:[#allocation70_spill] sm:$0xff] }
 0x290   : > { %v5112_v58 = vor.u32 %v5110_v3, %v5109_v38  ;;  %v5115_v20 = vshrl.u32 %v8147_v27, 16  ;;  %v4874_v4 = vrot.slane %v4866_v30, %v10396_v44  ;;  %v5118_v2 = vshll.u32 %v8147_v27, 16  ;;  %v9383_v3 = vld [vmem:[%s10093_s21 + $0x170] sm:$0xf]  ;;  %v12428_v27 = vld [vmem:[#allocation68_spill] sm:$0xff] }
 0x291   : > { %6739 = vperm.xlu0 %9237, %v6441_v33   ;;  %v5260_v51 = vsel %vm1308_vm2, %v5255_v26, %v5259_v21  ;;  %v5265_v13 = vshll.u32 %v5180_v18, 16  ;;  %v5263_v24 = vor.u32 %v5261_v17, %v5259_v21  ;;  %v4886_v50 = vrot.slane %v4878_v6, %v10396_v44 }
 0x292   : > { %6751 = vperm.xlu1 %9238, %v6442_v37   ;;  %v5113_v11 = vsel %vm1141_vm0, %v5101_v0, %v5112_v58  ;;  %v5117_v9 = vrot.slane %v5115_v20, 7  ;;  %v8148_v53 = vcombine.low %v4862_v49, %v4874_v4  ;;  %8753 = vmatmul.mubr.msk.bf16.gmra.mrb[12].mxu0 %vm1453_vm1, %v5260_v51  ;;  %v4902_v0 = vpop.permute.xlu1 %4901  ;;  %v6444_v8 = vmul.bf16 %v9380_v23, %v11379_v55 }
 0x293   : > { %v4890_v63 = vpop.permute.xlu0 %4889  ;;  %v5267_v22 = vrot.slane %v5265_v13, 1  ;;  %v5181_v46 = vmul.bf16 %v12426_v43, %v5113_v11  ;;  %v5269_v15 = vshrl.u32 %v5180_v18, 16  ;;  %v2721_v54 = vmul.bf16 %v9382_v7, %v11452_v25 }
 0x294   : > { %v5120_v60 = vor.u32 %v5118_v2, %v5117_v9  ;;  %v5123_v14 = vshrl.u32 %v8148_v53, 16  ;;  %v4898_v10 = vrot.slane %v4890_v63, %v10396_v44  ;;  %v5126_v33 = vshll.u32 %v8148_v53, 16 }
 0x295   : > { %3038 = vperm.xlu0 %9237, %v2718_v41   ;;  %v5268_v1 = vsel %vm1308_vm2, %v5263_v24, %v5267_v22  ;;  %v5273_v39 = vshll.u32 %v5181_v46, 16  ;;  %v5271_v36 = vor.u32 %v5269_v15, %v5267_v22  ;;  %v4910_v31 = vrot.slane %v4902_v0, %v10396_v44  ;;  %v9384_v0 = vld [vmem:[%s10093_s21 + $0x17c] sm:$0xf] }
 0x296   : > { %3050 = vperm.xlu1 %9238, %v2719_v56   ;;  %v5121_v32 = vsel %vm1141_vm0, %v5109_v38, %v5120_v60  ;;  %v5125_v40 = vrot.slane %v5123_v14, 7  ;;  %v8149_v28 = vcombine.low %v4886_v50, %v4898_v10  ;;  %8756 = vmatprep.mubr.msk.bf16.mxu0 %vm1453_vm1, %v5268_v1  ;;  %v4926_v38 = vpop.permute.xlu1 %4925  ;;  %v2720_v23 = vmul.bf16 %v9383_v3, %v12428_v27  ;;  %v12430_v50 = vld [vmem:[#allocation65_spill] sm:$0xff]  ;;  %v12431_v15 = vld [vmem:[#allocation67_spill] sm:$0xff] }
 0x297   : > { %v5275_v29 = vrot.slane %v5273_v39, 1  ;;  %v5182_v37 = vmul.bf16 %v12427_v62, %v5121_v32  ;;  %v5277_v25 = vshrl.u32 %v5181_v46, 16  ;;  %v6445_v6 = vmul.bf16 %v9383_v3, %v11405_v35 }
 0x298   : > { %v4914_v59 = vpop.permute.xlu0 %4913  ;;  %v5128_v5 = vor.u32 %v5126_v33, %v5125_v40  ;;  %v5131_v55 = vshrl.u32 %v8149_v28, 16  ;;  %v5134_v18 = vshll.u32 %v8149_v28, 16  ;;  %v4934_v13 = vrot.slane %v4926_v38, %v10396_v44 }
 0x299   : > { %v4922_v61 = vrot.slane %v4914_v59, %v10396_v44  ;;  %6763 = vperm.xlu0 %9237, %v6443_v57   ;;  %v5276_v56 = vsel %vm1308_vm2, %v5271_v36, %v5275_v29  ;;  %v5281_v30 = vshll.u32 %v5182_v37, 16  ;;  %v5279_v49 = vor.u32 %v5277_v25, %v5275_v29 }
 0x29a   : > { %6775 = vperm.xlu1 %9238, %v6444_v8   ;;  %v5129_v26 = vsel %vm1141_vm0, %v5117_v9, %v5128_v5  ;;  %v5133_v21 = vrot.slane %v5131_v55, 7  ;;  %8757 = vmatmul.mubr.msk.bf16.gmra.mrb[16].mxu0 %vm1453_vm1, %v5276_v56  ;;  %v5613_v2 = vpop.permute.xlu1 %5612  ;;  %v6446_v53 = vmul.bf16 %v9382_v7, %v11456_v52  ;;  %v5285_v63 = vshrl.u32 %v5182_v37, 16  ;;  %v9385_v8 = vld [vmem:[%s10093_s21 + $0x178] sm:$0xf] }
 0x29b   : > { %v8150_v58 = vcombine.low %v4910_v31, %v4922_v61  ;;  %v5283_v4 = vrot.slane %v5281_v30, 1  ;;  %v5183_v41 = vmul.bf16 %v12429_v42, %v5129_v26  ;;  %v2723_v1 = vmul.bf16 %v9384_v0, %v11486_v16 }
 0x29c   : > { %v4938_v20 = vpop.permute.xlu0 %4937  ;;  %v5136_v51 = vor.u32 %v5134_v18, %v5133_v21  ;;  %v2722_v52 = vmul.bf16 %v9385_v8, %v12431_v15  ;;  %v5621_v61 = vrot.slane %v5613_v2, %v10396_v44  ;;  %v6447_v3 = vmul.bf16 %v9385_v8, %v11471_v48 }
 0x29d   : > { %v5139_v17 = vshrl.u32 %v8150_v58, 16  ;;  %v4946_v11 = vrot.slane %v4938_v20, %v10396_v44  ;;  %3062 = vperm.xlu0 %9237, %v2720_v23   ;;  %v5284_v9 = vsel %vm1308_vm2, %v5279_v49, %v5283_v4  ;;  %v5289_v24 = vshll.u32 %v5183_v41, 16 }
 0x29e   : > { %3074 = vperm.xlu1 %9238, %v2721_v54   ;;  %v5137_v35 = vsel %vm1141_vm0, %v5125_v40, %v5136_v51  ;;  %v5142_v57 = vshll.u32 %v8150_v58, 16  ;;  %8760 = vmatprep.mubr.msk.bf16.mxu0 %vm1453_vm1, %v5284_v9  ;;  %v5287_v60 = vor.u32 %v5285_v63, %v5283_v4  ;;  %v5637_v33 = vpop.permute.xlu1 %5636  ;;  %v5293_v7 = vshrl.u32 %v5183_v41, 16 }
 0x29f   : > { %v5141_v22 = vrot.slane %v5139_v17, 7  ;;  %v8151_v43 = vcombine.low %v4934_v13, %v4946_v11  ;;  %v5291_v14 = vrot.slane %v5289_v24, 1  ;;  %v5184_v10 = vmul.bf16 %v12430_v50, %v5137_v35  ;;  %v11670_v17 = vld [vmem:[%s10078_s10 + $0x28] sm:$0xff]  }
 0x2a0   : > { %v5625_v46 = vpop.permute.xlu0 %5624  ;;  %v5645_v16 = vrot.slane %v5637_v33, %v10396_v44  ;;  %v6448_v23 = vmul.bf16 %v9384_v0, %v11490_v34  ;;  %v8170_v49 = vcombine.low %v5621_v61, %v5621_v61 }
 0x2a1   : > { %v5144_v39 = vor.u32 %v5142_v57, %v5141_v22  ;;  %v5147_v32 = vshrl.u32 %v8151_v43, 16  ;;  %v5150_v40 = vshll.u32 %v8151_v43, 16  ;;  %6787 = vperm.xlu0 %9237, %v6445_v6   ;;  %v5292_v28 = vsel %vm1308_vm2, %v5287_v60, %v5291_v14 }
 0x2a2   : > { %6799 = vperm.xlu1 %9238, %v6446_v53   ;;  %v5297_v54 = vshll.u32 %v5184_v10, 16  ;;  %v5633_v29 = vrot.slane %v5625_v46, %v10396_v44  ;;  %8761 = vmatmul.mubr.msk.bf16.gmra.mrb[20].mxu0 %vm1453_vm1, %v5292_v28  ;;  %v5295_v37 = vor.u32 %v5293_v7, %v5291_v14  ;;  %v5661_v38 = vpop.permute.xlu1 %5660  ;;  %v5301_v56 = vshrl.u32 %v5184_v10, 16  ;;  %v11690_v28 = vld [vmem:[%s10078_s10 + $0x38] sm:$0xff]  }
 0x2a3   : > { %v5145_v59 = vsel %vm1141_vm0, %v5133_v21, %v5144_v39  ;;  %v5149_v36 = vrot.slane %v5147_v32, 7  ;;  %v5669_v34 = vrot.slane %v5661_v38, %v10396_v44  ;;  %v9274_v38 = vld [vmem:[#allocation8 + $0x78] sm:$0xff]  }
 0x2a4   : > { %v5649_v62 = vpop.permute.xlu0 %5648  ;;  %v5299_v5 = vrot.slane %v5297_v54, 1  ;;  %v5185_v55 = vmul.bf16 %v11481_v19, %v5145_v59  ;;  %v8171_v26 = vcombine.low %v5633_v29, %v5645_v16 }
 0x2a5   : > { %v5152_v31 = vor.u32 %v5150_v40, %v5149_v36  ;;  %3086 = vperm.xlu0 %9237, %v2722_v52   ;;  %v5187_v21 = vmul.bf16 0, %v5149_v36  ;;  %v5657_v4 = vrot.slane %v5649_v62, %v10396_v44  ;;  %v11683_v52 = vld [vmem:[%s10078_s10 + $0x30] sm:$0xff]  }
 0x2a6   : > { %3098 = vperm.xlu1 %9238, %v2723_v1   ;;  %v5300_v27 = vsel %vm1308_vm2, %v5295_v37, %v5299_v5  ;;  %v5305_v25 = vshll.u32 %v5185_v55, 16  ;;  %v5303_v58 = vor.u32 %v5301_v56, %v5299_v5  ;;  %v5685_v6 = vpop.permute.xlu1 %5684  ;;  %v5309_v41 = vshrl.u32 %v5185_v55, 16 }
 0x2a7   : > { %v5153_v30 = vsel %vm1141_vm0, %v5141_v22, %v5152_v31  ;;  %8764 = vmatprep.mubr.msk.bf16.mxu0 %vm1453_vm1, %v5300_v27  ;;  %v6093_v13 = vmul.bf16 %v11670_v17, %v8171_v26  ;;  %v5693_v2 = vrot.slane %v5685_v6, %v10396_v44  ;;  %v5321_v9 = vshll.u32 %v5187_v21, 16  ;;  %v11677_v22 = vld [vmem:[%s10078_s10 + $0x20] sm:$0xff]  }
 0x2a8   : > { %v5673_v18 = vpop.permute.xlu0 %5672  ;;  %v5307_v20 = vrot.slane %v5305_v25, 1  ;;  %v5186_v48 = vmul.bf16 %v11505_v12, %v5153_v30  ;;  %v6092_v57 = vmul.bf16 %v11677_v22, %v8170_v49  ;;  %v8172_v46 = vcombine.low %v5657_v4, %v5669_v34  ;;  %v11706_v30 = vld [vmem:[%s10078_s10 + $0x48] sm:$0xff]  }
 0x2a9   : > { %6811 = vperm.xlu0 %9237, %v6447_v3   ;;  %v5681_v11 = vrot.slane %v5673_v18, %v10396_v44  ;;  %v6132_v50 = vrot.slane %v6093_v13, 4  ;;  %v5323_v1 = vrot.slane %v5321_v9, 1  ;;  %v11699_v3 = vld [vmem:[%s10078_s10 + $0x40] sm:$0xff]  }
 0x2aa   : > { %6823 = vperm.xlu1 %9238, %v6448_v23   ;;  %v5308_v42 = vsel %vm1308_vm2, %v5303_v58, %v5307_v20  ;;  %v5313_v51 = vshll.u32 %v5186_v48, 16  ;;  %v5311_v63 = vor.u32 %v5309_v41, %v5307_v20  ;;  %v5317_v35 = vshrl.u32 %v5186_v48, 16  ;;  %v5709_v43 = vpop.permute.xlu1 %5708 }
 0x2ab   : > { %8765 = vmatmul.mubr.msk.bf16.gmra.mrb[24].mxu0 %vm1453_vm1, %v5308_v42  ;;  %v8173_v10 = vcombine.low %v5681_v11, %v5693_v2  ;;  %v6131_v8 = vrot.slane %v6092_v57, 4  ;;  %v6094_v39 = vmul.bf16 %v11683_v52, %v8172_v46  ;;  %v5717_v33 = vrot.slane %v5709_v43, %v10396_v44 }
 0x2ac   : > { %v5697_v53 = vpop.permute.xlu0 %5696  ;;  %v5315_v24 = vrot.slane %v5313_v51, 1  ;;  %v11716_v51 = vld [vmem:[%s10078_s10 + $0x50] sm:$0xff]  }
 0x2ad   : > { %v5705_v32 = vrot.slane %v5697_v53, %v10396_v44  ;;  %v6095_v7 = vmul.bf16 %v11690_v28, %v8173_v10  ;;  %v6133_v36 = vsel %vm2405_vm3, %v6131_v8, %v6132_v50  ;;  %v6134_v62 = vrot.slane %v6094_v39, 4 }
 0x2ae   : > { %v5316_v60 = vsel %vm1308_vm2, %v5311_v63, %v5315_v24  ;;  %v5319_v14 = vor.u32 %v5317_v35, %v5315_v24 }
 0x2af   : > { %8768 = vmatprep.mubr.msk.bf16.mxu0 %vm1453_vm1, %v5316_v60  ;;  %v5733_v15 = vpop.permute.xlu1 %5732  ;;  %v8174_v37 = vcombine.low %v5705_v32, %v5717_v33  ;;  %v6136_v5 = vrot.slane %v6095_v7, 4  ;;  %v6135_v25 = vsel %vm2405_vm3, %v6132_v50, %v6134_v62  ;;  %v11739_v33 = vld [vmem:[%s10078_s10 + $0x68] sm:$0xff]  }
 0x2b0   : > { %v5721_v0 = vpop.permute.xlu0 %5720  ;;  %v5324_v40 = vsel %vm1308_vm2, %v5319_v14, %v5323_v1  ;;  %v5741_v59 = vrot.slane %v5733_v15, %v10396_v44  ;;  %v11732_v1 = vld [vmem:[%s10078_s10 + $0x60] sm:$0xff]  }
 0x2b1   : > { %v5729_v54 = vrot.slane %v5721_v0, %v10396_v44  ;;  %v6096_v27 = vmul.bf16 %v11699_v3, %v8174_v37  ;;  %v6137_v58 = vsel %vm2405_vm3, %v6134_v62, %v6136_v5 }
 0x2b3   : > { %8769 = vmatmul.mubr.msk.bf16.gmra.mrb[28].mxu0 %vm1453_vm1, %v5324_v40  ;;  %v5757_v16 = vpop.permute.xlu1 %5756  ;;  %v8175_v55 = vcombine.low %v5729_v54, %v5741_v59  ;;  %v6138_v49 = vrot.slane %v6096_v27, 4  ;;  %v11750_v27 = vld [vmem:[%s10078_s10 + $0x70] sm:$0xff]  }
 0x2b4   : > { %v5745_v29 = vpop.permute.xlu0 %5744  ;;  %8776 = vmatprep.mubr.msk.bf16.mxu0 %vm1453_vm1, %v6133_v36  ;;  %v5765_v56 = vrot.slane %v5757_v16, %v10396_v44 }
 0x2b5   : > { %v5753_v23 = vrot.slane %v5745_v29, %v10396_v44  ;;  %v6097_v26 = vmul.bf16 %v11706_v30, %v8175_v55  ;;  %v6139_v9 = vsel %vm2405_vm3, %v6136_v5, %v6138_v49 }
 0x2b7   : > { %v5781_v61 = vpop.permute.xlu1 %5780  ;;  %v8176_v4 = vcombine.low %v5753_v23, %v5765_v56  ;;  %v6140_v6 = vrot.slane %v6097_v26, 4 }
 0x2b8   : > { %v5769_v31 = vpop.permute.xlu0 %5768  ;;  %v5789_v18 = vrot.slane %v5781_v61, %v10396_v44 }
 0x2b9   : > { %v5777_v21 = vrot.slane %v5769_v31, %v10396_v44  ;;  %v6098_v13 = vmul.bf16 %v11716_v51, %v8176_v4  ;;  %v6141_v35 = vsel %vm2405_vm3, %v6138_v49, %v6140_v6 }
 0x2bb   : > { %8777 = vmatmul.mubr.msk.bf16.vlgmr.msra.gmra.mrb[0].mxu0 %vm1453_vm1, %v6135_v25  ;;  %v5805_v48 = vpop.permute.xlu1 %5804  ;;  %v8177_v34 = vcombine.low %v5777_v21, %v5789_v18  ;;  %v6142_v46 = vrot.slane %v6098_v13, 4  ;;  %v11755_v25 = vld [vmem:[%s10078_s10 + $0x78] sm:$0xff]  }
 0x2bc   : > { %v5793_v20 = vpop.permute.xlu0 %5792  ;;  %8780 = vmatprep.mubr.msk.bf16.mxu0 %vm1453_vm1, %v6137_v58  ;;  %8809 = vmatpush3.bf16.msra.mxu0 %v11554_v45  ;;  %v5813_v2 = vrot.slane %v5805_v48, %v10396_v44  ;;  %v11723_v45 = vld [vmem:[%s10078_s10 + $0x58] sm:$0xff]   ;;  %s12436_s10 = sld [smem:[#allocation34_spill]] }
 0x2bd   : > { %8810 = vmatprep.subr.bf16.mxu0 %v9274_v38  ;;  %v5801_v11 = vrot.slane %v5793_v20, %v10396_v44  ;;  %v6099_v53 = vmul.bf16 %v11723_v45, %v8177_v34  ;;  %v6143_v32 = vsel %vm2405_vm3, %v6140_v6, %v6142_v46 }
 0x2bf   : > { %v5829_v41 = vpop.permute.xlu1 %5828  ;;  %v8178_v60 = vcombine.low %v5801_v11, %v5813_v2  ;;  %v6144_v14 = vrot.slane %v6099_v53, 4 }
 0x2c0   : > { %v5817_v42 = vpop.permute.xlu0 %5816  ;;  %8811 = vmatpush3.bf16.msra.mxu0 %v9274_v38  ;;  %v5837_v24 = vrot.slane %v5829_v41, %v10396_v44  ;;  %v11764_v41 = vld [vmem:[%s10086_s15] sm:$0xff]  }
 0x2c1   : > { %v5825_v63 = vrot.slane %v5817_v42, %v10396_v44  ;;  %v6100_v8 = vmul.bf16 %v11732_v1, %v8178_v60  ;;  %v6145_v59 = vsel %vm2405_vm3, %v6142_v46, %v6144_v14 }
 0x2c2   : > { %p12438_p12 = scmp.ne.s32.totalorder %s12436_s10, 0 }
 0x2c3   : > { %8781 = vmatmul.mubr.msk.bf16.gmra.mrb[4].mxu0 %vm1453_vm1, %v6139_v9  ;;  %v5853_v43 = vpop.permute.xlu1 %5852  ;;  %v8179_v50 = vcombine.low %v5825_v63, %v5837_v24  ;;  %v6146_v16 = vrot.slane %v6100_v8, 4 }
 0x2c4   : > { %v5841_v57 = vpop.permute.xlu0 %5840  ;;  %8784 = vmatprep.mubr.msk.bf16.mxu0 %vm1453_vm1, %v6141_v35  ;;  %v5861_v39 = vrot.slane %v5853_v43, %v10396_v44  ;;  %v11773_v35 = vld [vmem:[%s10086_s15 + $0x8] sm:$0xff]  }
 0x2c5   : > { %v5849_v15 = vrot.slane %v5841_v57, %v10396_v44  ;;  %v6101_v40 = vmul.bf16 %v11739_v33, %v8179_v50  ;;  %v6147_v56 = vsel %vm2405_vm3, %v6144_v14, %v6146_v16 }
 0x2c7   : > { %v5877_v0 = vpop.permute.xlu1 %5876  ;;  %v8180_v62 = vcombine.low %v5849_v15, %v5861_v39  ;;  %v6148_v37 = vrot.slane %v6101_v40, 4 }
 0x2c8   : > { %v5865_v10 = vpop.permute.xlu0 %5864  ;;  %v5885_v54 = vrot.slane %v5877_v0, %v10396_v44 }
 0x2c9   : > { %v5873_v7 = vrot.slane %v5865_v10, %v10396_v44  ;;  %v6102_v23 = vmul.bf16 %v11750_v27, %v8180_v62  ;;  %v6149_v58 = vsel %vm2405_vm3, %v6146_v16, %v6148_v37 }
 0x2cb   : > { %8785 = vmatmul.mubr.msk.bf16.gmra.mrb[8].mxu0 %vm1453_vm1, %v6143_v32  ;;  %v5901_v29 = vpop.permute.xlu1 %5900  ;;  %v8181_v5 = vcombine.low %v5873_v7, %v5885_v54  ;;  %v6150_v4 = vrot.slane %v6102_v23, 4 }
 0x2cc   : > { %v5889_v36 = vpop.permute.xlu0 %5888  ;;  %8788 = vmatprep.mubr.msk.bf16.mxu0 %vm1453_vm1, %v6145_v59  ;;  %v5909_v61 = vrot.slane %v5901_v29, %v10396_v44 }
 0x2cd   : > { %v5897_v31 = vrot.slane %v5889_v36, %v10396_v44  ;;  %v6103_v26 = vmul.bf16 %v11755_v25, %v8181_v5  ;;  %v6151_v24 = vsel %vm2405_vm3, %v6148_v37, %v6150_v4 }
 0x2cf   : > { %v5925_v38 = vpop.permute.xlu1 %5924  ;;  %v8182_v48 = vcombine.low %v5897_v31, %v5909_v61  ;;  %v6152_v6 = vrot.slane %v6103_v26, 4 }
 0x2d0   : > { %v5913_v55 = vpop.permute.xlu0 %5912  ;;  %v5933_v18 = vrot.slane %v5925_v38, %v10396_v44 }
 0x2d1   : > { %v5921_v21 = vrot.slane %v5913_v55, %v10396_v44  ;;  %v6104_v13 = vmul.bf16 %v11764_v41, %v8182_v48  ;;  %v6153_v43 = vsel %vm2405_vm3, %v6150_v4, %v6152_v6 }
 0x2d3   : > { %8789 = vmatmul.mubr.msk.bf16.gmra.mrb[12].mxu0 %vm1453_vm1, %v6147_v56  ;;  %v5949_v49 = vpop.permute.xlu1 %5948  ;;  %v8183_v34 = vcombine.low %v5921_v21, %v5933_v18  ;;  %v6154_v14 = vrot.slane %v6104_v13, 4 }
 0x2d4   : > { %v5937_v20 = vpop.permute.xlu0 %5936  ;;  %8792 = vmatprep.mubr.msk.bf16.mxu0 %vm1453_vm1, %v6149_v58  ;;  %v5957_v2 = vrot.slane %v5949_v49, %v10396_v44 }
 0x2d5   : > { %v5945_v11 = vrot.slane %v5937_v20, %v10396_v44  ;;  %v6105_v57 = vmul.bf16 %v11773_v35, %v8183_v34  ;;  %v6155_v62 = vsel %vm2405_vm3, %v6152_v6, %v6154_v14 }
 0x2d7   : > { %v8184_v50 = vcombine.low %v5945_v11, %v5957_v2  ;;  %v6156_v32 = vrot.slane %v6105_v57, 4 }
 0x2d8   : > { %v6452_v42 = vpop.permute.xlu0 %6451  ;;  %v6464_v53 = vpop.permute.xlu1 %6463 }
 0x2d9   : > { %v6460_v9 = vrot.slane %v6452_v42, %v10396_v44  ;;  %v6472_v63 = vrot.slane %v6464_v53, %v10396_v44  ;;  %v6106_v36 = vmul.bf16 %v11481_v19, %v8184_v50  ;;  %v6157_v61 = vsel %vm2405_vm3, %v6154_v14, %v6156_v32 }
 0x2db   : > { %8793 = vmatmul.mubr.msk.bf16.gmra.mrb[16].mxu0 %vm1453_vm1, %v6151_v24  ;;  %v8205_v46 = vcombine.low %v6460_v9, %v6472_v63  ;;  %v6158_v21 = vrot.slane %v6106_v36, 4 }
 0x2dc   : > { %v6476_v60 = vpop.permute.xlu0 %6475  ;;  %8796 = vmatprep.mubr.msk.bf16.mxu0 %vm1453_vm1, %v6153_v43  ;;  %v6488_v0 = vpop.permute.xlu1 %6487 }
 0x2dd   : > { %v6484_v10 = vrot.slane %v6476_v60, %v10396_v44  ;;  %v6914_v8 = vshrl.u32 %v8205_v46, 16  ;;  %v6917_v15 = vshll.u32 %v8205_v46, 16  ;;  %v6496_v39 = vrot.slane %v6488_v0, %v10396_v44 }
 0x2de   : > { %v6159_v43 = vsel %vm2405_vm3, %v6156_v32, %v6158_v21 }
 0x2df   : > { %v6916_v40 = vrot.slane %v6914_v8, 3  ;;  %v6919_v7 = vrot.slane %v6917_v15, 4  ;;  %v8206_v54 = vcombine.low %v6484_v10, %v6496_v39 }
 0x2e0   : > { %v6500_v59 = vpop.permute.xlu0 %6499  ;;  %v6512_v16 = vpop.permute.xlu1 %6511 }
 0x2e1   : > { %v6508_v29 = vrot.slane %v6500_v59, %v10396_v44  ;;  %v6920_v37 = vor.u32 %v6919_v7, %v6916_v40  ;;  %v6922_v5 = vshrl.u32 %v8206_v54, 16  ;;  %v6925_v55 = vshll.u32 %v8206_v54, 16 }
 0x2e2   : > { %v6520_v31 = vrot.slane %v6512_v16, %v10396_v44 }
 0x2e3   : > { %8797 = vmatmul.mubr.msk.bf16.gmra.mrb[20].mxu0 %vm1453_vm1, %v6155_v62  ;;  %v7073_v38 = vmul.bf16 %v11677_v22, %v6920_v37  ;;  %v6924_v23 = vrot.slane %v6922_v5, 3  ;;  %v6927_v56 = vrot.slane %v6925_v55, 4 }
 0x2e4   : > { %v8207_v26 = vcombine.low %v6508_v29, %v6520_v31  ;;  %v5961_v19 = vpop.permute.xlu0 %5960  ;;  %8800 = vmatprep.mubr.msk.bf16.mxu0 %vm1453_vm1, %v6157_v61  ;;  %v5973_v58 = vpop.permute.xlu1 %5972 }
 0x2e5   : > { %v5969_v18 = vrot.slane %v5961_v19, %v10396_v44  ;;  %v6928_v20 = vor.u32 %v6927_v56, %v6924_v23  ;;  %v5981_v4 = vrot.slane %v5973_v58, %v10396_v44  ;;  %v7096_v6 = vshrl.u32 %v7073_v38, 16 }
 0x2e6   : > { %v6931_v48 = vshrl.u32 %v8207_v26, 16  ;;  %v6934_v49 = vshll.u32 %v8207_v26, 16  ;;  %v7099_v53 = vshll.u32 %v7073_v38, 16 }
 0x2e7   : > { %v6929_v34 = vsel %vm3188_vm4, %v6920_v37, %v6928_v20  ;;  %v8185_v13 = vcombine.low %v5969_v18, %v5981_v4  ;;  %v7098_v0 = vrot.slane %v7096_v6, 4 }
 0x2e8   : > { %v6933_v42 = vrot.slane %v6931_v48, 3  ;;  %v6936_v22 = vrot.slane %v6934_v49, 4  ;;  %v5985_v11 = vpop.permute.xlu0 %5984  ;;  %v7074_v9 = vmul.bf16 %v11670_v17, %v6929_v34  ;;  %v7101_v39 = vrot.slane %v7099_v53, 5 }
 0x2e9   : > { %v6524_v2 = vpop.permute.xlu1 %6523  ;;  %v6107_v24 = vmul.bf16 %v11505_v12, %v8185_v13  ;;  %v5993_v57 = vrot.slane %v5985_v11, %v10396_v44 }
 0x2ea   : > { %v6937_v63 = vor.u32 %v6936_v22, %v6933_v42  ;;  %v7104_v46 = vshrl.u32 %v7074_v9, 16  ;;  %v7107_v60 = vshll.u32 %v7074_v9, 16  ;;  %v6532_v54 = vrot.slane %v6524_v2, %v10396_v44 }
 0x2eb   : > { %8801 = vmatmul.mubr.msk.bf16.gmra.mrb[24].mxu0 %vm1453_vm1, %v6159_v43  ;;  %v6160_v50 = vrot.slane %v6107_v24, 4  ;;  %v8186_v10 = vcombine.low %v5993_v57, %v5993_v57  ;;  %v7102_v55 = vor.u32 %v7101_v39, %v7098_v0  ;;  %v12432_v0 = vld [vmem:[#allocation62_spill] sm:$0xff] }
 0x2ec   : > { %v6938_v14 = vsel %vm3188_vm4, %v6928_v20, %v6937_v63  ;;  %v6536_v17 = vpop.permute.xlu0 %6535  ;;  %v7106_v40 = vrot.slane %v7104_v46, 4  ;;  %v7109_v12 = vrot.slane %v7107_v60, 5 }
 0x2ed   : > { %v7075_v8 = vmul.bf16 %v11683_v52, %v6938_v14  ;;  %v6548_v15 = vpop.permute.xlu1 %6547  ;;  %v6108_v7 = vmul.bf16 0, %v8186_v10  ;;  %v6544_v32 = vrot.slane %v6536_v17, %v10396_v44  ;;  %v6161_v59 = vsel %vm2405_vm3, %v6158_v21, %v6160_v50 }
 0x2ee   : > { %8804 = vmatprep.mubr.msk.bf16.mxu0 %vm1453_vm1, %v6161_v59  ;;  %v7110_v37 = vor.u32 %v7109_v12, %v7106_v40  ;;  %v6556_v38 = vrot.slane %v6548_v15, %v10396_v44 }
 0x2ef   : > { %v7113_v36 = vshrl.u32 %v7075_v8, 16  ;;  %v7116_v29 = vshll.u32 %v7075_v8, 16  ;;  %v6162_v16 = vrot.slane %v6108_v7, 4  ;;  %v8208_v62 = vcombine.low %v6532_v54, %v6544_v32 }
 0x2f0   : > { %v6560_v52 = vpop.permute.xlu0 %6559  ;;  %v7111_v20 = vsel %vm3371_vm5, %v7102_v55, %v7110_v37  ;;  %v3023_v8 = vrot.slane %v12432_v0, %v10396_v44 }
 0x2f1   : > { %v6572_v5 = vpop.permute.xlu1 %6571  ;;  %v6940_v31 = vshrl.u32 %v8208_v62, 16  ;;  %v6943_v61 = vshll.u32 %v8208_v62, 16  ;;  %v6568_v23 = vrot.slane %v6560_v52, %v10396_v44  ;;  %v6163_v56 = vsel %vm2405_vm3, %v6160_v50, %v6162_v16 }
 0x2f2   : > { %v7115_v26 = vrot.slane %v7113_v36, 4  ;;  %v7118_v19 = vrot.slane %v7116_v29, 5  ;;  %v6580_v48 = vrot.slane %v6572_v5, %v10396_v44 }
 0x2f3   : > { %v6942_v21 = vrot.slane %v6940_v31, 3  ;;  %v6945_v18 = vrot.slane %v6943_v61, 4  ;;  %v8209_v58 = vcombine.low %v6556_v38, %v6568_v23  ;;  %8805 = vmatmul.mubr.msk.bf16.gmra.mrb[28].mxu0 %vm1453_vm1, %v6163_v56 }
 0x2f4   : > { %v6584_v49 = vpop.permute.xlu0 %6583  ;;  %8812 = vmatprep.mubr.msk.bf16.mxu0 %vm1453_vm1, %v7111_v20  ;;  %v7119_v13 = vor.u32 %v7118_v19, %v7115_v26 }
 0x2f5   : > { %v6596_v4 = vpop.permute.xlu1 %6595  ;;  %v6946_v6 = vor.u32 %v6945_v18, %v6942_v21  ;;  %v6949_v34 = vshrl.u32 %v8209_v58, 16  ;;  %v6952_v42 = vshll.u32 %v8209_v58, 16  ;;  %v6592_v22 = vrot.slane %v6584_v49, %v10396_v44 }
 0x2f6   : > { %v6604_v24 = vrot.slane %v6596_v4, %v10396_v44  ;;  %v7120_v17 = vsel %vm3371_vm5, %v7110_v37, %v7119_v13 }
 0x2f7   : > { %v6947_v11 = vsel %vm3188_vm4, %v6937_v63, %v6946_v6  ;;  %v6951_v2 = vrot.slane %v6949_v34, 3  ;;  %v6954_v9 = vrot.slane %v6952_v42, 4  ;;  %v8210_v53 = vcombine.low %v6580_v48, %v6592_v22 }
 0x2f8   : > { %v6608_v57 = vpop.permute.xlu0 %6607  ;;  %v7076_v46 = vmul.bf16 %v11690_v28, %v6947_v11 }
 0x2f9   : > { %v6620_v43 = vpop.permute.xlu1 %6619  ;;  %v6955_v60 = vor.u32 %v6954_v9, %v6951_v2  ;;  %v6958_v14 = vshrl.u32 %v8210_v53, 16  ;;  %v6961_v50 = vshll.u32 %v8210_v53, 16  ;;  %v6616_v10 = vrot.slane %v6608_v57, %v10396_v44 }
 0x2fa   : > { %v7122_v63 = vshrl.u32 %v7076_v46, 16  ;;  %v7125_v15 = vshll.u32 %v7076_v46, 16  ;;  %v6628_v28 = vrot.slane %v6620_v43, %v10396_v44 }
 0x2fb   : > { %v6956_v39 = vsel %vm3188_vm4, %v6946_v6, %v6955_v60  ;;  %v6960_v40 = vrot.slane %v6958_v14, 3  ;;  %v6963_v12 = vrot.slane %v6961_v50, 4  ;;  %v8211_v7 = vcombine.low %v6604_v24, %v6616_v10  ;;  %8813 = vmatmul.mubr.msk.bf16.vlgmr.msra.gmra.mrb[0].mxu0 %vm1453_vm1, %v7120_v17 }
 0x2fc   : > { %v6632_v54 = vpop.permute.xlu0 %6631  ;;  %v7124_v59 = vrot.slane %v7122_v63, 4  ;;  %v7127_v36 = vrot.slane %v7125_v15, 5  ;;  %v7077_v29 = vmul.bf16 %v11699_v3, %v6956_v39 }
 0x2fd   : > { %v6644_v32 = vpop.permute.xlu1 %6643  ;;  %v6964_v16 = vor.u32 %v6963_v12, %v6960_v40  ;;  %v6967_v62 = vshrl.u32 %v8211_v7, 16  ;;  %v6970_v37 = vshll.u32 %v8211_v7, 16  ;;  %v6640_v52 = vrot.slane %v6632_v54, %v10396_v44 }
 0x2fe   : > { %v6652_v5 = vrot.slane %v6644_v32, %v10396_v44  ;;  %v7128_v55 = vor.u32 %v7127_v36, %v7124_v59  ;;  %v7131_v31 = vshrl.u32 %v7077_v29, 16  ;;  %v7134_v61 = vshll.u32 %v7077_v29, 16 }
 0x2ff   : > { %v6965_v38 = vsel %vm3188_vm4, %v6955_v60, %v6964_v16  ;;  %v6969_v23 = vrot.slane %v6967_v62, 3  ;;  %v6972_v56 = vrot.slane %v6970_v37, 4  ;;  %v8212_v26 = vcombine.low %v6628_v28, %v6640_v52 }
 0x300   : > { %v6656_v19 = vpop.permute.xlu0 %6655  ;;  %v7129_v18 = vsel %vm3371_vm5, %v7119_v13, %v7128_v55  ;;  %v7133_v3 = vrot.slane %v7131_v31, 4  ;;  %v7136_v58 = vrot.slane %v7134_v61, 5  ;;  %v7078_v20 = vmul.bf16 %v11706_v30, %v6965_v38 }
 0x301   : > { %v6668_v21 = vpop.permute.xlu1 %6667  ;;  %v6973_v48 = vor.u32 %v6972_v56, %v6969_v23  ;;  %v6976_v49 = vshrl.u32 %v8212_v26, 16  ;;  %v6979_v4 = vshll.u32 %v8212_v26, 16  ;;  %v6664_v6 = vrot.slane %v6656_v19, %v10396_v44  ;;  %8816 = vmatprep.mubr.msk.bf16.mxu0 %vm1453_vm1, %v7129_v18 }
 0x302   : > { %v6676_v34 = vrot.slane %v6668_v21, %v10396_v44  ;;  %v7137_v42 = vor.u32 %v7136_v58, %v7133_v3  ;;  %v7140_v22 = vshrl.u32 %v7078_v20, 16  ;;  %v7143_v11 = vshll.u32 %v7078_v20, 16 }
 0x303   : > { %v6974_v2 = vsel %vm3188_vm4, %v6964_v16, %v6973_v48  ;;  %v6978_v9 = vrot.slane %v6976_v49, 3  ;;  %v6981_v13 = vrot.slane %v6979_v4, 4  ;;  %v8213_v53 = vcombine.low %v6652_v5, %v6664_v6 }
 0x304   : > { %v6680_v24 = vpop.permute.xlu0 %6679  ;;  %v7138_v30 = vsel %vm3371_vm5, %v7128_v55, %v7137_v42  ;;  %v7142_v43 = vrot.slane %v7140_v22, 4  ;;  %v7145_v46 = vrot.slane %v7143_v11, 5  ;;  %v7079_v60 = vmul.bf16 %v11716_v51, %v6974_v2 }
 0x305   : > { %v6692_v57 = vpop.permute.xlu1 %6691  ;;  %v6982_v14 = vor.u32 %v6981_v13, %v6978_v9  ;;  %v6985_v50 = vshrl.u32 %v8213_v53, 16  ;;  %v6988_v10 = vshll.u32 %v8213_v53, 16  ;;  %v6688_v17 = vrot.slane %v6680_v24, %v10396_v44  ;;  %8817 = vmatmul.mubr.msk.bf16.gmra.mrb[4].mxu0 %vm1453_vm1, %v7138_v30 }
 0x306   : > { %v6700_v63 = vrot.slane %v6692_v57, %v10396_v44  ;;  %v7146_v15 = vor.u32 %v7145_v46, %v7142_v43  ;;  %v7149_v39 = vshrl.u32 %v7079_v60, 16  ;;  %v7152_v40 = vshll.u32 %v7079_v60, 16 }
 0x307   : > { %v6983_v12 = vsel %vm3188_vm4, %v6973_v48, %v6982_v14  ;;  %v6987_v7 = vrot.slane %v6985_v50, 3  ;;  %v6990_v28 = vrot.slane %v6988_v10, 4  ;;  %v8214_v54 = vcombine.low %v6676_v34, %v6688_v17 }
 0x308   : > { %v6704_v32 = vpop.permute.xlu0 %6703  ;;  %v7147_v51 = vsel %vm3371_vm5, %v7137_v42, %v7146_v15  ;;  %v7151_v36 = vrot.slane %v7149_v39, 4  ;;  %v7154_v29 = vrot.slane %v7152_v40, 5  ;;  %v7080_v16 = vmul.bf16 %v11723_v45, %v6983_v12 }
 0x309   : > { %v6716_v59 = vpop.permute.xlu1 %6715  ;;  %v6991_v62 = vor.u32 %v6990_v28, %v6987_v7  ;;  %v6994_v37 = vshrl.u32 %v8214_v54, 16  ;;  %v6997_v52 = vshll.u32 %v8214_v54, 16  ;;  %v6712_v5 = vrot.slane %v6704_v32, %v10396_v44  ;;  %8820 = vmatprep.mubr.msk.bf16.mxu0 %vm1453_vm1, %v7147_v51 }
 0x30a   : > { %v6724_v55 = vrot.slane %v6716_v59, %v10396_v44  ;;  %v7155_v31 = vor.u32 %v7154_v29, %v7151_v36  ;;  %v7158_v61 = vshrl.u32 %v7080_v16, 16  ;;  %v7161_v38 = vshll.u32 %v7080_v16, 16 }
 0x30b   : > { %v6992_v23 = vsel %vm3188_vm4, %v6982_v14, %v6991_v62  ;;  %v6996_v56 = vrot.slane %v6994_v37, 3  ;;  %v6999_v26 = vrot.slane %v6997_v52, 4  ;;  %v8215_v19 = vcombine.low %v6700_v63, %v6712_v5 }
 0x30c   : > { %v6728_v21 = vpop.permute.xlu0 %6727  ;;  %v7156_v45 = vsel %vm3371_vm5, %v7146_v15, %v7155_v31  ;;  %v7160_v3 = vrot.slane %v7158_v61, 4  ;;  %v7163_v58 = vrot.slane %v7161_v38, 5  ;;  %v7081_v20 = vmul.bf16 %v11732_v1, %v6992_v23 }
 0x30d   : > { %v3027_v18 = vpop.permute.xlu1 %3026  ;;  %v7000_v48 = vor.u32 %v6999_v26, %v6996_v56  ;;  %v7003_v49 = vshrl.u32 %v8215_v19, 16  ;;  %v7006_v4 = vshll.u32 %v8215_v19, 16  ;;  %v6736_v6 = vrot.slane %v6728_v21, %v10396_v44  ;;  %8821 = vmatmul.mubr.msk.bf16.gmra.mrb[8].mxu0 %vm1453_vm1, %v7156_v45  ;;  %v12433_v26 = vld [vmem:[#allocation57_spill] sm:$0xff] }
 0x30e   : > { %v3035_v34 = vrot.slane %v3027_v18, %v10396_v44  ;;  %v7164_v42 = vor.u32 %v7163_v58, %v7160_v3  ;;  %v7167_v22 = vshrl.u32 %v7081_v20, 16  ;;  %v7170_v11 = vshll.u32 %v7081_v20, 16 }
 0x30f   : > { %v7001_v2 = vsel %vm3188_vm4, %v6991_v62, %v7000_v48  ;;  %v7005_v9 = vrot.slane %v7003_v49, 3  ;;  %v7008_v13 = vrot.slane %v7006_v4, 4  ;;  %v8216_v53 = vcombine.low %v6724_v55, %v6736_v6 }
 0x310   : > { %v8080_v24 = vcombine.low %v3023_v8, %v3035_v34  ;;  %v6740_v57 = vpop.permute.xlu0 %6739  ;;  %v7165_v43 = vsel %vm3371_vm5, %v7155_v31, %v7164_v42  ;;  %v7169_v46 = vrot.slane %v7167_v22, 4  ;;  %v7172_v60 = vrot.slane %v7170_v11, 5 }
 0x311   : > { %v6752_v30 = vpop.permute.xlu1 %6751  ;;  %v7009_v14 = vor.u32 %v7008_v13, %v7005_v9  ;;  %v7012_v50 = vshrl.u32 %v8216_v53, 16  ;;  %v7015_v10 = vshll.u32 %v8216_v53, 16  ;;  %v6748_v17 = vrot.slane %v6740_v57, %v10396_v44  ;;  %8824 = vmatprep.mubr.msk.bf16.mxu0 %vm1453_vm1, %v7165_v43 }
 0x312   : > { %v3297_v63 = vshrl.u32 %v8080_v24, 16  ;;  %v3300_v15 = vshll.u32 %v8080_v24, 16  ;;  %v6760_v39 = vrot.slane %v6752_v30, %v10396_v44  ;;  %v7173_v40 = vor.u32 %v7172_v60, %v7169_v46 }
 0x313   : > { %v7010_v0 = vsel %vm3188_vm4, %v7000_v48, %v7009_v14  ;;  %v7014_v8 = vrot.slane %v7012_v50, 3  ;;  %v7017_v12 = vrot.slane %v7015_v10, 4  ;;  %v7082_v7 = vmul.bf16 %v11739_v33, %v7001_v2 }
 0x314   : > { %v3299_v28 = vrot.slane %v3297_v63, 3  ;;  %v3302_v54 = vrot.slane %v3300_v15, 4  ;;  %v8217_v32 = vcombine.low %v6748_v17, %v6760_v39  ;;  %v3039_v59 = vpop.permute.xlu0 %3038  ;;  %v7174_v36 = vsel %vm3371_vm5, %v7164_v42, %v7173_v40 }
 0x315   : > { %v3051_v51 = vpop.permute.xlu1 %3050  ;;  %v7018_v29 = vor.u32 %v7017_v12, %v7014_v8  ;;  %v3047_v16 = vrot.slane %v3039_v59, %v10396_v44  ;;  %8825 = vmatmul.mubr.msk.bf16.gmra.mrb[12].mxu0 %vm1453_vm1, %v7174_v36  ;;  %v7176_v37 = vshrl.u32 %v7082_v7, 16  ;;  %v7179_v31 = vshll.u32 %v7082_v7, 16 }
 0x316   : > { %v3059_v62 = vrot.slane %v3051_v51, %v10396_v44  ;;  %v3303_v52 = vor.u32 %v3302_v54, %v3299_v28  ;;  %v7021_v5 = vshrl.u32 %v8217_v32, 16  ;;  %v7024_v55 = vshll.u32 %v8217_v32, 16 }
 0x317   : > { %v7019_v61 = vsel %vm3188_vm4, %v7009_v14, %v7018_v29  ;;  %v7178_v23 = vrot.slane %v7176_v37, 4  ;;  %v7083_v56 = vmul.bf16 %v11750_v27, %v7010_v0  ;;  %v7181_v58 = vrot.slane %v7179_v31, 5 }
 0x318   : > { %v8081_v38 = vcombine.low %v3047_v16, %v3059_v62  ;;  %v3304_v19 = vsel %vm3188_vm4, %v12433_v26, %v3303_v52  ;;  %v7023_v21 = vrot.slane %v7021_v5, 3  ;;  %v7026_v18 = vrot.slane %v7024_v55, 4  ;;  %v6764_v45 = vpop.permute.xlu0 %6763 }
 0x319   : > { %v6776_v3 = vpop.permute.xlu1 %6775  ;;  %v6772_v49 = vrot.slane %v6764_v45, %v10396_v44  ;;  %v7182_v34 = vor.u32 %v7181_v58, %v7178_v23  ;;  %v7185_v22 = vshrl.u32 %v7083_v56, 16  ;;  %v7188_v11 = vshll.u32 %v7083_v56, 16 }
 0x31a   : > { %v3306_v20 = vshrl.u32 %v8081_v38, 16  ;;  %v3309_v48 = vshll.u32 %v8081_v38, 16  ;;  %v6784_v4 = vrot.slane %v6776_v3, %v10396_v44  ;;  %v7027_v6 = vor.u32 %v7026_v18, %v7023_v21  ;;  %v11868_v42 = vpop.f32.mrb[0].mxu1 }
 0x31b   : > { %v11870_v53 = vpop.f32.mrb[1].mxu1  ;;  %v3361_v24 = vmul.bf16 %v11732_v1, %v3304_v19  ;;  %v7183_v30 = vsel %vm3371_vm5, %v7173_v40, %v7182_v34  ;;  %v7187_v60 = vrot.slane %v7185_v22, 4  ;;  %v7190_v14 = vrot.slane %v7188_v11, 5 }
 0x31c   : > { %v3308_v2 = vrot.slane %v3306_v20, 3  ;;  %v3311_v9 = vrot.slane %v3309_v48, 4  ;;  %v8218_v13 = vcombine.low %v6772_v49, %v6784_v4  ;;  %v7028_v57 = vsel %vm3188_vm4, %v7018_v29, %v7027_v6  ;;  %v3063_v43 = vpop.permute.xlu0 %3062  ;;  %8828 = vmatprep.mubr.msk.bf16.mxu0 %vm1453_vm1, %v7183_v30  ;;  %v11877_v15 = vpop.f32.mrb[2].mxu1 }
 0x31d   : > { %v3075_v46 = vpop.permute.xlu1 %3074  ;;  %v3071_v63 = vrot.slane %v3063_v43, %v10396_v44  ;;  %v11880_v1 = vpop.f32.mrb[3].mxu1  ;;  %v7191_v0 = vor.u32 %v7190_v14, %v7187_v60  ;;  %v3480_v8 = vshrl.u32 %v3361_v24, 16  ;;  %v3483_v40 = vshll.u32 %v3361_v24, 16 }
 0x31e   : > { %v3312_v50 = vor.u32 %v3311_v9, %v3308_v2  ;;  %v7030_v10 = vshrl.u32 %v8218_v13, 16  ;;  %v7033_v17 = vshll.u32 %v8218_v13, 16  ;;  %v3083_v39 = vrot.slane %v3075_v46, %v10396_v44 }
 0x31f   : > { %v7084_v54 = vmul.bf16 %v11755_v25, %v7019_v61  ;;  %v7192_v59 = vsel %vm3371_vm5, %v7182_v34, %v7191_v0  ;;  %v3482_v29 = vrot.slane %v3480_v8, 4  ;;  %v3485_v16 = vrot.slane %v3483_v40, 5 }
 0x320   : > { %v3313_v12 = vsel %vm3188_vm4, %v3303_v52, %v3312_v50  ;;  %v7032_v7 = vrot.slane %v7030_v10, 3  ;;  %v7035_v28 = vrot.slane %v7033_v17, 4  ;;  %v8082_v32 = vcombine.low %v3071_v63, %v3083_v39  ;;  %v6788_v51 = vpop.permute.xlu0 %6787  ;;  %8829 = vmatmul.mubr.msk.bf16.gmra.mrb[16].mxu0 %vm1453_vm1, %v7192_v59 }
 0x321   : > { %v6800_v36 = vpop.permute.xlu1 %6799  ;;  %v6796_v37 = vrot.slane %v6788_v51, %v10396_v44  ;;  %v7194_v55 = vshrl.u32 %v7084_v54, 16  ;;  %v11888_v38 = vor.u32 %v3485_v16, %v3482_v29  ;;  %v7197_v61 = vshll.u32 %v7084_v54, 16 }
 0x322   : > { %v7036_v62 = vor.u32 %v7035_v28, %v7032_v7  ;;  %v6808_v5 = vrot.slane %v6800_v36, %v10396_v44  ;;  %v3315_v52 = vshrl.u32 %v8082_v32, 16  ;;  %v3318_v31 = vshll.u32 %v8082_v32, 16  ;;  %v11890_v23 = vpop.f32.mrb[4].mxu1 }
 0x323   : > { %v7196_v19 = vrot.slane %v7194_v55, 4  ;;  %v11893_v21 = vpop.f32.mrb[5].mxu1  ;;  %v7085_v18 = vmul.bf16 %v11764_v41, %v7028_v57  ;;  %v3487_v58 = vsel %vm3371_vm5, %v11477_v47, %v11888_v38  ;;  %v7199_v20 = vrot.slane %v7197_v61, 5 }
 0x324   : > { %v7037_v56 = vsel %vm3188_vm4, %v7027_v6, %v7036_v62  ;;  %v8219_v26 = vcombine.low %v6796_v37, %v6808_v5  ;;  %v3317_v45 = vrot.slane %v3315_v52, 3  ;;  %v3320_v3 = vrot.slane %v3318_v31, 4  ;;  %v3087_v48 = vpop.permute.xlu0 %3086  ;;  %8689 = vmatmul.mubr.msk.bf16.gmra.mrb[20].mxu1 %vm1453_vm1, %v3487_v58  ;;  %v11902_v11 = vpop.f32.mrb[6].mxu1 }
 0x325   : > { %v3099_v49 = vpop.permute.xlu1 %3098  ;;  %v3095_v6 = vrot.slane %v3087_v48, %v10396_v44  ;;  %v7200_v9 = vor.u32 %v7199_v20, %v7196_v19  ;;  %v11904_v13 = vpop.f32.mrb[7].mxu1  ;;  %v7203_v24 = vshrl.u32 %v7085_v18, 16  ;;  %v7206_v57 = vshll.u32 %v7085_v18, 16 }
 0x326   : > { %v7039_v4 = vshrl.u32 %v8219_v26, 16  ;;  %v7042_v34 = vshll.u32 %v8219_v26, 16  ;;  %v3107_v22 = vrot.slane %v3099_v49, %v10396_v44  ;;  %v3321_v2 = vor.u32 %v3320_v3, %v3317_v45 }
 0x327   : > { %v3362_v46 = vmul.bf16 %v11739_v33, %v3313_v12  ;;  %v7201_v14 = vsel %vm3371_vm5, %v7191_v0, %v7200_v9  ;;  %v7205_v10 = vrot.slane %v7203_v24, 4  ;;  %v7208_v17 = vrot.slane %v7206_v57, 5 }
 0x328   : > { %v7041_v47 = vrot.slane %v7039_v4, 3  ;;  %v7044_v30 = vrot.slane %v7042_v34, 4  ;;  %v8083_v43 = vcombine.low %v3095_v6, %v3107_v22  ;;  %v3322_v60 = vsel %vm3188_vm4, %v3312_v50, %v3321_v2  ;;  %v6812_v63 = vpop.permute.xlu0 %6811  ;;  %8832 = vmatprep.mubr.msk.bf16.mxu0 %vm1453_vm1, %v7201_v14 }
 0x329   : > { %v6824_v39 = vpop.permute.xlu1 %6823  ;;  %v6820_v28 = vrot.slane %v6812_v63, %v10396_v44  ;;  %v7209_v54 = vor.u32 %v7208_v17, %v7205_v10  ;;  %v3489_v59 = vshrl.u32 %v3362_v46, 16  ;;  %v3492_v33 = vshll.u32 %v3362_v46, 16 }
 0x32a   : > { %v7045_v8 = vor.u32 %v7044_v30, %v7041_v47  ;;  %v3324_v40 = vshrl.u32 %v8083_v43, 16  ;;  %v3327_v7 = vshll.u32 %v8083_v43, 16  ;;  %v6832_v32 = vrot.slane %v6824_v39, %v10396_v44  ;;  %v11912_v12 = vpop.f32.mrb[8].mxu1 }
 0x32b   : > { %v11915_v36 = vpop.f32.mrb[9].mxu1  ;;  %v7086_v29 = vmul.bf16 %v11773_v35, %v7037_v56  ;;  %v7210_v16 = vsel %vm3371_vm5, %v7200_v9, %v7209_v54  ;;  %v3491_v5 = vrot.slane %v3489_v59, 4  ;;  %v3494_v55 = vrot.slane %v3492_v33, 5  ;;  %v9400_v35 = vld [vmem:[%s10086_s15 + $0x10] sm:$0xff]  }
 0x32c   : > { %v7046_v50 = vsel %vm3188_vm4, %v7036_v62, %v7045_v8  ;;  %v3326_v0 = vrot.slane %v3324_v40, 3  ;;  %v3329_v51 = vrot.slane %v3327_v7, 4  ;;  %v8220_v37 = vcombine.low %v6820_v28, %v6832_v32  ;;  %v11919_v52 = vpop.f32.mrb[10].mxu1  ;;  %8833 = vmatmul.mubr.msk.bf16.gmra.mrb[20].mxu0 %vm1453_vm1, %v7210_v16 }
 0x32d   : > { %v11922_v31 = vpop.f32.mrb[11].mxu1  ;;  %v7212_v62 = vshrl.u32 %v7086_v29, 16  ;;  %v7215_v61 = vshll.u32 %v7086_v29, 16  ;;  %v3363_v26 = vmul.bf16 %v11750_v27, %v3322_v60  ;;  %v3495_v45 = vor.u32 %v3494_v55, %v3491_v5 }
 0x32e   : > { %v3330_v44 = vor.u32 %v3329_v51, %v3326_v0  ;;  %v7048_v19 = vshrl.u32 %v8220_v37, 16  ;;  %v7051_v18 = vshll.u32 %v8220_v37, 16  ;;  %v7087_v56 = vmul.bf16 %v9400_v35, %v7046_v50  ;;  %v9401_v50 = vld [vmem:[%s10086_s15 + $0x18] sm:$0xff]   ;;  %s9514_s15 = scalar_lea.vmem %s12039_s22, 2048 }
 0x32f   : > { %v7214_v20 = vrot.slane %v7212_v62, 4  ;;  %v7217_v48 = vrot.slane %v7215_v61, 5  ;;  %v3496_v34 = vsel %vm3371_vm5, %v11888_v38, %v3495_v45  ;;  %v3498_v6 = vshrl.u32 %v3363_v26, 16  ;;  %p9515_p6 = scmp.ne.s32.totalorder %s12039_s22, %s9514_s15  ;;  %p9522_p13 = scmp.lt.s32.totalorder %s9520_s19, %s9514_s15 }
 0x330   : > { %v3331_v3 = vsel %vm3188_vm4, %v3321_v2, %v3330_v44  ;;  %v3365_v58 = vmul.bf16 %v11764_v41, %v3330_v44  ;;  %v7050_v49 = vrot.slane %v7048_v19, 3  ;;  %v7053_v4 = vrot.slane %v7051_v18, 4  ;;  %8692 = vmatprep.mubr.msk.bf16.mxu1 %vm1453_vm1, %v3496_v34 }
 0x331   : > { %v7218_v27 = vor.u32 %v7217_v48, %v7214_v20  ;;  %v3501_v22 = vshll.u32 %v3363_v26, 16  ;;  %v7221_v9 = vshrl.u32 %v7087_v56, 16  ;;  %v7224_v24 = vshll.u32 %v7087_v56, 16  ;;  %p9516_p1 = pnand %p9515_p6, %p12438_p12  ;;  %p9523_p8 = por %p9522_p13, %p9521_p0 }
 0x332   : > { %v7054_v57 = vor.u32 %v7053_v4, %v7050_v49  ;;  %v3500_v47 = vrot.slane %v3498_v6, 4  ;;  %v11931_v30 = vpop.f32.mrb[12].mxu1  ;;  %v3364_v41 = vmul.bf16 %v11755_v25, %v3331_v3  ;;  %v3516_v2 = vshrl.u32 %v3365_v58, 16 }
 0x333   : > { %v7219_v43 = vsel %vm3371_vm5, %v7209_v54, %v7218_v27  ;;  %v3503_v46 = vrot.slane %v3501_v22, 5  ;;  %v11935_v60 = vpop.f32.mrb[13].mxu1  ;;  %v7223_v38 = vrot.slane %v7221_v9, 4  ;;  %v7226_v14 = vrot.slane %v7224_v24, 5  ;;  %v11965_v9 = vld [vmem:[#allocation10] ss:$0 sm:$0xff]  ;;  %p9517_p7 = pneg %p9516_p1 }
 0x334   : > { %v7055_v10 = vsel %vm3188_vm4, %v7045_v8, %v7054_v57  ;;  %v7089_v17 = vmul.bf16 0, %v7054_v57  ;;  %8836 = vmatprep.mubr.msk.bf16.mxu0 %vm1453_vm1, %v7219_v43  ;;  %v11939_v63 = vpop.f32.mrb[14].mxu1  ;;  %v3507_v39 = vshrl.u32 %v3364_v41, 16  ;;  %v3510_v40 = vshll.u32 %v3364_v41, 16 }
 0x335   : > { %v3504_v7 = vor.u32 %v3503_v46, %v3500_v47  ;;  %v11941_v25 = vpop.f32.mrb[15].mxu1  ;;  %v7227_v28 = vor.u32 %v7226_v14, %v7223_v38  ;;  %v3518_v54 = vrot.slane %v3516_v2, 4  ;;  %v3519_v32 = vshll.u32 %v3365_v58, 16  ;;  %p9524_p10 = pnand %p9523_p8, %p9517_p7 }
 0x336   : > { %v3509_v59 = vrot.slane %v3507_v39, 4  ;;  %v3512_v33 = vrot.slane %v3510_v40, 5  ;;  %v7088_v0 = vmul.bf16 %v9401_v50, %v7055_v10  ;;  %v7239_v51 = vshrl.u32 %v7089_v17, 16 }
 0x337   : > { %v3505_v8 = vsel %vm3371_vm5, %v3495_v45, %v3504_v7  ;;  %v7228_v29 = vsel %vm3371_vm5, %v7218_v27, %v7227_v28  ;;  %v3521_v16 = vrot.slane %v3519_v32, 5  ;;  %v7242_v37 = vshll.u32 %v7089_v17, 16 }
 0x338   : > { %8693 = vmatmul.mubr.msk.bf16.gmra.mrb[24].mxu1 %vm1453_vm1, %v3505_v8  ;;  %8837 = vmatmul.mubr.msk.bf16.gmra.mrb[24].mxu0 %vm1453_vm1, %v7228_v29  ;;  %v3513_v5 = vor.u32 %v3512_v33, %v3509_v59  ;;  %v7230_v55 = vshrl.u32 %v7088_v0, 16  ;;  %v7233_v44 = vshll.u32 %v7088_v0, 16  ;;  %v7241_v62 = vrot.slane %v7239_v51, 4 }
 0x339   : > { %v3522_v61 = vor.u32 %v3521_v16, %v3518_v54  ;;  %v7244_v26 = vrot.slane %v7242_v37, 5 }
 0x33a   : > { %v3514_v19 = vsel %vm3371_vm5, %v3504_v7, %v3513_v5  ;;  %v11949_v18 = vpop.f32.mrb[16].mxu1  ;;  %v7232_v35 = vrot.slane %v7230_v55, 4  ;;  %v7235_v45 = vrot.slane %v7233_v44, 5 }
 0x33b   : > { %8696 = vmatprep.mubr.msk.bf16.mxu1 %vm1453_vm1, %v3514_v19  ;;  %v11952_v56 = vpop.f32.mrb[17].mxu1  ;;  %v7245_v3 = vor.u32 %v7244_v26, %v7241_v62  ;;  %v3523_v48 = vsel %vm3371_vm5, %v3513_v5, %v3522_v61 }
 0x33c   : > { %v11954_v58 = vpop.f32.mrb[18].mxu1  ;;  %v7236_v20 = vor.u32 %v7235_v45, %v7232_v35 }
 0x33d   : > { %v11957_v49 = vpop.f32.mrb[19].mxu1 }
 0x33e   : > { %v7237_v4 = vsel %vm3371_vm5, %v7227_v28, %v7236_v20  ;;  %v7246_v34 = vsel %vm3371_vm5, %v7236_v20, %v7245_v3 }
 0x33f   : > { %8840 = vmatprep.mubr.msk.bf16.mxu0 %vm1453_vm1, %v7237_v4 }
 0x340   : > { %8697 = vmatmul.mubr.msk.bf16.gmra.mrb[28].mxu1 %vm1453_vm1, %v3523_v48  ;;  %8841 = vmatmul.mubr.msk.bf16.gmra.mrb[28].mxu0 %vm1453_vm1, %v7246_v34 }
 0x3ce   : > { %v8814_v6 = vpop.f32.mrb[0].mxu0 }
 0x3cf   : > { %v8844_v27 = vadd.f32 %v8814_v6, %v11868_v42  ;;  %v7341_v22 = vpop.f32.mrb[1].mxu0 }
 0x3d0   : > { %v8845_v24 = vadd.f32 %v7341_v22, %v11870_v53  ;;  %v8815_v57 = vpop.f32.mrb[2].mxu0 }
 0x3d1   : > { %v8846_v47 = vadd.f32 %v8815_v57, %v11877_v15  ;;  %v7344_v41 = vpop.f32.mrb[3].mxu0  ;;  %v7509_v43 = vadd.f32 %v8844_v27, %v11965_v9 }
 0x3d2   : > { %v8847_v2 = vadd.f32 %v7344_v41, %v11880_v1  ;;  %v7507_v38 = vadd.f32 %v8845_v24, %v11965_v9 }
 0x3d3   : > { %v7510_v46 = vadd.f32 %v8846_v47, %v11965_v9 }
 0x3d4   : > { %v7508_v14 = vadd.f32 %v8847_v2, %v11965_v9 }
 0x3d5   : > { %v8325_v42 = vpack.c.bf16 %v7510_v46, %v7509_v43 }
 0x3d6   : > { %v8320_v10 = vpack.c.bf16 %v7508_v14, %v7507_v38 }
 0x3d7   : > { %8397 = vst [vmem:[%s11976_s12 + $0x8] sm:$0xff] %v8325_v42  }
 0x3d8   : > { %8321 = vst [vmem:[%s11976_s12] sm:$0xff] %v8320_v10   ;;  %v8818_v53 = vpop.f32.mrb[4].mxu0 }
 0x3d9   : > { %v8848_v15 = vadd.f32 %v8818_v53, %v11890_v23  ;;  %v7357_v1 = vpop.f32.mrb[5].mxu0 }
 0x3da   : > { %v8849_v17 = vadd.f32 %v7357_v1, %v11893_v21  ;;  %v8819_v39 = vpop.f32.mrb[6].mxu0 }
 0x3db   : > { %v8850_v40 = vadd.f32 %v8819_v39, %v11902_v11  ;;  %v7360_v7 = vpop.f32.mrb[7].mxu0  ;;  %v7513_v54 = vadd.f32 %v8848_v15, %v11965_v9 }
 0x3dc   : > { %v8851_v28 = vadd.f32 %v7360_v7, %v11904_v13  ;;  %v7511_v59 = vadd.f32 %v8849_v17, %v11965_v9 }
 0x3dd   : > { %v7514_v32 = vadd.f32 %v8850_v40, %v11965_v9 }
 0x3de   : > { %v7512_v33 = vadd.f32 %v8851_v28, %v11965_v9 }
 0x3df   : > { %v8335_v50 = vpack.c.bf16 %v7514_v32, %v7513_v54 }
 0x3e0   : > { %v8330_v23 = vpack.c.bf16 %v7512_v33, %v7511_v59  ;;  %v8822_v0 = vpop.f32.mrb[8].mxu0 }
 0x3e1   : > { %8399 = vst [vmem:[%s11976_s12 + $0x18] sm:$0xff] %v8335_v50   ;;  %v8852_v21 = vadd.f32 %v8822_v0, %v11912_v12  ;;  %v7373_v51 = vpop.f32.mrb[9].mxu0 }
 0x3e2   : > { %8398 = vst [vmem:[%s11976_s12 + $0x10] sm:$0xff] %v8330_v23   ;;  %v8853_v11 = vadd.f32 %v7373_v51, %v11915_v36  ;;  %v8823_v13 = vpop.f32.mrb[10].mxu0 }
 0x3e3   : > { %v8854_v8 = vadd.f32 %v8823_v13, %v11919_v52  ;;  %v7376_v29 = vpop.f32.mrb[11].mxu0  ;;  %v7517_v37 = vadd.f32 %v8852_v21, %v11965_v9 }
 0x3e4   : > { %v8855_v16 = vadd.f32 %v7376_v29, %v11922_v31  ;;  %v7515_v55 = vadd.f32 %v8853_v11, %v11965_v9 }
 0x3e5   : > { %v7518_v5 = vadd.f32 %v8854_v8, %v11965_v9 }
 0x3e6   : > { %v7516_v44 = vadd.f32 %v8855_v16, %v11965_v9 }
 0x3e7   : > { %v8345_v12 = vpack.c.bf16 %v7518_v5, %v7517_v37 }
 0x3e8   : > { %v8340_v62 = vpack.c.bf16 %v7516_v44, %v7515_v55  ;;  %v8826_v61 = vpop.f32.mrb[12].mxu0 }
 0x3e9   : > { %8401 = vst [vmem:[%s11976_s12 + $0x28] sm:$0xff] %v8345_v12   ;;  %v8856_v36 = vadd.f32 %v8826_v61, %v11931_v30  ;;  %v7389_v52 = vpop.f32.mrb[13].mxu0 }
 0x3ea   : > { %8400 = vst [vmem:[%s11976_s12 + $0x20] sm:$0xff] %v8340_v62   ;;  %v8857_v31 = vadd.f32 %v7389_v52, %v11935_v60  ;;  %v8827_v26 = vpop.f32.mrb[14].mxu0 }
 0x3eb   : > { %v8858_v19 = vadd.f32 %v8827_v26, %v11939_v63  ;;  %v7392_v35 = vpop.f32.mrb[15].mxu0  ;;  %v7521_v3 = vadd.f32 %v8856_v36, %v11965_v9 }
 0x3ec   : > { %v8859_v45 = vadd.f32 %v7392_v35, %v11941_v25  ;;  %v7519_v48 = vadd.f32 %v8857_v31, %v11965_v9 }
 0x3ed   : > { %v7522_v20 = vadd.f32 %v8858_v19, %v11965_v9 }
 0x3ee   : > { %v7520_v4 = vadd.f32 %v8859_v45, %v11965_v9 }
 0x3ef   : > { %v8355_v34 = vpack.c.bf16 %v7522_v20, %v7521_v3 }
 0x3f0   : > { %v8350_v30 = vpack.c.bf16 %v7520_v4, %v7519_v48 }
 0x3f1   : > { %8403 = vst [vmem:[%s11976_s12 + $0x38] sm:$0xff] %v8355_v34  }
 0x3f2   : > { %8402 = vst [vmem:[%s11976_s12 + $0x30] sm:$0xff] %v8350_v30  }
 0x3f3   : > { %v8830_v6 = vpop.f32.mrb[16].mxu0 }
 0x3f4   : > { %v8860_v60 = vadd.f32 %v8830_v6, %v11949_v18  ;;  %v7405_v27 = vpop.f32.mrb[17].mxu0 }
 0x3f5   : > { %v8861_v63 = vadd.f32 %v7405_v27, %v11952_v56  ;;  %v8831_v25 = vpop.f32.mrb[18].mxu0 }
 0x3f6   : > { %v8862_v22 = vadd.f32 %v8831_v25, %v11954_v58  ;;  %v7408_v24 = vpop.f32.mrb[19].mxu0  ;;  %v7525_v41 = vadd.f32 %v8860_v60, %v11965_v9 }
 0x3f7   : > { %v8863_v57 = vadd.f32 %v7408_v24, %v11957_v49  ;;  %v8690_v47 = vpop.f32.mrb[20].mxu1  ;;  %v7523_v46 = vadd.f32 %v8861_v63, %v11965_v9 }
 0x3f8   : > { %v7526_v2 = vadd.f32 %v8862_v22, %v11965_v9  ;;  %v3698_v43 = vpop.f32.mrb[21].mxu1 }
 0x3f9   : > { %v7524_v18 = vadd.f32 %v8863_v57, %v11965_v9  ;;  %v8691_v38 = vpop.f32.mrb[22].mxu1 }
 0x3fa   : > { %v8365_v14 = vpack.c.bf16 %v7526_v2, %v7525_v41  ;;  %v3701_v56 = vpop.f32.mrb[23].mxu1 }
 0x3fb   : > { %v8360_v42 = vpack.c.bf16 %v7524_v18, %v7523_v46 }
 0x3fc   : > { %8405 = vst [vmem:[%s11976_s12 + $0x48] sm:$0xff] %v8365_v14  }
 0x3fd   : > { %8404 = vst [vmem:[%s11976_s12 + $0x40] sm:$0xff] %v8360_v42  }
 0x3ff   : > { %v8834_v58 = vpop.f32.mrb[20].mxu0 }
 0x400   : > { %v8864_v49 = vadd.f32 %v8834_v58, %v8690_v47  ;;  %v7421_v10 = vpop.f32.mrb[21].mxu0 }
 0x401   : > { %v8865_v53 = vadd.f32 %v7421_v10, %v3698_v43  ;;  %v8835_v15 = vpop.f32.mrb[22].mxu0 }
 0x402   : > { %v8866_v1 = vadd.f32 %v8835_v15, %v8691_v38  ;;  %v7424_v17 = vpop.f32.mrb[23].mxu0  ;;  %v7529_v40 = vadd.f32 %v8864_v49, %v11965_v9 }
 0x403   : > { %v8867_v39 = vadd.f32 %v7424_v17, %v3701_v56  ;;  %v7527_v28 = vadd.f32 %v8865_v53, %v11965_v9 }
 0x404   : > { %v7530_v7 = vadd.f32 %v8866_v1, %v11965_v9 }
 0x405   : > { %v7528_v54 = vadd.f32 %v8867_v39, %v11965_v9 }
 0x406   : > { %v8375_v32 = vpack.c.bf16 %v7530_v7, %v7529_v40 }
 0x407   : > { %v8370_v59 = vpack.c.bf16 %v7528_v54, %v7527_v28 }
 0x408   : > { %8407 = vst [vmem:[%s11976_s12 + $0x58] sm:$0xff] %v8375_v32  }
 0x409   : > { %8406 = vst [vmem:[%s11976_s12 + $0x50] sm:$0xff] %v8370_v59  }
 0x40b   : > { %v8694_v33 = vpop.f32.mrb[24].mxu1  ;;  %v8838_v50 = vpop.f32.mrb[24].mxu0 }
 0x40c   : > { %v3714_v23 = vpop.f32.mrb[25].mxu1  ;;  %v8868_v0 = vadd.f32 %v8838_v50, %v8694_v33  ;;  %v7437_v21 = vpop.f32.mrb[25].mxu0 }
 0x40d   : > { %v8695_v51 = vpop.f32.mrb[26].mxu1  ;;  %v8869_v11 = vadd.f32 %v7437_v21, %v3714_v23  ;;  %v8839_v13 = vpop.f32.mrb[26].mxu0 }
 0x40e   : > { %v3717_v8 = vpop.f32.mrb[27].mxu1  ;;  %v8870_v29 = vadd.f32 %v8839_v13, %v8695_v51  ;;  %v7440_v16 = vpop.f32.mrb[27].mxu0  ;;  %v7533_v5 = vadd.f32 %v8868_v0, %v11965_v9 }
 0x40f   : > { %v8871_v37 = vadd.f32 %v7440_v16, %v3717_v8  ;;  %v7531_v44 = vadd.f32 %v8869_v11, %v11965_v9 }
 0x410   : > { %v7534_v55 = vadd.f32 %v8870_v29, %v11965_v9 }
 0x411   : > { %v7532_v12 = vadd.f32 %v8871_v37, %v11965_v9 }
 0x412   : > { %v8385_v62 = vpack.c.bf16 %v7534_v55, %v7533_v5 }
 0x413   : > { %v8380_v61 = vpack.c.bf16 %v7532_v12, %v7531_v44  ;;  %v8698_v36 = vpop.f32.mrb[28].mxu1  ;;  %v8842_v52 = vpop.f32.mrb[28].mxu0 }
 0x414   : > { %8409 = vst [vmem:[%s11976_s12 + $0x68] sm:$0xff] %v8385_v62   ;;  %v3730_v31 = vpop.f32.mrb[29].mxu1  ;;  %v8872_v26 = vadd.f32 %v8842_v52, %v8698_v36  ;;  %v7453_v19 = vpop.f32.mrb[29].mxu0 }
 0x415   : > { %8408 = vst [vmem:[%s11976_s12 + $0x60] sm:$0xff] %v8380_v61   ;;  %v8699_v35 = vpop.f32.mrb[30].mxu1  ;;  %v8873_v45 = vadd.f32 %v7453_v19, %v3730_v31  ;;  %v8843_v3 = vpop.f32.mrb[30].mxu0 }
 0x416   : > { %v3733_v20 = vpop.f32.mrb[31].mxu1  ;;  %v8874_v48 = vadd.f32 %v8843_v3, %v8699_v35  ;;  %v7456_v4 = vpop.f32.mrb[31].mxu0  ;;  %v7537_v30 = vadd.f32 %v8872_v26, %v11965_v9 }
 0x417   : > { %v8875_v34 = vadd.f32 %v7456_v4, %v3733_v20  ;;  %v7535_v60 = vadd.f32 %v8873_v45, %v11965_v9 }
 0x418   : > { %v7538_v6 = vadd.f32 %v8874_v48, %v11965_v9 }
 0x419   : > { %v7536_v27 = vadd.f32 %v8875_v34, %v11965_v9 }
 0x41a   : > { %v8395_v63 = vpack.c.bf16 %v7538_v6, %v7537_v30 }
 0x41b   : > { %v8390_v25 = vpack.c.bf16 %v7536_v27, %v7535_v60 }
 0x41c   : > { %8411 = vst [vmem:[%s11976_s12 + $0x78] sm:$0xff] %v8395_v63  }
 0x41d   : > { %8410 = vst [vmem:[%s11976_s12 + $0x70] sm:$0xff] %v8390_v25  }
 0x41e   : > { %9527 = shalt.err (!%p9524_p10)
}
 0x41f   : > { %s9528_s7 = scalar_lea.hbm %s12044_s0, 2048  ;;  %s9532_s11 = scalar_lea.hbm %s12437_s14, 8192 }
 0x420   : > { %p9529_p3 = scmp.ne.s32.totalorder %s12044_s0, %s9528_s7  ;;  %p9533_p2 = scmp.lt.u32.totalorder %s12044_s0, %s12437_s14 }
 0x421   : > { %p9534_p9 = scmp.lt.u32.totalorder %s9532_s11, %s9528_s7  ;;  %p9536_p6 = scmp.lt.u32.totalorder %s9528_s7, %s12044_s0 }
 0x422   : > { %p9530_p5 = pnand %p9529_p3, %p12438_p12 }
 0x423   : > { %p9535_p11 = por %p9534_p9, %p9533_p2 }
 0x424   : > { %p9531_p4 = pneg %p9530_p5 }
 0x425   : > { %p9537_p1 = por %p9536_p6, %p9535_p11 }
 0x427   : > { %p9538_p7 = pnand %p9537_p1, %p9531_p4 }
 0x429   : > { %9541 = shalt.err (!%p9538_p7)
}
 0x42a   : > { %s9691_s13 = smov 64   ;;  %s9692_s16 = smov 4  }
 0x42b   : > { %9091 = dma.vmem_to_hbm [thread:$0]  (%p12438_p12), %s12039_s22, 2048, %s12044_s0, %s7700_s3, %s9691_s13, %s9691_s13, %s9692_s16  }
 0x42c PF: > { %s12439_s18 = sld [smem:[#allocation22_spill]]  ;;  %p9108_p0 = scmp.ge.s32.totalorder %s9672_s6, 2 }
 0x42d   : > { %s12440_s17 = sld [smem:[#allocation35_spill]] }
 0x432   : > { %s7730_s5 = sand.u32 1, %s12439_s18  }
 0x433   : > { %p12441_p13 = scmp.ne.s32.totalorder %s12440_s17, 0  ;;  %s7731_s15 = scalar_lea.sflag [#allocation4], %s7730_s5 }
 0x435   : > { %p9101_p8 = pnand %p9108_p0, %p12441_p13 }
 0x437   : > { %9615 = dma.done.wait (!%p9101_p8), %s7731_s15, 2048  }
 0x438   : > { %9617 = vsyncadd (!%p9101_p8), %s7731_s15, 4294965248  ;;  %s25_s6 = sadd.s32 1, %s9672_s6   ;;  %s12443_s18 = sld [smem:[#allocation20_spill]] }
 0x439   : > { %p12077_p10 = scmp.ge.s32.totalorder %s25_s6, 6   ;;  %s12444_s28 = sld [smem:[#allocation31_spill]] }
 0x43a   : > { %s12445_s21 = sld [smem:[#allocation21_spill]]  ;;  %s12446_s10 = sld [smem:[#allocation32_spill]] }
 0x43b   : > { %s12447_s0 = sld [smem:[#allocation29_spill]]  ;;  %s12448_s3 = sld [smem:[#allocation26_spill]] }
 0x43c   : > { %s12449_s7 = sld [smem:[#allocation27_spill]]  ;;  %s12450_s19 = smov %s9628_s20 }
 0x43d   : > { %s12452_s22 = smov %s9640_s23  ;;  %s12454_s24 = smov %s9648_s25 }
 0x43e   : > { %s12455_s25 = smov %s9652_s26  ;;  %s12457_s27 = smov %s9664_s29 }
 0x43f   : > { %s12451_s20 = smov %s12444_s28  ;;  %s12458_s28 = smov %s9668_s30 }
 0x440   : > { %s12453_s23 = smov %s12446_s10  ;;  %24 = sbr.rel (!%p12077_p10) target bundleno = 17 (0x11), region = 131 }
 0x441   : > { %s12456_s26 = smov %s12447_s0  ;;  %s12459_s29 = smov %s12448_s3 }
 0x442   : > { %s12460_s30 = smov %s12449_s7 }
 0x447   :  { %7736 = vsyncpa [#allocation3], 1 }
 0x448   :  { %7738 = vsyncpa [#allocation3 + $0x1], 1 }
 0x449   :  { %7739 = vsyncpa [#allocation6], 1 }
 0x44a   :  { %7741 = vsyncpa [#allocation6 + $0x1], 1 }
 0x44b   :  { %7742 = vsyncpa [#allocation9], 1 }
 0x44c   :  { %7743 = vsyncpa [#allocation4], 1 }
 0x44d   :  { %7745 = vsyncpa [#allocation4 + $0x1], 1 }

</bundles_post_ra>
